<compile_context>
chip_gen: v7x
topology: tpu7x:2x2x1
jax: 0.10.0
libtpu: 0.0.40
codegen_flags: <defaults>
</compile_context>

<pallas_src>
import functools

import jax
import jax.numpy as jnp
from jax.experimental import pallas as pl
from jax.experimental.pallas import tpu as pltpu

# ---- synthetic SigLIP-style ViT config (small) ----
IMG = 16                     # default_image_size (small synthetic)
PATCH = 4
C_IN = 3
GRID = IMG // PATCH
N_TOK = GRID * GRID          # 16 patch tokens (no CLS token in SigLIP)
PDIM = C_IN * PATCH * PATCH  # 48
D = 32                       # embed dim
HEADS = 4
HEAD_DIM = D // HEADS
MLP = 4 * D                  # 128
DEPTH = 3
FEATURE_INDEX = 2            # get_intermediate_layers(n={FEATURE_INDEX})
LN_EPS = 1e-6                # timm SigLIP ViT LayerNorm eps
LANE = 128                   # TPU lane width; I/O last dims padded to this
MXU_DTYPE = jnp.bfloat16     # matmul-operand dtype (f32 accumulate)


def _layer_norm(x, g, b):
    mu = jnp.mean(x, axis=-1, keepdims=True)
    xc = x - mu
    var = jnp.mean(xc * xc, axis=-1, keepdims=True)
    return xc * jax.lax.rsqrt(var + LN_EPS) * g + b


# -------------- fused forward kernel (patch-embed + all blocks) --------------
def _fused_kernel(patches_ref, pw_ref, pb_ref, pos_ref,
                  ln1g_ref, ln1b_ref, wqkv_ref, bqkv_ref, wo_ref, bo_ref,
                  ln2g_ref, ln2b_ref, w1_ref, b1_ref, w2_ref, b2_ref,
                  o_ref, *, b_t):
    n_layers = ln1g_ref.shape[0]
    T = b_t * N_TOK
    cdt = pw_ref.dtype           # MXU operand dtype (bf16); accumulation is f32

    # ---- patch embed. Input block (b_t, N_TOK, 128) -> unmasked lane-dense
    # loads. Normalize(0.5, 0.5) folded into pw/pb at trace time; padded input
    # lanes are zero and the matching pw rows are zero, so they contribute 0.
    p = patches_ref[...].reshape(T, LANE).astype(cdt)
    x = jnp.dot(p, pw_ref[...], preferred_element_type=jnp.float32) + pb_ref[...]
    x = (x.reshape(b_t, N_TOK, D) + pos_ref[...]).reshape(T, D)

    # Static loop over VMEM-resident, stacked per-layer weights.
    for layer in range(n_layers):
        # ---- pre-norm MHSA (fused QKV; 1/sqrt(head_dim) folded into Q) ----
        h = _layer_norm(x, ln1g_ref[layer], ln1b_ref[layer])
        qkv = (jnp.dot(h.astype(cdt), wqkv_ref[layer],
                       preferred_element_type=jnp.float32) + bqkv_ref[layer])
        q3 = qkv[:, 0 * D:1 * D].reshape(b_t, N_TOK, D)
        k3 = qkv[:, 1 * D:2 * D].reshape(b_t, N_TOK, D)
        v3 = qkv[:, 2 * D:3 * D].reshape(b_t, N_TOK, D)

        # Attention batched over images (leading einsum batch dim): no
        # cross-image mask, per-head scores stay (b_t, N_TOK, N_TOK).
        head_outs = []
        for hd in range(HEADS):
            sl = slice(hd * HEAD_DIM, (hd + 1) * HEAD_DIM)
            qh, kh, vh = q3[:, :, sl], k3[:, :, sl], v3[:, :, sl]
            s = jnp.einsum('bnd,bmd->bnm', qh, kh,
                           preferred_element_type=jnp.float32)
            s = s - jnp.max(s, axis=-1, keepdims=True)
            pr = jnp.exp(s)
            pr = pr * pl.reciprocal(jnp.sum(pr, axis=-1, keepdims=True),
                                    approx=True)
            head_outs.append(jnp.einsum('bnm,bmd->bnd', pr, vh,
                                        preferred_element_type=jnp.float32))
        attn = jnp.concatenate(head_outs, axis=-1).reshape(T, D)
        attn = (jnp.dot(attn.astype(cdt), wo_ref[layer],
                        preferred_element_type=jnp.float32) + bo_ref[layer])
        x = x + attn

        # ---- pre-norm MLP ----
        h2 = _layer_norm(x, ln2g_ref[layer], ln2b_ref[layer])
        m = (jnp.dot(h2.astype(cdt), w1_ref[layer],
                     preferred_element_type=jnp.float32) + b1_ref[layer])
        # TODO(synk): timm SigLIP uses exact erf-GELU; tanh-approximate GELU here.
        m = jax.nn.gelu(m, approximate=True)
        m = (jnp.dot(m.astype(cdt), w2_ref[layer],
                     preferred_element_type=jnp.float32) + b2_ref[layer])
        x = x + m

    # Lane-dense output block (b_t, N_TOK, 128): pad D->128 lanes so the store
    # is an unmasked full-width vst; the wrapper slices the first D lanes out.
    x3 = x.reshape(b_t, N_TOK, D)
    pad = jnp.zeros((b_t, N_TOK, LANE - D), jnp.float32)
    o_ref[...] = jnp.concatenate([x3, pad], axis=-1)


# -------------- wrapper-side weight prep (trace-time folds) --------------
def _prepare_fused_params(params, n_layers):
    dt = MXU_DTYPE
    # Fold Normalize(mean=0.5, std=0.5) into the patch-embed matmul:
    #   (2x - 1) @ W + b  ==  x @ (2W) + (b - colsum(W))
    pw = 2.0 * params["patch_w"]
    pb = params["patch_b"] - jnp.sum(params["patch_w"], axis=0, keepdims=True)
    # Zero-pad the patch rows to the 128-lane width (matches zero-padded input).
    pw = jnp.pad(pw, ((0, LANE - PDIM), (0, 0))).astype(dt)

    blocks = params["blocks"][:n_layers]
    scale = HEAD_DIM ** -0.5

    def stack(fn, cast=None):
        a = jnp.stack([fn(blk) for blk in blocks], axis=0)
        return a.astype(cast) if cast is not None else a

    # Fuse Q|K|V and fold the attention scale into the Q columns / bias.
    wqkv = stack(lambda b: jnp.concatenate(
        [b["wq"] * scale, b["wk"], b["wv"]], axis=1), dt)
    bqkv = stack(lambda b: jnp.concatenate(
        [b["bq"] * scale, b["bk"], b["bv"]], axis=1))

    return (pw, pb, params["pos"],
            stack(lambda b: b["ln1_g"]), stack(lambda b: b["ln1_b"]),
            wqkv, bqkv,
            stack(lambda b: b["wo"], dt), stack(lambda b: b["bo"]),
            stack(lambda b: b["ln2_g"]), stack(lambda b: b["ln2_b"]),
            stack(lambda b: b["w1"], dt), stack(lambda b: b["b1"]),
            stack(lambda b: b["w2"], dt), stack(lambda b: b["b2"]))


def _num_tensorcores():
    # Best-effort TensorCore count; falls back to 1 (correct & good on v5e/v6e).
    try:
        info = pltpu.get_tpu_info()
        for attr in ("num_cores", "core_count", "num_tensorcores",
                     "tensorcore_count"):
            v = getattr(info, attr, None)
            if isinstance(v, int) and v >= 1:
                return v
    except Exception:
        pass
    try:
        kind = jax.devices()[0].device_kind.lower()
        if any(t in kind for t in ("v7", "7x", "v5p", "v4")):
            return 2
    except Exception:
        pass
    return 1


def _pick_batch_tile(B, n_cores):
    # Single-TC chips (v5e/v6e): one grid step over the whole batch maximizes
    # matmul M-occupancy and removes per-step overhead. Megacore chips (v7x):
    # exactly n_cores steps so the parallel grid axis keeps every core busy.
    if n_cores >= 2 and B >= n_cores and B % n_cores == 0:
        return B // n_cores
    return B


def extract_patches(img):
    # img: [B, C, H, W] (NCHW, like PyTorch). Non-overlapping PATCHxPATCH
    # patches, flattened channel-major to match Conv2d weight layout.
    B = img.shape[0]
    x = img.reshape(B, C_IN, GRID, PATCH, GRID, PATCH)
    x = x.transpose(0, 2, 4, 1, 3, 5)            # B, gh, gw, C, Ph, Pw
    return x.reshape(B, N_TOK, PDIM)


def init_params(key):
    k_pe, k_pos, *k_blocks = jax.random.split(key, 2 + DEPTH)
    params = {
        "patch_w": jax.random.normal(k_pe, (PDIM, D), jnp.float32) * 0.02,
        "patch_b": jnp.zeros((1, D), jnp.float32),
        "pos": jax.random.normal(k_pos, (N_TOK, D), jnp.float32) * 0.02,
        "blocks": [],
    }
    for kb in k_blocks:
        k = jax.random.split(kb, 6)
        params["blocks"].append({
            "ln1_g": jnp.ones((1, D), jnp.float32),
            "ln1_b": jnp.zeros((1, D), jnp.float32),
            "wq": jax.random.normal(k[0], (D, D), jnp.float32) * 0.02,
            "bq": jnp.zeros((1, D), jnp.float32),
            "wk": jax.random.normal(k[1], (D, D), jnp.float32) * 0.02,
            "bk": jnp.zeros((1, D), jnp.float32),
            "wv": jax.random.normal(k[2], (D, D), jnp.float32) * 0.02,
            "bv": jnp.zeros((1, D), jnp.float32),
            "wo": jax.random.normal(k[3], (D, D), jnp.float32) * 0.02,
            "bo": jnp.zeros((1, D), jnp.float32),
            "ln2_g": jnp.ones((1, D), jnp.float32),
            "ln2_b": jnp.zeros((1, D), jnp.float32),
            "w1": jax.random.normal(k[4], (D, MLP), jnp.float32) * 0.02,
            "b1": jnp.zeros((1, MLP), jnp.float32),
            "w2": jax.random.normal(k[5], (MLP, D), jnp.float32) * 0.02,
            "b2": jnp.zeros((1, D), jnp.float32),
        })
    return params


@jax.jit
def siglip_encoder_forward(image_tensor, params):
    # ToPILImage -> Resize(default_image_size) -> ToTensor is the identity for
    # an input already at the default resolution in [0, 1]; Normalize(0.5, 0.5)
    # is folded into the patch-embed weights inside _prepare_fused_params.
    patches = extract_patches(image_tensor)                       # (B, N_TOK, PDIM)
    patches = jnp.pad(patches, ((0, 0), (0, 0), (0, LANE - PDIM)))  # lane-dense
    B = patches.shape[0]
    b_t = _pick_batch_tile(B, _num_tensorcores())

    # timm get_intermediate_layers(n={FEATURE_INDEX}): run blocks
    # 0..FEATURE_INDEX, return the un-normed hidden state after that block.
    fused = _prepare_fused_params(params, FEATURE_INDEX + 1)

    def full_spec(a):
        # Whole array, constant block index: DMA'd into VMEM once and reused
        # across grid steps.
        return pl.BlockSpec(a.shape, lambda i, _nd=a.ndim: (0,) * _nd)

    out = pl.pallas_call(
        functools.partial(_fused_kernel, b_t=b_t),
        out_shape=jax.ShapeDtypeStruct((B, N_TOK, LANE), jnp.float32),
        grid=(B // b_t,),
        in_specs=[pl.BlockSpec((b_t, N_TOK, LANE), lambda i: (i, 0, 0))]
                 + [full_spec(a) for a in fused],
        out_specs=pl.BlockSpec((b_t, N_TOK, LANE), lambda i: (i, 0, 0)),
        compiler_params=pltpu.CompilerParams(dimension_semantics=("parallel",)),
    )(patches, *fused)

    # Drop the lane padding; SigLIPEncoder.forward unwraps the length-1 tuple.
    return out[:, :, :D]


if __name__ == "__main__":
    key = jax.random.PRNGKey(0)
    k_img, k_params = jax.random.split(key)
    # batch=2, channels=3, spatial=16x16 image in [0, 1]
    image_tensor = jax.random.uniform(k_img, (2, C_IN, IMG, IMG), dtype=jnp.float32)
    params = init_params(k_params)
    out = siglip_encoder_forward(image_tensor, params)
    jax.block_until_ready(out)
    assert out.shape == (2, N_TOK, D), out.shape
    assert bool(jnp.all(jnp.isfinite(out)))
    print("KERNEL_OK")
</pallas_src>

<mosaic_0001>
module attributes {stable_mosaic.version = 11 : i64} {
  func.func @_fused_kernel(%arg0: i32, %arg1: memref<2x16x128xf32, #tpu.memory_space<vmem>>, %arg2: memref<128x32xbf16, #tpu.memory_space<vmem>>, %arg3: memref<1x32xf32, #tpu.memory_space<vmem>>, %arg4: memref<16x32xf32, #tpu.memory_space<vmem>>, %arg5: memref<3x1x32xf32, #tpu.memory_space<vmem>>, %arg6: memref<3x1x32xf32, #tpu.memory_space<vmem>>, %arg7: memref<3x32x96xbf16, #tpu.memory_space<vmem>>, %arg8: memref<3x1x96xf32, #tpu.memory_space<vmem>>, %arg9: memref<3x32x32xbf16, #tpu.memory_space<vmem>>, %arg10: memref<3x1x32xf32, #tpu.memory_space<vmem>>, %arg11: memref<3x1x32xf32, #tpu.memory_space<vmem>>, %arg12: memref<3x1x32xf32, #tpu.memory_space<vmem>>, %arg13: memref<3x32x128xbf16, #tpu.memory_space<vmem>>, %arg14: memref<3x1x128xf32, #tpu.memory_space<vmem>>, %arg15: memref<3x128x32xbf16, #tpu.memory_space<vmem>>, %arg16: memref<3x1x32xf32, #tpu.memory_space<vmem>>, %arg17: memref<2x16x128xf32, #tpu.memory_space<vmem>>) attributes {dimension_semantics = [#tpu.dimension_semantics<parallel>], iteration_bounds = array<i64: 1>, scalar_prefetch = 0 : i64, scratch_operands = 0 : i64, tpu.core_type = #tpu.core_type<tc>, window_params = [{transform_indices = @transform_0, window_bounds = array<i64: 2, 16, 128>}, {pipeline_mode = #tpu.pipeline_mode<synchronous>, transform_indices = @transform_1, window_bounds = array<i64: 128, 32>}, {pipeline_mode = #tpu.pipeline_mode<synchronous>, transform_indices = @transform_2, window_bounds = array<i64: 1, 32>}, {pipeline_mode = #tpu.pipeline_mode<synchronous>, transform_indices = @transform_3, window_bounds = array<i64: 16, 32>}, {pipeline_mode = #tpu.pipeline_mode<synchronous>, transform_indices = @transform_4, window_bounds = array<i64: 3, 1, 32>}, {pipeline_mode = #tpu.pipeline_mode<synchronous>, transform_indices = @transform_5, window_bounds = array<i64: 3, 1, 32>}, {pipeline_mode = #tpu.pipeline_mode<synchronous>, transform_indices = @transform_6, window_bounds = array<i64: 3, 32, 96>}, {pipeline_mode = #tpu.pipeline_mode<synchronous>, transform_indices = @transform_7, window_bounds = array<i64: 3, 1, 96>}, {pipeline_mode = #tpu.pipeline_mode<synchronous>, transform_indices = @transform_8, window_bounds = array<i64: 3, 32, 32>}, {pipeline_mode = #tpu.pipeline_mode<synchronous>, transform_indices = @transform_9, window_bounds = array<i64: 3, 1, 32>}, {pipeline_mode = #tpu.pipeline_mode<synchronous>, transform_indices = @transform_10, window_bounds = array<i64: 3, 1, 32>}, {pipeline_mode = #tpu.pipeline_mode<synchronous>, transform_indices = @transform_11, window_bounds = array<i64: 3, 1, 32>}, {pipeline_mode = #tpu.pipeline_mode<synchronous>, transform_indices = @transform_12, window_bounds = array<i64: 3, 32, 128>}, {pipeline_mode = #tpu.pipeline_mode<synchronous>, transform_indices = @transform_13, window_bounds = array<i64: 3, 1, 128>}, {pipeline_mode = #tpu.pipeline_mode<synchronous>, transform_indices = @transform_14, window_bounds = array<i64: 3, 128, 32>}, {pipeline_mode = #tpu.pipeline_mode<synchronous>, transform_indices = @transform_15, window_bounds = array<i64: 3, 1, 32>}, {transform_indices = @transform_16, window_bounds = array<i64: 2, 16, 128>}]} {
    %c0 = arith.constant 0 : index
    %c0_0 = arith.constant 0 : index
    %c0_1 = arith.constant 0 : index
    %0 = vector.load %arg1[%c0, %c0_0, %c0_1] : memref<2x16x128xf32, #tpu.memory_space<vmem>>, vector<2x16x128xf32>
    %1 = vector.shape_cast %0 : vector<2x16x128xf32> to vector<32x128xf32>
    %2 = arith.truncf %1 : vector<32x128xf32> to vector<32x128xbf16>
    %c0_2 = arith.constant 0 : index
    %c0_3 = arith.constant 0 : index
    %3 = vector.load %arg2[%c0_2, %c0_3] : memref<128x32xbf16, #tpu.memory_space<vmem>>, vector<128x32xbf16>
    %cst = arith.constant dense<0.000000e+00> : vector<32x32xf32>
    %4 = tpu.matmul %2, %3, %cst {dimension_numbers = #tpu.dot_dimension_numbers<[1], [0], [0], [1], [0, 0, 1, 1], [], []>} : vector<32x128xbf16>, vector<128x32xbf16>, vector<32x32xf32> -> vector<32x32xf32>
    %c0_4 = arith.constant 0 : index
    %c0_5 = arith.constant 0 : index
    %5 = vector.load %arg3[%c0_4, %c0_5] : memref<1x32xf32, #tpu.memory_space<vmem>>, vector<1x32xf32>
    %6 = vector.broadcast %5 : vector<1x32xf32> to vector<32x32xf32>
    %7 = arith.addf %4, %6 : vector<32x32xf32>
    %8 = vector.shape_cast %7 : vector<32x32xf32> to vector<2x16x32xf32>
    %c0_6 = arith.constant 0 : index
    %c0_7 = arith.constant 0 : index
    %9 = vector.load %arg4[%c0_6, %c0_7] : memref<16x32xf32, #tpu.memory_space<vmem>>, vector<16x32xf32>
    %10 = vector.shape_cast %9 : vector<16x32xf32> to vector<1x16x32xf32>
    %11 = vector.broadcast %10 : vector<1x16x32xf32> to vector<2x16x32xf32>
    %12 = arith.addf %8, %11 : vector<2x16x32xf32>
    %13 = vector.shape_cast %12 : vector<2x16x32xf32> to vector<32x32xf32>
    %c0_8 = arith.constant 0 : index
    %c0_9 = arith.constant 0 : index
    %c0_10 = arith.constant 0 : index
    %14 = vector.load %arg5[%c0_8, %c0_9, %c0_10] : memref<3x1x32xf32, #tpu.memory_space<vmem>>, vector<1x1x32xf32>
    %15 = vector.shape_cast %14 : vector<1x1x32xf32> to vector<1x32xf32>
    %c0_11 = arith.constant 0 : index
    %c0_12 = arith.constant 0 : index
    %c0_13 = arith.constant 0 : index
    %16 = vector.load %arg6[%c0_11, %c0_12, %c0_13] : memref<3x1x32xf32, #tpu.memory_space<vmem>>, vector<1x1x32xf32>
    %17 = vector.shape_cast %16 : vector<1x1x32xf32> to vector<1x32xf32>
    %cst_14 = arith.constant dense<0.000000e+00> : vector<32xf32>
    %18 = vector.multi_reduction <add>, %13, %cst_14 [1] : vector<32x32xf32> to vector<32xf32>
    %19 = vector.shape_cast %18 : vector<32xf32> to vector<32x1xf32>
    %cst_15 = arith.constant 3.200000e+01 : f32
    %20 = vector.broadcast %cst_15 : f32 to vector<32x1xf32>
    %21 = arith.divf %19, %20 : vector<32x1xf32>
    %22 = vector.broadcast %21 : vector<32x1xf32> to vector<32x32xf32>
    %23 = arith.subf %13, %22 : vector<32x32xf32>
    %24 = arith.mulf %23, %23 : vector<32x32xf32>
    %cst_16 = arith.constant dense<0.000000e+00> : vector<32xf32>
    %25 = vector.multi_reduction <add>, %24, %cst_16 [1] : vector<32x32xf32> to vector<32xf32>
    %26 = vector.shape_cast %25 : vector<32xf32> to vector<32x1xf32>
    %cst_17 = arith.constant 3.200000e+01 : f32
    %27 = vector.broadcast %cst_17 : f32 to vector<32x1xf32>
    %28 = arith.divf %26, %27 : vector<32x1xf32>
    %cst_18 = arith.constant 9.99999997E-7 : f32
    %29 = vector.broadcast %cst_18 : f32 to vector<32x1xf32>
    %30 = arith.addf %28, %29 : vector<32x1xf32>
    %31 = math.rsqrt %30 : vector<32x1xf32>
    %32 = vector.broadcast %31 : vector<32x1xf32> to vector<32x32xf32>
    %33 = arith.mulf %23, %32 : vector<32x32xf32>
    %34 = vector.broadcast %15 : vector<1x32xf32> to vector<32x32xf32>
    %35 = arith.mulf %33, %34 : vector<32x32xf32>
    %36 = vector.broadcast %17 : vector<1x32xf32> to vector<32x32xf32>
    %37 = arith.addf %35, %36 : vector<32x32xf32>
    %38 = arith.truncf %37 : vector<32x32xf32> to vector<32x32xbf16>
    %c0_19 = arith.constant 0 : index
    %c0_20 = arith.constant 0 : index
    %c0_21 = arith.constant 0 : index
    %39 = vector.load %arg7[%c0_19, %c0_20, %c0_21] : memref<3x32x96xbf16, #tpu.memory_space<vmem>>, vector<1x32x96xbf16>
    %40 = vector.shape_cast %39 : vector<1x32x96xbf16> to vector<32x96xbf16>
    %cst_22 = arith.constant dense<0.000000e+00> : vector<32x96xf32>
    %41 = tpu.matmul %38, %40, %cst_22 {dimension_numbers = #tpu.dot_dimension_numbers<[1], [0], [0], [1], [0, 0, 1, 1], [], []>} : vector<32x32xbf16>, vector<32x96xbf16>, vector<32x96xf32> -> vector<32x96xf32>
    %c0_23 = arith.constant 0 : index
    %c0_24 = arith.constant 0 : index
    %c0_25 = arith.constant 0 : index
    %42 = vector.load %arg8[%c0_23, %c0_24, %c0_25] : memref<3x1x96xf32, #tpu.memory_space<vmem>>, vector<1x1x96xf32>
    %43 = vector.shape_cast %42 : vector<1x1x96xf32> to vector<1x96xf32>
    %44 = vector.broadcast %43 : vector<1x96xf32> to vector<32x96xf32>
    %45 = arith.addf %41, %44 : vector<32x96xf32>
    %46 = vector.extract_strided_slice %45 {offsets = [0, 0], sizes = [32, 32], strides = [1, 1]} : vector<32x96xf32> to vector<32x32xf32>
    %47 = vector.shape_cast %46 : vector<32x32xf32> to vector<2x16x32xf32>
    %48 = vector.extract_strided_slice %45 {offsets = [0, 32], sizes = [32, 32], strides = [1, 1]} : vector<32x96xf32> to vector<32x32xf32>
    %49 = vector.shape_cast %48 : vector<32x32xf32> to vector<2x16x32xf32>
    %50 = vector.extract_strided_slice %45 {offsets = [0, 64], sizes = [32, 32], strides = [1, 1]} : vector<32x96xf32> to vector<32x32xf32>
    %51 = vector.shape_cast %50 : vector<32x32xf32> to vector<2x16x32xf32>
    %52 = vector.extract_strided_slice %47 {offsets = [0, 0, 0], sizes = [2, 16, 8], strides = [1, 1, 1]} : vector<2x16x32xf32> to vector<2x16x8xf32>
    %53 = vector.extract_strided_slice %49 {offsets = [0, 0, 0], sizes = [2, 16, 8], strides = [1, 1, 1]} : vector<2x16x32xf32> to vector<2x16x8xf32>
    %54 = vector.extract_strided_slice %51 {offsets = [0, 0, 0], sizes = [2, 16, 8], strides = [1, 1, 1]} : vector<2x16x32xf32> to vector<2x16x8xf32>
    "tpu.trace_start"() <{level = 10 : i32, message = "bnd,bmd->bnm"}> : () -> ()
    %cst_26 = arith.constant dense<0.000000e+00> : vector<2x16x16xf32>
    %55 = tpu.matmul %52, %53, %cst_26 {dimension_numbers = #tpu.dot_dimension_numbers<[2], [2], [1], [1], [0, 0, 0, 1, 1, 1], [0], [0]>} : vector<2x16x8xf32>, vector<2x16x8xf32>, vector<2x16x16xf32> -> vector<2x16x16xf32>
    "tpu.trace_stop"() : () -> ()
    %cst_27 = arith.constant dense<0xFF800000> : vector<2x16xf32>
    %56 = vector.multi_reduction <maximumf>, %55, %cst_27 [2] : vector<2x16x16xf32> to vector<2x16xf32>
    %57 = vector.shape_cast %56 : vector<2x16xf32> to vector<2x16x1xf32>
    %58 = vector.broadcast %57 : vector<2x16x1xf32> to vector<2x16x16xf32>
    %59 = arith.subf %55, %58 : vector<2x16x16xf32>
    %60 = math.exp %59 : vector<2x16x16xf32>
    %cst_28 = arith.constant dense<0.000000e+00> : vector<2x16xf32>
    %61 = vector.multi_reduction <add>, %60, %cst_28 [2] : vector<2x16x16xf32> to vector<2x16xf32>
    %62 = vector.shape_cast %61 : vector<2x16xf32> to vector<2x16x1xf32>
    %63 = tpu.reciprocal %62 {approx = true} : vector<2x16x1xf32> -> vector<2x16x1xf32>
    %64 = vector.broadcast %63 : vector<2x16x1xf32> to vector<2x16x16xf32>
    %65 = arith.mulf %60, %64 : vector<2x16x16xf32>
    "tpu.trace_start"() <{level = 10 : i32, message = "bnm,bmd->bnd"}> : () -> ()
    %cst_29 = arith.constant dense<0.000000e+00> : vector<2x16x8xf32>
    %66 = tpu.matmul %65, %54, %cst_29 {dimension_numbers = #tpu.dot_dimension_numbers<[2], [1], [1], [2], [0, 0, 0, 1, 1, 2], [0], [0]>} : vector<2x16x16xf32>, vector<2x16x8xf32>, vector<2x16x8xf32> -> vector<2x16x8xf32>
    "tpu.trace_stop"() : () -> ()
    %67 = vector.extract_strided_slice %47 {offsets = [0, 0, 8], sizes = [2, 16, 8], strides = [1, 1, 1]} : vector<2x16x32xf32> to vector<2x16x8xf32>
    %68 = vector.extract_strided_slice %49 {offsets = [0, 0, 8], sizes = [2, 16, 8], strides = [1, 1, 1]} : vector<2x16x32xf32> to vector<2x16x8xf32>
    %69 = vector.extract_strided_slice %51 {offsets = [0, 0, 8], sizes = [2, 16, 8], strides = [1, 1, 1]} : vector<2x16x32xf32> to vector<2x16x8xf32>
    "tpu.trace_start"() <{level = 10 : i32, message = "bnd,bmd->bnm"}> : () -> ()
    %cst_30 = arith.constant dense<0.000000e+00> : vector<2x16x16xf32>
    %70 = tpu.matmul %67, %68, %cst_30 {dimension_numbers = #tpu.dot_dimension_numbers<[2], [2], [1], [1], [0, 0, 0, 1, 1, 1], [0], [0]>} : vector<2x16x8xf32>, vector<2x16x8xf32>, vector<2x16x16xf32> -> vector<2x16x16xf32>
    "tpu.trace_stop"() : () -> ()
    %cst_31 = arith.constant dense<0xFF800000> : vector<2x16xf32>
    %71 = vector.multi_reduction <maximumf>, %70, %cst_31 [2] : vector<2x16x16xf32> to vector<2x16xf32>
    %72 = vector.shape_cast %71 : vector<2x16xf32> to vector<2x16x1xf32>
    %73 = vector.broadcast %72 : vector<2x16x1xf32> to vector<2x16x16xf32>
    %74 = arith.subf %70, %73 : vector<2x16x16xf32>
    %75 = math.exp %74 : vector<2x16x16xf32>
    %cst_32 = arith.constant dense<0.000000e+00> : vector<2x16xf32>
    %76 = vector.multi_reduction <add>, %75, %cst_32 [2] : vector<2x16x16xf32> to vector<2x16xf32>
    %77 = vector.shape_cast %76 : vector<2x16xf32> to vector<2x16x1xf32>
    %78 = tpu.reciprocal %77 {approx = true} : vector<2x16x1xf32> -> vector<2x16x1xf32>
    %79 = vector.broadcast %78 : vector<2x16x1xf32> to vector<2x16x16xf32>
    %80 = arith.mulf %75, %79 : vector<2x16x16xf32>
    "tpu.trace_start"() <{level = 10 : i32, message = "bnm,bmd->bnd"}> : () -> ()
    %cst_33 = arith.constant dense<0.000000e+00> : vector<2x16x8xf32>
    %81 = tpu.matmul %80, %69, %cst_33 {dimension_numbers = #tpu.dot_dimension_numbers<[2], [1], [1], [2], [0, 0, 0, 1, 1, 2], [0], [0]>} : vector<2x16x16xf32>, vector<2x16x8xf32>, vector<2x16x8xf32> -> vector<2x16x8xf32>
    "tpu.trace_stop"() : () -> ()
    %82 = vector.extract_strided_slice %47 {offsets = [0, 0, 16], sizes = [2, 16, 8], strides = [1, 1, 1]} : vector<2x16x32xf32> to vector<2x16x8xf32>
    %83 = vector.extract_strided_slice %49 {offsets = [0, 0, 16], sizes = [2, 16, 8], strides = [1, 1, 1]} : vector<2x16x32xf32> to vector<2x16x8xf32>
    %84 = vector.extract_strided_slice %51 {offsets = [0, 0, 16], sizes = [2, 16, 8], strides = [1, 1, 1]} : vector<2x16x32xf32> to vector<2x16x8xf32>
    "tpu.trace_start"() <{level = 10 : i32, message = "bnd,bmd->bnm"}> : () -> ()
    %cst_34 = arith.constant dense<0.000000e+00> : vector<2x16x16xf32>
    %85 = tpu.matmul %82, %83, %cst_34 {dimension_numbers = #tpu.dot_dimension_numbers<[2], [2], [1], [1], [0, 0, 0, 1, 1, 1], [0], [0]>} : vector<2x16x8xf32>, vector<2x16x8xf32>, vector<2x16x16xf32> -> vector<2x16x16xf32>
    "tpu.trace_stop"() : () -> ()
    %cst_35 = arith.constant dense<0xFF800000> : vector<2x16xf32>
    %86 = vector.multi_reduction <maximumf>, %85, %cst_35 [2] : vector<2x16x16xf32> to vector<2x16xf32>
    %87 = vector.shape_cast %86 : vector<2x16xf32> to vector<2x16x1xf32>
    %88 = vector.broadcast %87 : vector<2x16x1xf32> to vector<2x16x16xf32>
    %89 = arith.subf %85, %88 : vector<2x16x16xf32>
    %90 = math.exp %89 : vector<2x16x16xf32>
    %cst_36 = arith.constant dense<0.000000e+00> : vector<2x16xf32>
    %91 = vector.multi_reduction <add>, %90, %cst_36 [2] : vector<2x16x16xf32> to vector<2x16xf32>
    %92 = vector.shape_cast %91 : vector<2x16xf32> to vector<2x16x1xf32>
    %93 = tpu.reciprocal %92 {approx = true} : vector<2x16x1xf32> -> vector<2x16x1xf32>
    %94 = vector.broadcast %93 : vector<2x16x1xf32> to vector<2x16x16xf32>
    %95 = arith.mulf %90, %94 : vector<2x16x16xf32>
    "tpu.trace_start"() <{level = 10 : i32, message = "bnm,bmd->bnd"}> : () -> ()
    %cst_37 = arith.constant dense<0.000000e+00> : vector<2x16x8xf32>
    %96 = tpu.matmul %95, %84, %cst_37 {dimension_numbers = #tpu.dot_dimension_numbers<[2], [1], [1], [2], [0, 0, 0, 1, 1, 2], [0], [0]>} : vector<2x16x16xf32>, vector<2x16x8xf32>, vector<2x16x8xf32> -> vector<2x16x8xf32>
    "tpu.trace_stop"() : () -> ()
    %97 = vector.extract_strided_slice %47 {offsets = [0, 0, 24], sizes = [2, 16, 8], strides = [1, 1, 1]} : vector<2x16x32xf32> to vector<2x16x8xf32>
    %98 = vector.extract_strided_slice %49 {offsets = [0, 0, 24], sizes = [2, 16, 8], strides = [1, 1, 1]} : vector<2x16x32xf32> to vector<2x16x8xf32>
    %99 = vector.extract_strided_slice %51 {offsets = [0, 0, 24], sizes = [2, 16, 8], strides = [1, 1, 1]} : vector<2x16x32xf32> to vector<2x16x8xf32>
    "tpu.trace_start"() <{level = 10 : i32, message = "bnd,bmd->bnm"}> : () -> ()
    %cst_38 = arith.constant dense<0.000000e+00> : vector<2x16x16xf32>
    %100 = tpu.matmul %97, %98, %cst_38 {dimension_numbers = #tpu.dot_dimension_numbers<[2], [2], [1], [1], [0, 0, 0, 1, 1, 1], [0], [0]>} : vector<2x16x8xf32>, vector<2x16x8xf32>, vector<2x16x16xf32> -> vector<2x16x16xf32>
    "tpu.trace_stop"() : () -> ()
    %cst_39 = arith.constant dense<0xFF800000> : vector<2x16xf32>
    %101 = vector.multi_reduction <maximumf>, %100, %cst_39 [2] : vector<2x16x16xf32> to vector<2x16xf32>
    %102 = vector.shape_cast %101 : vector<2x16xf32> to vector<2x16x1xf32>
    %103 = vector.broadcast %102 : vector<2x16x1xf32> to vector<2x16x16xf32>
    %104 = arith.subf %100, %103 : vector<2x16x16xf32>
    %105 = math.exp %104 : vector<2x16x16xf32>
    %cst_40 = arith.constant dense<0.000000e+00> : vector<2x16xf32>
    %106 = vector.multi_reduction <add>, %105, %cst_40 [2] : vector<2x16x16xf32> to vector<2x16xf32>
    %107 = vector.shape_cast %106 : vector<2x16xf32> to vector<2x16x1xf32>
    %108 = tpu.reciprocal %107 {approx = true} : vector<2x16x1xf32> -> vector<2x16x1xf32>
    %109 = vector.broadcast %108 : vector<2x16x1xf32> to vector<2x16x16xf32>
    %110 = arith.mulf %105, %109 : vector<2x16x16xf32>
    "tpu.trace_start"() <{level = 10 : i32, message = "bnm,bmd->bnd"}> : () -> ()
    %cst_41 = arith.constant dense<0.000000e+00> : vector<2x16x8xf32>
    %111 = tpu.matmul %110, %99, %cst_41 {dimension_numbers = #tpu.dot_dimension_numbers<[2], [1], [1], [2], [0, 0, 0, 1, 1, 2], [0], [0]>} : vector<2x16x16xf32>, vector<2x16x8xf32>, vector<2x16x8xf32> -> vector<2x16x8xf32>
    "tpu.trace_stop"() : () -> ()
    %112 = tpu.concatenate %66, %81, %96, %111 in 2 : vector<2x16x8xf32>, vector<2x16x8xf32>, vector<2x16x8xf32>, vector<2x16x8xf32> -> vector<2x16x32xf32>
    %113 = vector.shape_cast %112 : vector<2x16x32xf32> to vector<32x32xf32>
    %114 = arith.truncf %113 : vector<32x32xf32> to vector<32x32xbf16>
    %c0_42 = arith.constant 0 : index
    %c0_43 = arith.constant 0 : index
    %c0_44 = arith.constant 0 : index
    %115 = vector.load %arg9[%c0_42, %c0_43, %c0_44] : memref<3x32x32xbf16, #tpu.memory_space<vmem>>, vector<1x32x32xbf16>
    %116 = vector.shape_cast %115 : vector<1x32x32xbf16> to vector<32x32xbf16>
    %cst_45 = arith.constant dense<0.000000e+00> : vector<32x32xf32>
    %117 = tpu.matmul %114, %116, %cst_45 {dimension_numbers = #tpu.dot_dimension_numbers<[1], [0], [0], [1], [0, 0, 1, 1], [], []>} : vector<32x32xbf16>, vector<32x32xbf16>, vector<32x32xf32> -> vector<32x32xf32>
    %c0_46 = arith.constant 0 : index
    %c0_47 = arith.constant 0 : index
    %c0_48 = arith.constant 0 : index
    %118 = vector.load %arg10[%c0_46, %c0_47, %c0_48] : memref<3x1x32xf32, #tpu.memory_space<vmem>>, vector<1x1x32xf32>
    %119 = vector.shape_cast %118 : vector<1x1x32xf32> to vector<1x32xf32>
    %120 = vector.broadcast %119 : vector<1x32xf32> to vector<32x32xf32>
    %121 = arith.addf %117, %120 : vector<32x32xf32>
    %122 = arith.addf %13, %121 : vector<32x32xf32>
    %c0_49 = arith.constant 0 : index
    %c0_50 = arith.constant 0 : index
    %c0_51 = arith.constant 0 : index
    %123 = vector.load %arg11[%c0_49, %c0_50, %c0_51] : memref<3x1x32xf32, #tpu.memory_space<vmem>>, vector<1x1x32xf32>
    %124 = vector.shape_cast %123 : vector<1x1x32xf32> to vector<1x32xf32>
    %c0_52 = arith.constant 0 : index
    %c0_53 = arith.constant 0 : index
    %c0_54 = arith.constant 0 : index
    %125 = vector.load %arg12[%c0_52, %c0_53, %c0_54] : memref<3x1x32xf32, #tpu.memory_space<vmem>>, vector<1x1x32xf32>
    %126 = vector.shape_cast %125 : vector<1x1x32xf32> to vector<1x32xf32>
    %cst_55 = arith.constant dense<0.000000e+00> : vector<32xf32>
    %127 = vector.multi_reduction <add>, %122, %cst_55 [1] : vector<32x32xf32> to vector<32xf32>
    %128 = vector.shape_cast %127 : vector<32xf32> to vector<32x1xf32>
    %cst_56 = arith.constant 3.200000e+01 : f32
    %129 = vector.broadcast %cst_56 : f32 to vector<32x1xf32>
    %130 = arith.divf %128, %129 : vector<32x1xf32>
    %131 = vector.broadcast %130 : vector<32x1xf32> to vector<32x32xf32>
    %132 = arith.subf %122, %131 : vector<32x32xf32>
    %133 = arith.mulf %132, %132 : vector<32x32xf32>
    %cst_57 = arith.constant dense<0.000000e+00> : vector<32xf32>
    %134 = vector.multi_reduction <add>, %133, %cst_57 [1] : vector<32x32xf32> to vector<32xf32>
    %135 = vector.shape_cast %134 : vector<32xf32> to vector<32x1xf32>
    %cst_58 = arith.constant 3.200000e+01 : f32
    %136 = vector.broadcast %cst_58 : f32 to vector<32x1xf32>
    %137 = arith.divf %135, %136 : vector<32x1xf32>
    %cst_59 = arith.constant 9.99999997E-7 : f32
    %138 = vector.broadcast %cst_59 : f32 to vector<32x1xf32>
    %139 = arith.addf %137, %138 : vector<32x1xf32>
    %140 = math.rsqrt %139 : vector<32x1xf32>
    %141 = vector.broadcast %140 : vector<32x1xf32> to vector<32x32xf32>
    %142 = arith.mulf %132, %141 : vector<32x32xf32>
    %143 = vector.broadcast %124 : vector<1x32xf32> to vector<32x32xf32>
    %144 = arith.mulf %142, %143 : vector<32x32xf32>
    %145 = vector.broadcast %126 : vector<1x32xf32> to vector<32x32xf32>
    %146 = arith.addf %144, %145 : vector<32x32xf32>
    %147 = arith.truncf %146 : vector<32x32xf32> to vector<32x32xbf16>
    %c0_60 = arith.constant 0 : index
    %c0_61 = arith.constant 0 : index
    %c0_62 = arith.constant 0 : index
    %148 = vector.load %arg13[%c0_60, %c0_61, %c0_62] : memref<3x32x128xbf16, #tpu.memory_space<vmem>>, vector<1x32x128xbf16>
    %149 = vector.shape_cast %148 : vector<1x32x128xbf16> to vector<32x128xbf16>
    %cst_63 = arith.constant dense<0.000000e+00> : vector<32x128xf32>
    %150 = tpu.matmul %147, %149, %cst_63 {dimension_numbers = #tpu.dot_dimension_numbers<[1], [0], [0], [1], [0, 0, 1, 1], [], []>} : vector<32x32xbf16>, vector<32x128xbf16>, vector<32x128xf32> -> vector<32x128xf32>
    %c0_64 = arith.constant 0 : index
    %c0_65 = arith.constant 0 : index
    %c0_66 = arith.constant 0 : index
    %151 = vector.load %arg14[%c0_64, %c0_65, %c0_66] : memref<3x1x128xf32, #tpu.memory_space<vmem>>, vector<1x1x128xf32>
    %152 = vector.shape_cast %151 : vector<1x1x128xf32> to vector<1x128xf32>
    %153 = vector.broadcast %152 : vector<1x128xf32> to vector<32x128xf32>
    %154 = arith.addf %150, %153 : vector<32x128xf32>
    %155 = arith.mulf %154, %154 : vector<32x128xf32>
    %156 = arith.mulf %154, %155 : vector<32x128xf32>
    %cst_67 = arith.constant 4.471500e-02 : f32
    %157 = vector.broadcast %cst_67 : f32 to vector<32x128xf32>
    %158 = arith.mulf %157, %156 : vector<32x128xf32>
    %159 = arith.addf %154, %158 : vector<32x128xf32>
    %cst_68 = arith.constant 0.797884583 : f32
    %160 = vector.broadcast %cst_68 : f32 to vector<32x128xf32>
    %161 = arith.mulf %160, %159 : vector<32x128xf32>
    %162 = math.tanh %161 : vector<32x128xf32>
    %cst_69 = arith.constant 1.000000e+00 : f32
    %163 = vector.broadcast %cst_69 : f32 to vector<32x128xf32>
    %164 = arith.addf %163, %162 : vector<32x128xf32>
    %cst_70 = arith.constant 5.000000e-01 : f32
    %165 = vector.broadcast %cst_70 : f32 to vector<32x128xf32>
    %166 = arith.mulf %165, %164 : vector<32x128xf32>
    %167 = arith.mulf %154, %166 : vector<32x128xf32>
    %168 = arith.truncf %167 : vector<32x128xf32> to vector<32x128xbf16>
    %c0_71 = arith.constant 0 : index
    %c0_72 = arith.constant 0 : index
    %c0_73 = arith.constant 0 : index
    %169 = vector.load %arg15[%c0_71, %c0_72, %c0_73] : memref<3x128x32xbf16, #tpu.memory_space<vmem>>, vector<1x128x32xbf16>
    %170 = vector.shape_cast %169 : vector<1x128x32xbf16> to vector<128x32xbf16>
    %cst_74 = arith.constant dense<0.000000e+00> : vector<32x32xf32>
    %171 = tpu.matmul %168, %170, %cst_74 {dimension_numbers = #tpu.dot_dimension_numbers<[1], [0], [0], [1], [0, 0, 1, 1], [], []>} : vector<32x128xbf16>, vector<128x32xbf16>, vector<32x32xf32> -> vector<32x32xf32>
    %c0_75 = arith.constant 0 : index
    %c0_76 = arith.constant 0 : index
    %c0_77 = arith.constant 0 : index
    %172 = vector.load %arg16[%c0_75, %c0_76, %c0_77] : memref<3x1x32xf32, #tpu.memory_space<vmem>>, vector<1x1x32xf32>
    %173 = vector.shape_cast %172 : vector<1x1x32xf32> to vector<1x32xf32>
    %174 = vector.broadcast %173 : vector<1x32xf32> to vector<32x32xf32>
    %175 = arith.addf %171, %174 : vector<32x32xf32>
    %176 = arith.addf %122, %175 : vector<32x32xf32>
    %c1 = arith.constant 1 : index
    %c0_78 = arith.constant 0 : index
    %c0_79 = arith.constant 0 : index
    %177 = vector.load %arg5[%c1, %c0_78, %c0_79] : memref<3x1x32xf32, #tpu.memory_space<vmem>>, vector<1x1x32xf32>
    %178 = vector.shape_cast %177 : vector<1x1x32xf32> to vector<1x32xf32>
    %c1_80 = arith.constant 1 : index
    %c0_81 = arith.constant 0 : index
    %c0_82 = arith.constant 0 : index
    %179 = vector.load %arg6[%c1_80, %c0_81, %c0_82] : memref<3x1x32xf32, #tpu.memory_space<vmem>>, vector<1x1x32xf32>
    %180 = vector.shape_cast %179 : vector<1x1x32xf32> to vector<1x32xf32>
    %cst_83 = arith.constant dense<0.000000e+00> : vector<32xf32>
    %181 = vector.multi_reduction <add>, %176, %cst_83 [1] : vector<32x32xf32> to vector<32xf32>
    %182 = vector.shape_cast %181 : vector<32xf32> to vector<32x1xf32>
    %cst_84 = arith.constant 3.200000e+01 : f32
    %183 = vector.broadcast %cst_84 : f32 to vector<32x1xf32>
    %184 = arith.divf %182, %183 : vector<32x1xf32>
    %185 = vector.broadcast %184 : vector<32x1xf32> to vector<32x32xf32>
    %186 = arith.subf %176, %185 : vector<32x32xf32>
    %187 = arith.mulf %186, %186 : vector<32x32xf32>
    %cst_85 = arith.constant dense<0.000000e+00> : vector<32xf32>
    %188 = vector.multi_reduction <add>, %187, %cst_85 [1] : vector<32x32xf32> to vector<32xf32>
    %189 = vector.shape_cast %188 : vector<32xf32> to vector<32x1xf32>
    %cst_86 = arith.constant 3.200000e+01 : f32
    %190 = vector.broadcast %cst_86 : f32 to vector<32x1xf32>
    %191 = arith.divf %189, %190 : vector<32x1xf32>
    %cst_87 = arith.constant 9.99999997E-7 : f32
    %192 = vector.broadcast %cst_87 : f32 to vector<32x1xf32>
    %193 = arith.addf %191, %192 : vector<32x1xf32>
    %194 = math.rsqrt %193 : vector<32x1xf32>
    %195 = vector.broadcast %194 : vector<32x1xf32> to vector<32x32xf32>
    %196 = arith.mulf %186, %195 : vector<32x32xf32>
    %197 = vector.broadcast %178 : vector<1x32xf32> to vector<32x32xf32>
    %198 = arith.mulf %196, %197 : vector<32x32xf32>
    %199 = vector.broadcast %180 : vector<1x32xf32> to vector<32x32xf32>
    %200 = arith.addf %198, %199 : vector<32x32xf32>
    %201 = arith.truncf %200 : vector<32x32xf32> to vector<32x32xbf16>
    %c1_88 = arith.constant 1 : index
    %c0_89 = arith.constant 0 : index
    %c0_90 = arith.constant 0 : index
    %202 = vector.load %arg7[%c1_88, %c0_89, %c0_90] : memref<3x32x96xbf16, #tpu.memory_space<vmem>>, vector<1x32x96xbf16>
    %203 = vector.shape_cast %202 : vector<1x32x96xbf16> to vector<32x96xbf16>
    %cst_91 = arith.constant dense<0.000000e+00> : vector<32x96xf32>
    %204 = tpu.matmul %201, %203, %cst_91 {dimension_numbers = #tpu.dot_dimension_numbers<[1], [0], [0], [1], [0, 0, 1, 1], [], []>} : vector<32x32xbf16>, vector<32x96xbf16>, vector<32x96xf32> -> vector<32x96xf32>
    %c1_92 = arith.constant 1 : index
    %c0_93 = arith.constant 0 : index
    %c0_94 = arith.constant 0 : index
    %205 = vector.load %arg8[%c1_92, %c0_93, %c0_94] : memref<3x1x96xf32, #tpu.memory_space<vmem>>, vector<1x1x96xf32>
    %206 = vector.shape_cast %205 : vector<1x1x96xf32> to vector<1x96xf32>
    %207 = vector.broadcast %206 : vector<1x96xf32> to vector<32x96xf32>
    %208 = arith.addf %204, %207 : vector<32x96xf32>
    %209 = vector.extract_strided_slice %208 {offsets = [0, 0], sizes = [32, 32], strides = [1, 1]} : vector<32x96xf32> to vector<32x32xf32>
    %210 = vector.shape_cast %209 : vector<32x32xf32> to vector<2x16x32xf32>
    %211 = vector.extract_strided_slice %208 {offsets = [0, 32], sizes = [32, 32], strides = [1, 1]} : vector<32x96xf32> to vector<32x32xf32>
    %212 = vector.shape_cast %211 : vector<32x32xf32> to vector<2x16x32xf32>
    %213 = vector.extract_strided_slice %208 {offsets = [0, 64], sizes = [32, 32], strides = [1, 1]} : vector<32x96xf32> to vector<32x32xf32>
    %214 = vector.shape_cast %213 : vector<32x32xf32> to vector<2x16x32xf32>
    %215 = vector.extract_strided_slice %210 {offsets = [0, 0, 0], sizes = [2, 16, 8], strides = [1, 1, 1]} : vector<2x16x32xf32> to vector<2x16x8xf32>
    %216 = vector.extract_strided_slice %212 {offsets = [0, 0, 0], sizes = [2, 16, 8], strides = [1, 1, 1]} : vector<2x16x32xf32> to vector<2x16x8xf32>
    %217 = vector.extract_strided_slice %214 {offsets = [0, 0, 0], sizes = [2, 16, 8], strides = [1, 1, 1]} : vector<2x16x32xf32> to vector<2x16x8xf32>
    "tpu.trace_start"() <{level = 10 : i32, message = "bnd,bmd->bnm"}> : () -> ()
    %cst_95 = arith.constant dense<0.000000e+00> : vector<2x16x16xf32>
    %218 = tpu.matmul %215, %216, %cst_95 {dimension_numbers = #tpu.dot_dimension_numbers<[2], [2], [1], [1], [0, 0, 0, 1, 1, 1], [0], [0]>} : vector<2x16x8xf32>, vector<2x16x8xf32>, vector<2x16x16xf32> -> vector<2x16x16xf32>
    "tpu.trace_stop"() : () -> ()
    %cst_96 = arith.constant dense<0xFF800000> : vector<2x16xf32>
    %219 = vector.multi_reduction <maximumf>, %218, %cst_96 [2] : vector<2x16x16xf32> to vector<2x16xf32>
    %220 = vector.shape_cast %219 : vector<2x16xf32> to vector<2x16x1xf32>
    %221 = vector.broadcast %220 : vector<2x16x1xf32> to vector<2x16x16xf32>
    %222 = arith.subf %218, %221 : vector<2x16x16xf32>
    %223 = math.exp %222 : vector<2x16x16xf32>
    %cst_97 = arith.constant dense<0.000000e+00> : vector<2x16xf32>
    %224 = vector.multi_reduction <add>, %223, %cst_97 [2] : vector<2x16x16xf32> to vector<2x16xf32>
    %225 = vector.shape_cast %224 : vector<2x16xf32> to vector<2x16x1xf32>
    %226 = tpu.reciprocal %225 {approx = true} : vector<2x16x1xf32> -> vector<2x16x1xf32>
    %227 = vector.broadcast %226 : vector<2x16x1xf32> to vector<2x16x16xf32>
    %228 = arith.mulf %223, %227 : vector<2x16x16xf32>
    "tpu.trace_start"() <{level = 10 : i32, message = "bnm,bmd->bnd"}> : () -> ()
    %cst_98 = arith.constant dense<0.000000e+00> : vector<2x16x8xf32>
    %229 = tpu.matmul %228, %217, %cst_98 {dimension_numbers = #tpu.dot_dimension_numbers<[2], [1], [1], [2], [0, 0, 0, 1, 1, 2], [0], [0]>} : vector<2x16x16xf32>, vector<2x16x8xf32>, vector<2x16x8xf32> -> vector<2x16x8xf32>
    "tpu.trace_stop"() : () -> ()
    %230 = vector.extract_strided_slice %210 {offsets = [0, 0, 8], sizes = [2, 16, 8], strides = [1, 1, 1]} : vector<2x16x32xf32> to vector<2x16x8xf32>
    %231 = vector.extract_strided_slice %212 {offsets = [0, 0, 8], sizes = [2, 16, 8], strides = [1, 1, 1]} : vector<2x16x32xf32> to vector<2x16x8xf32>
    %232 = vector.extract_strided_slice %214 {offsets = [0, 0, 8], sizes = [2, 16, 8], strides = [1, 1, 1]} : vector<2x16x32xf32> to vector<2x16x8xf32>
    "tpu.trace_start"() <{level = 10 : i32, message = "bnd,bmd->bnm"}> : () -> ()
    %cst_99 = arith.constant dense<0.000000e+00> : vector<2x16x16xf32>
    %233 = tpu.matmul %230, %231, %cst_99 {dimension_numbers = #tpu.dot_dimension_numbers<[2], [2], [1], [1], [0, 0, 0, 1, 1, 1], [0], [0]>} : vector<2x16x8xf32>, vector<2x16x8xf32>, vector<2x16x16xf32> -> vector<2x16x16xf32>
    "tpu.trace_stop"() : () -> ()
    %cst_100 = arith.constant dense<0xFF800000> : vector<2x16xf32>
    %234 = vector.multi_reduction <maximumf>, %233, %cst_100 [2] : vector<2x16x16xf32> to vector<2x16xf32>
    %235 = vector.shape_cast %234 : vector<2x16xf32> to vector<2x16x1xf32>
    %236 = vector.broadcast %235 : vector<2x16x1xf32> to vector<2x16x16xf32>
    %237 = arith.subf %233, %236 : vector<2x16x16xf32>
    %238 = math.exp %237 : vector<2x16x16xf32>
    %cst_101 = arith.constant dense<0.000000e+00> : vector<2x16xf32>
    %239 = vector.multi_reduction <add>, %238, %cst_101 [2] : vector<2x16x16xf32> to vector<2x16xf32>
    %240 = vector.shape_cast %239 : vector<2x16xf32> to vector<2x16x1xf32>
    %241 = tpu.reciprocal %240 {approx = true} : vector<2x16x1xf32> -> vector<2x16x1xf32>
    %242 = vector.broadcast %241 : vector<2x16x1xf32> to vector<2x16x16xf32>
    %243 = arith.mulf %238, %242 : vector<2x16x16xf32>
    "tpu.trace_start"() <{level = 10 : i32, message = "bnm,bmd->bnd"}> : () -> ()
    %cst_102 = arith.constant dense<0.000000e+00> : vector<2x16x8xf32>
    %244 = tpu.matmul %243, %232, %cst_102 {dimension_numbers = #tpu.dot_dimension_numbers<[2], [1], [1], [2], [0, 0, 0, 1, 1, 2], [0], [0]>} : vector<2x16x16xf32>, vector<2x16x8xf32>, vector<2x16x8xf32> -> vector<2x16x8xf32>
    "tpu.trace_stop"() : () -> ()
    %245 = vector.extract_strided_slice %210 {offsets = [0, 0, 16], sizes = [2, 16, 8], strides = [1, 1, 1]} : vector<2x16x32xf32> to vector<2x16x8xf32>
    %246 = vector.extract_strided_slice %212 {offsets = [0, 0, 16], sizes = [2, 16, 8], strides = [1, 1, 1]} : vector<2x16x32xf32> to vector<2x16x8xf32>
    %247 = vector.extract_strided_slice %214 {offsets = [0, 0, 16], sizes = [2, 16, 8], strides = [1, 1, 1]} : vector<2x16x32xf32> to vector<2x16x8xf32>
    "tpu.trace_start"() <{level = 10 : i32, message = "bnd,bmd->bnm"}> : () -> ()
    %cst_103 = arith.constant dense<0.000000e+00> : vector<2x16x16xf32>
    %248 = tpu.matmul %245, %246, %cst_103 {dimension_numbers = #tpu.dot_dimension_numbers<[2], [2], [1], [1], [0, 0, 0, 1, 1, 1], [0], [0]>} : vector<2x16x8xf32>, vector<2x16x8xf32>, vector<2x16x16xf32> -> vector<2x16x16xf32>
    "tpu.trace_stop"() : () -> ()
    %cst_104 = arith.constant dense<0xFF800000> : vector<2x16xf32>
    %249 = vector.multi_reduction <maximumf>, %248, %cst_104 [2] : vector<2x16x16xf32> to vector<2x16xf32>
    %250 = vector.shape_cast %249 : vector<2x16xf32> to vector<2x16x1xf32>
    %251 = vector.broadcast %250 : vector<2x16x1xf32> to vector<2x16x16xf32>
    %252 = arith.subf %248, %251 : vector<2x16x16xf32>
    %253 = math.exp %252 : vector<2x16x16xf32>
    %cst_105 = arith.constant dense<0.000000e+00> : vector<2x16xf32>
    %254 = vector.multi_reduction <add>, %253, %cst_105 [2] : vector<2x16x16xf32> to vector<2x16xf32>
    %255 = vector.shape_cast %254 : vector<2x16xf32> to vector<2x16x1xf32>
    %256 = tpu.reciprocal %255 {approx = true} : vector<2x16x1xf32> -> vector<2x16x1xf32>
    %257 = vector.broadcast %256 : vector<2x16x1xf32> to vector<2x16x16xf32>
    %258 = arith.mulf %253, %257 : vector<2x16x16xf32>
    "tpu.trace_start"() <{level = 10 : i32, message = "bnm,bmd->bnd"}> : () -> ()
    %cst_106 = arith.constant dense<0.000000e+00> : vector<2x16x8xf32>
    %259 = tpu.matmul %258, %247, %cst_106 {dimension_numbers = #tpu.dot_dimension_numbers<[2], [1], [1], [2], [0, 0, 0, 1, 1, 2], [0], [0]>} : vector<2x16x16xf32>, vector<2x16x8xf32>, vector<2x16x8xf32> -> vector<2x16x8xf32>
    "tpu.trace_stop"() : () -> ()
    %260 = vector.extract_strided_slice %210 {offsets = [0, 0, 24], sizes = [2, 16, 8], strides = [1, 1, 1]} : vector<2x16x32xf32> to vector<2x16x8xf32>
    %261 = vector.extract_strided_slice %212 {offsets = [0, 0, 24], sizes = [2, 16, 8], strides = [1, 1, 1]} : vector<2x16x32xf32> to vector<2x16x8xf32>
    %262 = vector.extract_strided_slice %214 {offsets = [0, 0, 24], sizes = [2, 16, 8], strides = [1, 1, 1]} : vector<2x16x32xf32> to vector<2x16x8xf32>
    "tpu.trace_start"() <{level = 10 : i32, message = "bnd,bmd->bnm"}> : () -> ()
    %cst_107 = arith.constant dense<0.000000e+00> : vector<2x16x16xf32>
    %263 = tpu.matmul %260, %261, %cst_107 {dimension_numbers = #tpu.dot_dimension_numbers<[2], [2], [1], [1], [0, 0, 0, 1, 1, 1], [0], [0]>} : vector<2x16x8xf32>, vector<2x16x8xf32>, vector<2x16x16xf32> -> vector<2x16x16xf32>
    "tpu.trace_stop"() : () -> ()
    %cst_108 = arith.constant dense<0xFF800000> : vector<2x16xf32>
    %264 = vector.multi_reduction <maximumf>, %263, %cst_108 [2] : vector<2x16x16xf32> to vector<2x16xf32>
    %265 = vector.shape_cast %264 : vector<2x16xf32> to vector<2x16x1xf32>
    %266 = vector.broadcast %265 : vector<2x16x1xf32> to vector<2x16x16xf32>
    %267 = arith.subf %263, %266 : vector<2x16x16xf32>
    %268 = math.exp %267 : vector<2x16x16xf32>
    %cst_109 = arith.constant dense<0.000000e+00> : vector<2x16xf32>
    %269 = vector.multi_reduction <add>, %268, %cst_109 [2] : vector<2x16x16xf32> to vector<2x16xf32>
    %270 = vector.shape_cast %269 : vector<2x16xf32> to vector<2x16x1xf32>
    %271 = tpu.reciprocal %270 {approx = true} : vector<2x16x1xf32> -> vector<2x16x1xf32>
    %272 = vector.broadcast %271 : vector<2x16x1xf32> to vector<2x16x16xf32>
    %273 = arith.mulf %268, %272 : vector<2x16x16xf32>
    "tpu.trace_start"() <{level = 10 : i32, message = "bnm,bmd->bnd"}> : () -> ()
    %cst_110 = arith.constant dense<0.000000e+00> : vector<2x16x8xf32>
    %274 = tpu.matmul %273, %262, %cst_110 {dimension_numbers = #tpu.dot_dimension_numbers<[2], [1], [1], [2], [0, 0, 0, 1, 1, 2], [0], [0]>} : vector<2x16x16xf32>, vector<2x16x8xf32>, vector<2x16x8xf32> -> vector<2x16x8xf32>
    "tpu.trace_stop"() : () -> ()
    %275 = tpu.concatenate %229, %244, %259, %274 in 2 : vector<2x16x8xf32>, vector<2x16x8xf32>, vector<2x16x8xf32>, vector<2x16x8xf32> -> vector<2x16x32xf32>
    %276 = vector.shape_cast %275 : vector<2x16x32xf32> to vector<32x32xf32>
    %277 = arith.truncf %276 : vector<32x32xf32> to vector<32x32xbf16>
    %c1_111 = arith.constant 1 : index
    %c0_112 = arith.constant 0 : index
    %c0_113 = arith.constant 0 : index
    %278 = vector.load %arg9[%c1_111, %c0_112, %c0_113] : memref<3x32x32xbf16, #tpu.memory_space<vmem>>, vector<1x32x32xbf16>
    %279 = vector.shape_cast %278 : vector<1x32x32xbf16> to vector<32x32xbf16>
    %cst_114 = arith.constant dense<0.000000e+00> : vector<32x32xf32>
    %280 = tpu.matmul %277, %279, %cst_114 {dimension_numbers = #tpu.dot_dimension_numbers<[1], [0], [0], [1], [0, 0, 1, 1], [], []>} : vector<32x32xbf16>, vector<32x32xbf16>, vector<32x32xf32> -> vector<32x32xf32>
    %c1_115 = arith.constant 1 : index
    %c0_116 = arith.constant 0 : index
    %c0_117 = arith.constant 0 : index
    %281 = vector.load %arg10[%c1_115, %c0_116, %c0_117] : memref<3x1x32xf32, #tpu.memory_space<vmem>>, vector<1x1x32xf32>
    %282 = vector.shape_cast %281 : vector<1x1x32xf32> to vector<1x32xf32>
    %283 = vector.broadcast %282 : vector<1x32xf32> to vector<32x32xf32>
    %284 = arith.addf %280, %283 : vector<32x32xf32>
    %285 = arith.addf %176, %284 : vector<32x32xf32>
    %c1_118 = arith.constant 1 : index
    %c0_119 = arith.constant 0 : index
    %c0_120 = arith.constant 0 : index
    %286 = vector.load %arg11[%c1_118, %c0_119, %c0_120] : memref<3x1x32xf32, #tpu.memory_space<vmem>>, vector<1x1x32xf32>
    %287 = vector.shape_cast %286 : vector<1x1x32xf32> to vector<1x32xf32>
    %c1_121 = arith.constant 1 : index
    %c0_122 = arith.constant 0 : index
    %c0_123 = arith.constant 0 : index
    %288 = vector.load %arg12[%c1_121, %c0_122, %c0_123] : memref<3x1x32xf32, #tpu.memory_space<vmem>>, vector<1x1x32xf32>
    %289 = vector.shape_cast %288 : vector<1x1x32xf32> to vector<1x32xf32>
    %cst_124 = arith.constant dense<0.000000e+00> : vector<32xf32>
    %290 = vector.multi_reduction <add>, %285, %cst_124 [1] : vector<32x32xf32> to vector<32xf32>
    %291 = vector.shape_cast %290 : vector<32xf32> to vector<32x1xf32>
    %cst_125 = arith.constant 3.200000e+01 : f32
    %292 = vector.broadcast %cst_125 : f32 to vector<32x1xf32>
    %293 = arith.divf %291, %292 : vector<32x1xf32>
    %294 = vector.broadcast %293 : vector<32x1xf32> to vector<32x32xf32>
    %295 = arith.subf %285, %294 : vector<32x32xf32>
    %296 = arith.mulf %295, %295 : vector<32x32xf32>
    %cst_126 = arith.constant dense<0.000000e+00> : vector<32xf32>
    %297 = vector.multi_reduction <add>, %296, %cst_126 [1] : vector<32x32xf32> to vector<32xf32>
    %298 = vector.shape_cast %297 : vector<32xf32> to vector<32x1xf32>
    %cst_127 = arith.constant 3.200000e+01 : f32
    %299 = vector.broadcast %cst_127 : f32 to vector<32x1xf32>
    %300 = arith.divf %298, %299 : vector<32x1xf32>
    %cst_128 = arith.constant 9.99999997E-7 : f32
    %301 = vector.broadcast %cst_128 : f32 to vector<32x1xf32>
    %302 = arith.addf %300, %301 : vector<32x1xf32>
    %303 = math.rsqrt %302 : vector<32x1xf32>
    %304 = vector.broadcast %303 : vector<32x1xf32> to vector<32x32xf32>
    %305 = arith.mulf %295, %304 : vector<32x32xf32>
    %306 = vector.broadcast %287 : vector<1x32xf32> to vector<32x32xf32>
    %307 = arith.mulf %305, %306 : vector<32x32xf32>
    %308 = vector.broadcast %289 : vector<1x32xf32> to vector<32x32xf32>
    %309 = arith.addf %307, %308 : vector<32x32xf32>
    %310 = arith.truncf %309 : vector<32x32xf32> to vector<32x32xbf16>
    %c1_129 = arith.constant 1 : index
    %c0_130 = arith.constant 0 : index
    %c0_131 = arith.constant 0 : index
    %311 = vector.load %arg13[%c1_129, %c0_130, %c0_131] : memref<3x32x128xbf16, #tpu.memory_space<vmem>>, vector<1x32x128xbf16>
    %312 = vector.shape_cast %311 : vector<1x32x128xbf16> to vector<32x128xbf16>
    %cst_132 = arith.constant dense<0.000000e+00> : vector<32x128xf32>
    %313 = tpu.matmul %310, %312, %cst_132 {dimension_numbers = #tpu.dot_dimension_numbers<[1], [0], [0], [1], [0, 0, 1, 1], [], []>} : vector<32x32xbf16>, vector<32x128xbf16>, vector<32x128xf32> -> vector<32x128xf32>
    %c1_133 = arith.constant 1 : index
    %c0_134 = arith.constant 0 : index
    %c0_135 = arith.constant 0 : index
    %314 = vector.load %arg14[%c1_133, %c0_134, %c0_135] : memref<3x1x128xf32, #tpu.memory_space<vmem>>, vector<1x1x128xf32>
    %315 = vector.shape_cast %314 : vector<1x1x128xf32> to vector<1x128xf32>
    %316 = vector.broadcast %315 : vector<1x128xf32> to vector<32x128xf32>
    %317 = arith.addf %313, %316 : vector<32x128xf32>
    %318 = arith.mulf %317, %317 : vector<32x128xf32>
    %319 = arith.mulf %317, %318 : vector<32x128xf32>
    %cst_136 = arith.constant 4.471500e-02 : f32
    %320 = vector.broadcast %cst_136 : f32 to vector<32x128xf32>
    %321 = arith.mulf %320, %319 : vector<32x128xf32>
    %322 = arith.addf %317, %321 : vector<32x128xf32>
    %cst_137 = arith.constant 0.797884583 : f32
    %323 = vector.broadcast %cst_137 : f32 to vector<32x128xf32>
    %324 = arith.mulf %323, %322 : vector<32x128xf32>
    %325 = math.tanh %324 : vector<32x128xf32>
    %cst_138 = arith.constant 1.000000e+00 : f32
    %326 = vector.broadcast %cst_138 : f32 to vector<32x128xf32>
    %327 = arith.addf %326, %325 : vector<32x128xf32>
    %cst_139 = arith.constant 5.000000e-01 : f32
    %328 = vector.broadcast %cst_139 : f32 to vector<32x128xf32>
    %329 = arith.mulf %328, %327 : vector<32x128xf32>
    %330 = arith.mulf %317, %329 : vector<32x128xf32>
    %331 = arith.truncf %330 : vector<32x128xf32> to vector<32x128xbf16>
    %c1_140 = arith.constant 1 : index
    %c0_141 = arith.constant 0 : index
    %c0_142 = arith.constant 0 : index
    %332 = vector.load %arg15[%c1_140, %c0_141, %c0_142] : memref<3x128x32xbf16, #tpu.memory_space<vmem>>, vector<1x128x32xbf16>
    %333 = vector.shape_cast %332 : vector<1x128x32xbf16> to vector<128x32xbf16>
    %cst_143 = arith.constant dense<0.000000e+00> : vector<32x32xf32>
    %334 = tpu.matmul %331, %333, %cst_143 {dimension_numbers = #tpu.dot_dimension_numbers<[1], [0], [0], [1], [0, 0, 1, 1], [], []>} : vector<32x128xbf16>, vector<128x32xbf16>, vector<32x32xf32> -> vector<32x32xf32>
    %c1_144 = arith.constant 1 : index
    %c0_145 = arith.constant 0 : index
    %c0_146 = arith.constant 0 : index
    %335 = vector.load %arg16[%c1_144, %c0_145, %c0_146] : memref<3x1x32xf32, #tpu.memory_space<vmem>>, vector<1x1x32xf32>
    %336 = vector.shape_cast %335 : vector<1x1x32xf32> to vector<1x32xf32>
    %337 = vector.broadcast %336 : vector<1x32xf32> to vector<32x32xf32>
    %338 = arith.addf %334, %337 : vector<32x32xf32>
    %339 = arith.addf %285, %338 : vector<32x32xf32>
    %c2 = arith.constant 2 : index
    %c0_147 = arith.constant 0 : index
    %c0_148 = arith.constant 0 : index
    %340 = vector.load %arg5[%c2, %c0_147, %c0_148] : memref<3x1x32xf32, #tpu.memory_space<vmem>>, vector<1x1x32xf32>
    %341 = vector.shape_cast %340 : vector<1x1x32xf32> to vector<1x32xf32>
    %c2_149 = arith.constant 2 : index
    %c0_150 = arith.constant 0 : index
    %c0_151 = arith.constant 0 : index
    %342 = vector.load %arg6[%c2_149, %c0_150, %c0_151] : memref<3x1x32xf32, #tpu.memory_space<vmem>>, vector<1x1x32xf32>
    %343 = vector.shape_cast %342 : vector<1x1x32xf32> to vector<1x32xf32>
    %cst_152 = arith.constant dense<0.000000e+00> : vector<32xf32>
    %344 = vector.multi_reduction <add>, %339, %cst_152 [1] : vector<32x32xf32> to vector<32xf32>
    %345 = vector.shape_cast %344 : vector<32xf32> to vector<32x1xf32>
    %cst_153 = arith.constant 3.200000e+01 : f32
    %346 = vector.broadcast %cst_153 : f32 to vector<32x1xf32>
    %347 = arith.divf %345, %346 : vector<32x1xf32>
    %348 = vector.broadcast %347 : vector<32x1xf32> to vector<32x32xf32>
    %349 = arith.subf %339, %348 : vector<32x32xf32>
    %350 = arith.mulf %349, %349 : vector<32x32xf32>
    %cst_154 = arith.constant dense<0.000000e+00> : vector<32xf32>
    %351 = vector.multi_reduction <add>, %350, %cst_154 [1] : vector<32x32xf32> to vector<32xf32>
    %352 = vector.shape_cast %351 : vector<32xf32> to vector<32x1xf32>
    %cst_155 = arith.constant 3.200000e+01 : f32
    %353 = vector.broadcast %cst_155 : f32 to vector<32x1xf32>
    %354 = arith.divf %352, %353 : vector<32x1xf32>
    %cst_156 = arith.constant 9.99999997E-7 : f32
    %355 = vector.broadcast %cst_156 : f32 to vector<32x1xf32>
    %356 = arith.addf %354, %355 : vector<32x1xf32>
    %357 = math.rsqrt %356 : vector<32x1xf32>
    %358 = vector.broadcast %357 : vector<32x1xf32> to vector<32x32xf32>
    %359 = arith.mulf %349, %358 : vector<32x32xf32>
    %360 = vector.broadcast %341 : vector<1x32xf32> to vector<32x32xf32>
    %361 = arith.mulf %359, %360 : vector<32x32xf32>
    %362 = vector.broadcast %343 : vector<1x32xf32> to vector<32x32xf32>
    %363 = arith.addf %361, %362 : vector<32x32xf32>
    %364 = arith.truncf %363 : vector<32x32xf32> to vector<32x32xbf16>
    %c2_157 = arith.constant 2 : index
    %c0_158 = arith.constant 0 : index
    %c0_159 = arith.constant 0 : index
    %365 = vector.load %arg7[%c2_157, %c0_158, %c0_159] : memref<3x32x96xbf16, #tpu.memory_space<vmem>>, vector<1x32x96xbf16>
    %366 = vector.shape_cast %365 : vector<1x32x96xbf16> to vector<32x96xbf16>
    %cst_160 = arith.constant dense<0.000000e+00> : vector<32x96xf32>
    %367 = tpu.matmul %364, %366, %cst_160 {dimension_numbers = #tpu.dot_dimension_numbers<[1], [0], [0], [1], [0, 0, 1, 1], [], []>} : vector<32x32xbf16>, vector<32x96xbf16>, vector<32x96xf32> -> vector<32x96xf32>
    %c2_161 = arith.constant 2 : index
    %c0_162 = arith.constant 0 : index
    %c0_163 = arith.constant 0 : index
    %368 = vector.load %arg8[%c2_161, %c0_162, %c0_163] : memref<3x1x96xf32, #tpu.memory_space<vmem>>, vector<1x1x96xf32>
    %369 = vector.shape_cast %368 : vector<1x1x96xf32> to vector<1x96xf32>
    %370 = vector.broadcast %369 : vector<1x96xf32> to vector<32x96xf32>
    %371 = arith.addf %367, %370 : vector<32x96xf32>
    %372 = vector.extract_strided_slice %371 {offsets = [0, 0], sizes = [32, 32], strides = [1, 1]} : vector<32x96xf32> to vector<32x32xf32>
    %373 = vector.shape_cast %372 : vector<32x32xf32> to vector<2x16x32xf32>
    %374 = vector.extract_strided_slice %371 {offsets = [0, 32], sizes = [32, 32], strides = [1, 1]} : vector<32x96xf32> to vector<32x32xf32>
    %375 = vector.shape_cast %374 : vector<32x32xf32> to vector<2x16x32xf32>
    %376 = vector.extract_strided_slice %371 {offsets = [0, 64], sizes = [32, 32], strides = [1, 1]} : vector<32x96xf32> to vector<32x32xf32>
    %377 = vector.shape_cast %376 : vector<32x32xf32> to vector<2x16x32xf32>
    %378 = vector.extract_strided_slice %373 {offsets = [0, 0, 0], sizes = [2, 16, 8], strides = [1, 1, 1]} : vector<2x16x32xf32> to vector<2x16x8xf32>
    %379 = vector.extract_strided_slice %375 {offsets = [0, 0, 0], sizes = [2, 16, 8], strides = [1, 1, 1]} : vector<2x16x32xf32> to vector<2x16x8xf32>
    %380 = vector.extract_strided_slice %377 {offsets = [0, 0, 0], sizes = [2, 16, 8], strides = [1, 1, 1]} : vector<2x16x32xf32> to vector<2x16x8xf32>
    "tpu.trace_start"() <{level = 10 : i32, message = "bnd,bmd->bnm"}> : () -> ()
    %cst_164 = arith.constant dense<0.000000e+00> : vector<2x16x16xf32>
    %381 = tpu.matmul %378, %379, %cst_164 {dimension_numbers = #tpu.dot_dimension_numbers<[2], [2], [1], [1], [0, 0, 0, 1, 1, 1], [0], [0]>} : vector<2x16x8xf32>, vector<2x16x8xf32>, vector<2x16x16xf32> -> vector<2x16x16xf32>
    "tpu.trace_stop"() : () -> ()
    %cst_165 = arith.constant dense<0xFF800000> : vector<2x16xf32>
    %382 = vector.multi_reduction <maximumf>, %381, %cst_165 [2] : vector<2x16x16xf32> to vector<2x16xf32>
    %383 = vector.shape_cast %382 : vector<2x16xf32> to vector<2x16x1xf32>
    %384 = vector.broadcast %383 : vector<2x16x1xf32> to vector<2x16x16xf32>
    %385 = arith.subf %381, %384 : vector<2x16x16xf32>
    %386 = math.exp %385 : vector<2x16x16xf32>
    %cst_166 = arith.constant dense<0.000000e+00> : vector<2x16xf32>
    %387 = vector.multi_reduction <add>, %386, %cst_166 [2] : vector<2x16x16xf32> to vector<2x16xf32>
    %388 = vector.shape_cast %387 : vector<2x16xf32> to vector<2x16x1xf32>
    %389 = tpu.reciprocal %388 {approx = true} : vector<2x16x1xf32> -> vector<2x16x1xf32>
    %390 = vector.broadcast %389 : vector<2x16x1xf32> to vector<2x16x16xf32>
    %391 = arith.mulf %386, %390 : vector<2x16x16xf32>
    "tpu.trace_start"() <{level = 10 : i32, message = "bnm,bmd->bnd"}> : () -> ()
    %cst_167 = arith.constant dense<0.000000e+00> : vector<2x16x8xf32>
    %392 = tpu.matmul %391, %380, %cst_167 {dimension_numbers = #tpu.dot_dimension_numbers<[2], [1], [1], [2], [0, 0, 0, 1, 1, 2], [0], [0]>} : vector<2x16x16xf32>, vector<2x16x8xf32>, vector<2x16x8xf32> -> vector<2x16x8xf32>
    "tpu.trace_stop"() : () -> ()
    %393 = vector.extract_strided_slice %373 {offsets = [0, 0, 8], sizes = [2, 16, 8], strides = [1, 1, 1]} : vector<2x16x32xf32> to vector<2x16x8xf32>
    %394 = vector.extract_strided_slice %375 {offsets = [0, 0, 8], sizes = [2, 16, 8], strides = [1, 1, 1]} : vector<2x16x32xf32> to vector<2x16x8xf32>
    %395 = vector.extract_strided_slice %377 {offsets = [0, 0, 8], sizes = [2, 16, 8], strides = [1, 1, 1]} : vector<2x16x32xf32> to vector<2x16x8xf32>
    "tpu.trace_start"() <{level = 10 : i32, message = "bnd,bmd->bnm"}> : () -> ()
    %cst_168 = arith.constant dense<0.000000e+00> : vector<2x16x16xf32>
    %396 = tpu.matmul %393, %394, %cst_168 {dimension_numbers = #tpu.dot_dimension_numbers<[2], [2], [1], [1], [0, 0, 0, 1, 1, 1], [0], [0]>} : vector<2x16x8xf32>, vector<2x16x8xf32>, vector<2x16x16xf32> -> vector<2x16x16xf32>
    "tpu.trace_stop"() : () -> ()
    %cst_169 = arith.constant dense<0xFF800000> : vector<2x16xf32>
    %397 = vector.multi_reduction <maximumf>, %396, %cst_169 [2] : vector<2x16x16xf32> to vector<2x16xf32>
    %398 = vector.shape_cast %397 : vector<2x16xf32> to vector<2x16x1xf32>
    %399 = vector.broadcast %398 : vector<2x16x1xf32> to vector<2x16x16xf32>
    %400 = arith.subf %396, %399 : vector<2x16x16xf32>
    %401 = math.exp %400 : vector<2x16x16xf32>
    %cst_170 = arith.constant dense<0.000000e+00> : vector<2x16xf32>
    %402 = vector.multi_reduction <add>, %401, %cst_170 [2] : vector<2x16x16xf32> to vector<2x16xf32>
    %403 = vector.shape_cast %402 : vector<2x16xf32> to vector<2x16x1xf32>
    %404 = tpu.reciprocal %403 {approx = true} : vector<2x16x1xf32> -> vector<2x16x1xf32>
    %405 = vector.broadcast %404 : vector<2x16x1xf32> to vector<2x16x16xf32>
    %406 = arith.mulf %401, %405 : vector<2x16x16xf32>
    "tpu.trace_start"() <{level = 10 : i32, message = "bnm,bmd->bnd"}> : () -> ()
    %cst_171 = arith.constant dense<0.000000e+00> : vector<2x16x8xf32>
    %407 = tpu.matmul %406, %395, %cst_171 {dimension_numbers = #tpu.dot_dimension_numbers<[2], [1], [1], [2], [0, 0, 0, 1, 1, 2], [0], [0]>} : vector<2x16x16xf32>, vector<2x16x8xf32>, vector<2x16x8xf32> -> vector<2x16x8xf32>
    "tpu.trace_stop"() : () -> ()
    %408 = vector.extract_strided_slice %373 {offsets = [0, 0, 16], sizes = [2, 16, 8], strides = [1, 1, 1]} : vector<2x16x32xf32> to vector<2x16x8xf32>
    %409 = vector.extract_strided_slice %375 {offsets = [0, 0, 16], sizes = [2, 16, 8], strides = [1, 1, 1]} : vector<2x16x32xf32> to vector<2x16x8xf32>
    %410 = vector.extract_strided_slice %377 {offsets = [0, 0, 16], sizes = [2, 16, 8], strides = [1, 1, 1]} : vector<2x16x32xf32> to vector<2x16x8xf32>
    "tpu.trace_start"() <{level = 10 : i32, message = "bnd,bmd->bnm"}> : () -> ()
    %cst_172 = arith.constant dense<0.000000e+00> : vector<2x16x16xf32>
    %411 = tpu.matmul %408, %409, %cst_172 {dimension_numbers = #tpu.dot_dimension_numbers<[2], [2], [1], [1], [0, 0, 0, 1, 1, 1], [0], [0]>} : vector<2x16x8xf32>, vector<2x16x8xf32>, vector<2x16x16xf32> -> vector<2x16x16xf32>
    "tpu.trace_stop"() : () -> ()
    %cst_173 = arith.constant dense<0xFF800000> : vector<2x16xf32>
    %412 = vector.multi_reduction <maximumf>, %411, %cst_173 [2] : vector<2x16x16xf32> to vector<2x16xf32>
    %413 = vector.shape_cast %412 : vector<2x16xf32> to vector<2x16x1xf32>
    %414 = vector.broadcast %413 : vector<2x16x1xf32> to vector<2x16x16xf32>
    %415 = arith.subf %411, %414 : vector<2x16x16xf32>
    %416 = math.exp %415 : vector<2x16x16xf32>
    %cst_174 = arith.constant dense<0.000000e+00> : vector<2x16xf32>
    %417 = vector.multi_reduction <add>, %416, %cst_174 [2] : vector<2x16x16xf32> to vector<2x16xf32>
    %418 = vector.shape_cast %417 : vector<2x16xf32> to vector<2x16x1xf32>
    %419 = tpu.reciprocal %418 {approx = true} : vector<2x16x1xf32> -> vector<2x16x1xf32>
    %420 = vector.broadcast %419 : vector<2x16x1xf32> to vector<2x16x16xf32>
    %421 = arith.mulf %416, %420 : vector<2x16x16xf32>
    "tpu.trace_start"() <{level = 10 : i32, message = "bnm,bmd->bnd"}> : () -> ()
    %cst_175 = arith.constant dense<0.000000e+00> : vector<2x16x8xf32>
    %422 = tpu.matmul %421, %410, %cst_175 {dimension_numbers = #tpu.dot_dimension_numbers<[2], [1], [1], [2], [0, 0, 0, 1, 1, 2], [0], [0]>} : vector<2x16x16xf32>, vector<2x16x8xf32>, vector<2x16x8xf32> -> vector<2x16x8xf32>
    "tpu.trace_stop"() : () -> ()
    %423 = vector.extract_strided_slice %373 {offsets = [0, 0, 24], sizes = [2, 16, 8], strides = [1, 1, 1]} : vector<2x16x32xf32> to vector<2x16x8xf32>
    %424 = vector.extract_strided_slice %375 {offsets = [0, 0, 24], sizes = [2, 16, 8], strides = [1, 1, 1]} : vector<2x16x32xf32> to vector<2x16x8xf32>
    %425 = vector.extract_strided_slice %377 {offsets = [0, 0, 24], sizes = [2, 16, 8], strides = [1, 1, 1]} : vector<2x16x32xf32> to vector<2x16x8xf32>
    "tpu.trace_start"() <{level = 10 : i32, message = "bnd,bmd->bnm"}> : () -> ()
    %cst_176 = arith.constant dense<0.000000e+00> : vector<2x16x16xf32>
    %426 = tpu.matmul %423, %424, %cst_176 {dimension_numbers = #tpu.dot_dimension_numbers<[2], [2], [1], [1], [0, 0, 0, 1, 1, 1], [0], [0]>} : vector<2x16x8xf32>, vector<2x16x8xf32>, vector<2x16x16xf32> -> vector<2x16x16xf32>
    "tpu.trace_stop"() : () -> ()
    %cst_177 = arith.constant dense<0xFF800000> : vector<2x16xf32>
    %427 = vector.multi_reduction <maximumf>, %426, %cst_177 [2] : vector<2x16x16xf32> to vector<2x16xf32>
    %428 = vector.shape_cast %427 : vector<2x16xf32> to vector<2x16x1xf32>
    %429 = vector.broadcast %428 : vector<2x16x1xf32> to vector<2x16x16xf32>
    %430 = arith.subf %426, %429 : vector<2x16x16xf32>
    %431 = math.exp %430 : vector<2x16x16xf32>
    %cst_178 = arith.constant dense<0.000000e+00> : vector<2x16xf32>
    %432 = vector.multi_reduction <add>, %431, %cst_178 [2] : vector<2x16x16xf32> to vector<2x16xf32>
    %433 = vector.shape_cast %432 : vector<2x16xf32> to vector<2x16x1xf32>
    %434 = tpu.reciprocal %433 {approx = true} : vector<2x16x1xf32> -> vector<2x16x1xf32>
    %435 = vector.broadcast %434 : vector<2x16x1xf32> to vector<2x16x16xf32>
    %436 = arith.mulf %431, %435 : vector<2x16x16xf32>
    "tpu.trace_start"() <{level = 10 : i32, message = "bnm,bmd->bnd"}> : () -> ()
    %cst_179 = arith.constant dense<0.000000e+00> : vector<2x16x8xf32>
    %437 = tpu.matmul %436, %425, %cst_179 {dimension_numbers = #tpu.dot_dimension_numbers<[2], [1], [1], [2], [0, 0, 0, 1, 1, 2], [0], [0]>} : vector<2x16x16xf32>, vector<2x16x8xf32>, vector<2x16x8xf32> -> vector<2x16x8xf32>
    "tpu.trace_stop"() : () -> ()
    %438 = tpu.concatenate %392, %407, %422, %437 in 2 : vector<2x16x8xf32>, vector<2x16x8xf32>, vector<2x16x8xf32>, vector<2x16x8xf32> -> vector<2x16x32xf32>
    %439 = vector.shape_cast %438 : vector<2x16x32xf32> to vector<32x32xf32>
    %440 = arith.truncf %439 : vector<32x32xf32> to vector<32x32xbf16>
    %c2_180 = arith.constant 2 : index
    %c0_181 = arith.constant 0 : index
    %c0_182 = arith.constant 0 : index
    %441 = vector.load %arg9[%c2_180, %c0_181, %c0_182] : memref<3x32x32xbf16, #tpu.memory_space<vmem>>, vector<1x32x32xbf16>
    %442 = vector.shape_cast %441 : vector<1x32x32xbf16> to vector<32x32xbf16>
    %cst_183 = arith.constant dense<0.000000e+00> : vector<32x32xf32>
    %443 = tpu.matmul %440, %442, %cst_183 {dimension_numbers = #tpu.dot_dimension_numbers<[1], [0], [0], [1], [0, 0, 1, 1], [], []>} : vector<32x32xbf16>, vector<32x32xbf16>, vector<32x32xf32> -> vector<32x32xf32>
    %c2_184 = arith.constant 2 : index
    %c0_185 = arith.constant 0 : index
    %c0_186 = arith.constant 0 : index
    %444 = vector.load %arg10[%c2_184, %c0_185, %c0_186] : memref<3x1x32xf32, #tpu.memory_space<vmem>>, vector<1x1x32xf32>
    %445 = vector.shape_cast %444 : vector<1x1x32xf32> to vector<1x32xf32>
    %446 = vector.broadcast %445 : vector<1x32xf32> to vector<32x32xf32>
    %447 = arith.addf %443, %446 : vector<32x32xf32>
    %448 = arith.addf %339, %447 : vector<32x32xf32>
    %c2_187 = arith.constant 2 : index
    %c0_188 = arith.constant 0 : index
    %c0_189 = arith.constant 0 : index
    %449 = vector.load %arg11[%c2_187, %c0_188, %c0_189] : memref<3x1x32xf32, #tpu.memory_space<vmem>>, vector<1x1x32xf32>
    %450 = vector.shape_cast %449 : vector<1x1x32xf32> to vector<1x32xf32>
    %c2_190 = arith.constant 2 : index
    %c0_191 = arith.constant 0 : index
    %c0_192 = arith.constant 0 : index
    %451 = vector.load %arg12[%c2_190, %c0_191, %c0_192] : memref<3x1x32xf32, #tpu.memory_space<vmem>>, vector<1x1x32xf32>
    %452 = vector.shape_cast %451 : vector<1x1x32xf32> to vector<1x32xf32>
    %cst_193 = arith.constant dense<0.000000e+00> : vector<32xf32>
    %453 = vector.multi_reduction <add>, %448, %cst_193 [1] : vector<32x32xf32> to vector<32xf32>
    %454 = vector.shape_cast %453 : vector<32xf32> to vector<32x1xf32>
    %cst_194 = arith.constant 3.200000e+01 : f32
    %455 = vector.broadcast %cst_194 : f32 to vector<32x1xf32>
    %456 = arith.divf %454, %455 : vector<32x1xf32>
    %457 = vector.broadcast %456 : vector<32x1xf32> to vector<32x32xf32>
    %458 = arith.subf %448, %457 : vector<32x32xf32>
    %459 = arith.mulf %458, %458 : vector<32x32xf32>
    %cst_195 = arith.constant dense<0.000000e+00> : vector<32xf32>
    %460 = vector.multi_reduction <add>, %459, %cst_195 [1] : vector<32x32xf32> to vector<32xf32>
    %461 = vector.shape_cast %460 : vector<32xf32> to vector<32x1xf32>
    %cst_196 = arith.constant 3.200000e+01 : f32
    %462 = vector.broadcast %cst_196 : f32 to vector<32x1xf32>
    %463 = arith.divf %461, %462 : vector<32x1xf32>
    %cst_197 = arith.constant 9.99999997E-7 : f32
    %464 = vector.broadcast %cst_197 : f32 to vector<32x1xf32>
    %465 = arith.addf %463, %464 : vector<32x1xf32>
    %466 = math.rsqrt %465 : vector<32x1xf32>
    %467 = vector.broadcast %466 : vector<32x1xf32> to vector<32x32xf32>
    %468 = arith.mulf %458, %467 : vector<32x32xf32>
    %469 = vector.broadcast %450 : vector<1x32xf32> to vector<32x32xf32>
    %470 = arith.mulf %468, %469 : vector<32x32xf32>
    %471 = vector.broadcast %452 : vector<1x32xf32> to vector<32x32xf32>
    %472 = arith.addf %470, %471 : vector<32x32xf32>
    %473 = arith.truncf %472 : vector<32x32xf32> to vector<32x32xbf16>
    %c2_198 = arith.constant 2 : index
    %c0_199 = arith.constant 0 : index
    %c0_200 = arith.constant 0 : index
    %474 = vector.load %arg13[%c2_198, %c0_199, %c0_200] : memref<3x32x128xbf16, #tpu.memory_space<vmem>>, vector<1x32x128xbf16>
    %475 = vector.shape_cast %474 : vector<1x32x128xbf16> to vector<32x128xbf16>
    %cst_201 = arith.constant dense<0.000000e+00> : vector<32x128xf32>
    %476 = tpu.matmul %473, %475, %cst_201 {dimension_numbers = #tpu.dot_dimension_numbers<[1], [0], [0], [1], [0, 0, 1, 1], [], []>} : vector<32x32xbf16>, vector<32x128xbf16>, vector<32x128xf32> -> vector<32x128xf32>
    %c2_202 = arith.constant 2 : index
    %c0_203 = arith.constant 0 : index
    %c0_204 = arith.constant 0 : index
    %477 = vector.load %arg14[%c2_202, %c0_203, %c0_204] : memref<3x1x128xf32, #tpu.memory_space<vmem>>, vector<1x1x128xf32>
    %478 = vector.shape_cast %477 : vector<1x1x128xf32> to vector<1x128xf32>
    %479 = vector.broadcast %478 : vector<1x128xf32> to vector<32x128xf32>
    %480 = arith.addf %476, %479 : vector<32x128xf32>
    %481 = arith.mulf %480, %480 : vector<32x128xf32>
    %482 = arith.mulf %480, %481 : vector<32x128xf32>
    %cst_205 = arith.constant 4.471500e-02 : f32
    %483 = vector.broadcast %cst_205 : f32 to vector<32x128xf32>
    %484 = arith.mulf %483, %482 : vector<32x128xf32>
    %485 = arith.addf %480, %484 : vector<32x128xf32>
    %cst_206 = arith.constant 0.797884583 : f32
    %486 = vector.broadcast %cst_206 : f32 to vector<32x128xf32>
    %487 = arith.mulf %486, %485 : vector<32x128xf32>
    %488 = math.tanh %487 : vector<32x128xf32>
    %cst_207 = arith.constant 1.000000e+00 : f32
    %489 = vector.broadcast %cst_207 : f32 to vector<32x128xf32>
    %490 = arith.addf %489, %488 : vector<32x128xf32>
    %cst_208 = arith.constant 5.000000e-01 : f32
    %491 = vector.broadcast %cst_208 : f32 to vector<32x128xf32>
    %492 = arith.mulf %491, %490 : vector<32x128xf32>
    %493 = arith.mulf %480, %492 : vector<32x128xf32>
    %494 = arith.truncf %493 : vector<32x128xf32> to vector<32x128xbf16>
    %c2_209 = arith.constant 2 : index
    %c0_210 = arith.constant 0 : index
    %c0_211 = arith.constant 0 : index
    %495 = vector.load %arg15[%c2_209, %c0_210, %c0_211] : memref<3x128x32xbf16, #tpu.memory_space<vmem>>, vector<1x128x32xbf16>
    %496 = vector.shape_cast %495 : vector<1x128x32xbf16> to vector<128x32xbf16>
    %cst_212 = arith.constant dense<0.000000e+00> : vector<32x32xf32>
    %497 = tpu.matmul %494, %496, %cst_212 {dimension_numbers = #tpu.dot_dimension_numbers<[1], [0], [0], [1], [0, 0, 1, 1], [], []>} : vector<32x128xbf16>, vector<128x32xbf16>, vector<32x32xf32> -> vector<32x32xf32>
    %c2_213 = arith.constant 2 : index
    %c0_214 = arith.constant 0 : index
    %c0_215 = arith.constant 0 : index
    %498 = vector.load %arg16[%c2_213, %c0_214, %c0_215] : memref<3x1x32xf32, #tpu.memory_space<vmem>>, vector<1x1x32xf32>
    %499 = vector.shape_cast %498 : vector<1x1x32xf32> to vector<1x32xf32>
    %500 = vector.broadcast %499 : vector<1x32xf32> to vector<32x32xf32>
    %501 = arith.addf %497, %500 : vector<32x32xf32>
    %502 = arith.addf %448, %501 : vector<32x32xf32>
    %503 = vector.shape_cast %502 : vector<32x32xf32> to vector<2x16x32xf32>
    %cst_216 = arith.constant 0.000000e+00 : f32
    %504 = vector.broadcast %cst_216 : f32 to vector<2x16x96xf32>
    %505 = tpu.concatenate %503, %504 in 2 : vector<2x16x32xf32>, vector<2x16x96xf32> -> vector<2x16x128xf32>
    %c0_217 = arith.constant 0 : index
    %c0_218 = arith.constant 0 : index
    %c0_219 = arith.constant 0 : index
    %506 = vector.load %arg17[%c0_217, %c0_218, %c0_219] : memref<2x16x128xf32, #tpu.memory_space<vmem>>, vector<2x16x128xf32>
    tpu.vector_store %arg17[%c0_217, %c0_218, %c0_219], %505 {strides = array<i32>} : memref<2x16x128xf32, #tpu.memory_space<vmem>>, vector<2x16x128xf32>,
    return
  }
  func.func @transform_0(%arg0: i32) -> (i32, i32, i32) {
    %c0_i32 = arith.constant 0 : i32
    %c0_i32_0 = arith.constant 0 : i32
    %c0_i32_1 = arith.constant 0 : i32
    return %arg0, %c0_i32, %c0_i32_0 : i32, i32, i32
  }
  func.func @transform_1(%arg0: i32) -> (i32, i32) {
    %c0_i32 = arith.constant 0 : i32
    %c0_i32_0 = arith.constant 0 : i32
    %c0_i32_1 = arith.constant 0 : i32
    return %c0_i32, %c0_i32_0 : i32, i32
  }
  func.func @transform_2(%arg0: i32) -> (i32, i32) {
    %c0_i32 = arith.constant 0 : i32
    %c0_i32_0 = arith.constant 0 : i32
    %c0_i32_1 = arith.constant 0 : i32
    return %c0_i32, %c0_i32_0 : i32, i32
  }
  func.func @transform_3(%arg0: i32) -> (i32, i32) {
    %c0_i32 = arith.constant 0 : i32
    %c0_i32_0 = arith.constant 0 : i32
    %c0_i32_1 = arith.constant 0 : i32
    return %c0_i32, %c0_i32_0 : i32, i32
  }
  func.func @transform_4(%arg0: i32) -> (i32, i32, i32) {
    %c0_i32 = arith.constant 0 : i32
    %c0_i32_0 = arith.constant 0 : i32
    %c0_i32_1 = arith.constant 0 : i32
    %c0_i32_2 = arith.constant 0 : i32
    return %c0_i32, %c0_i32_0, %c0_i32_1 : i32, i32, i32
  }
  func.func @transform_5(%arg0: i32) -> (i32, i32, i32) {
    %c0_i32 = arith.constant 0 : i32
    %c0_i32_0 = arith.constant 0 : i32
    %c0_i32_1 = arith.constant 0 : i32
    %c0_i32_2 = arith.constant 0 : i32
    return %c0_i32, %c0_i32_0, %c0_i32_1 : i32, i32, i32
  }
  func.func @transform_6(%arg0: i32) -> (i32, i32, i32) {
    %c0_i32 = arith.constant 0 : i32
    %c0_i32_0 = arith.constant 0 : i32
    %c0_i32_1 = arith.constant 0 : i32
    %c0_i32_2 = arith.constant 0 : i32
    return %c0_i32, %c0_i32_0, %c0_i32_1 : i32, i32, i32
  }
  func.func @transform_7(%arg0: i32) -> (i32, i32, i32) {
    %c0_i32 = arith.constant 0 : i32
    %c0_i32_0 = arith.constant 0 : i32
    %c0_i32_1 = arith.constant 0 : i32
    %c0_i32_2 = arith.constant 0 : i32
    return %c0_i32, %c0_i32_0, %c0_i32_1 : i32, i32, i32
  }
  func.func @transform_8(%arg0: i32) -> (i32, i32, i32) {
    %c0_i32 = arith.constant 0 : i32
    %c0_i32_0 = arith.constant 0 : i32
    %c0_i32_1 = arith.constant 0 : i32
    %c0_i32_2 = arith.constant 0 : i32
    return %c0_i32, %c0_i32_0, %c0_i32_1 : i32, i32, i32
  }
  func.func @transform_9(%arg0: i32) -> (i32, i32, i32) {
    %c0_i32 = arith.constant 0 : i32
    %c0_i32_0 = arith.constant 0 : i32
    %c0_i32_1 = arith.constant 0 : i32
    %c0_i32_2 = arith.constant 0 : i32
    return %c0_i32, %c0_i32_0, %c0_i32_1 : i32, i32, i32
  }
  func.func @transform_10(%arg0: i32) -> (i32, i32, i32) {
    %c0_i32 = arith.constant 0 : i32
    %c0_i32_0 = arith.constant 0 : i32
    %c0_i32_1 = arith.constant 0 : i32
    %c0_i32_2 = arith.constant 0 : i32
    return %c0_i32, %c0_i32_0, %c0_i32_1 : i32, i32, i32
  }
  func.func @transform_11(%arg0: i32) -> (i32, i32, i32) {
    %c0_i32 = arith.constant 0 : i32
    %c0_i32_0 = arith.constant 0 : i32
    %c0_i32_1 = arith.constant 0 : i32
    %c0_i32_2 = arith.constant 0 : i32
    return %c0_i32, %c0_i32_0, %c0_i32_1 : i32, i32, i32
  }
  func.func @transform_12(%arg0: i32) -> (i32, i32, i32) {
    %c0_i32 = arith.constant 0 : i32
    %c0_i32_0 = arith.constant 0 : i32
    %c0_i32_1 = arith.constant 0 : i32
    %c0_i32_2 = arith.constant 0 : i32
    return %c0_i32, %c0_i32_0, %c0_i32_1 : i32, i32, i32
  }
  func.func @transform_13(%arg0: i32) -> (i32, i32, i32) {
    %c0_i32 = arith.constant 0 : i32
    %c0_i32_0 = arith.constant 0 : i32
    %c0_i32_1 = arith.constant 0 : i32
    %c0_i32_2 = arith.constant 0 : i32
    return %c0_i32, %c0_i32_0, %c0_i32_1 : i32, i32, i32
  }
  func.func @transform_14(%arg0: i32) -> (i32, i32, i32) {
    %c0_i32 = arith.constant 0 : i32
    %c0_i32_0 = arith.constant 0 : i32
    %c0_i32_1 = arith.constant 0 : i32
    %c0_i32_2 = arith.constant 0 : i32
    return %c0_i32, %c0_i32_0, %c0_i32_1 : i32, i32, i32
  }
  func.func @transform_15(%arg0: i32) -> (i32, i32, i32) {
    %c0_i32 = arith.constant 0 : i32
    %c0_i32_0 = arith.constant 0 : i32
    %c0_i32_1 = arith.constant 0 : i32
    %c0_i32_2 = arith.constant 0 : i32
    return %c0_i32, %c0_i32_0, %c0_i32_1 : i32, i32, i32
  }
  func.func @transform_16(%arg0: i32) -> (i32, i32, i32) {
    %c0_i32 = arith.constant 0 : i32
    %c0_i32_0 = arith.constant 0 : i32
    %c0_i32_1 = arith.constant 0 : i32
    return %arg0, %c0_i32, %c0_i32_0 : i32, i32, i32
  }
}

</mosaic_0001>

<bundles_post_ra>
// kernel: siglip_encoder_forward.1
= control target key start
LH: loop header
LB: loop body
LE: loop exit
PB: predicated region body
PF: predicated region fallthrough
CT: control target
= control target key end

     0   :  { %s10104_s0 = inlined_call_operand.vmem [shape: f32[2,16,128], index: 0, kind: input, shape index: {}]   ;;  %s10105_s1 = inlined_call_operand.vmem [shape: bf16[128,32], index: 1, kind: input, shape index: {}]   ;;  %s10106_s2 = inlined_call_operand.vmem [shape: f32[1,32], index: 2, kind: input, shape index: {}]   ;;  %s10107_s3 = inlined_call_operand.vmem [shape: f32[16,32], index: 3, kind: input, shape index: {}]   ;;  %s10108_s4 = inlined_call_operand.vmem [shape: f32[3,1,32], index: 4, kind: input, shape index: {}]   ;;  %s10109_s5 = inlined_call_operand.vmem [shape: f32[3,1,32], index: 5, kind: input, shape index: {}]   ;;  %s10110_s6 = inlined_call_operand.vmem [shape: bf16[3,32,96], index: 6, kind: input, shape index: {}]   ;;  %s10111_s7 = inlined_call_operand.vmem [shape: f32[3,1,96], index: 7, kind: input, shape index: {}]   ;;  %s10112_s8 = inlined_call_operand.vmem [shape: bf16[3,32,32], index: 8, kind: input, shape index: {}]   ;;  %s10113_s9 = inlined_call_operand.vmem [shape: f32[3,1,32], index: 9, kind: input, shape index: {}]   ;;  %s10114_s10 = inlined_call_operand.vmem [shape: f32[3,1,32], index: 10, kind: input, shape index: {}]   ;;  %s10115_s11 = inlined_call_operand.vmem [shape: f32[3,1,32], index: 11, kind: input, shape index: {}]   ;;  %s10116_s12 = inlined_call_operand.vmem [shape: bf16[3,32,128], index: 12, kind: input, shape index: {}]   ;;  %s10117_s13 = inlined_call_operand.vmem [shape: f32[3,1,128], index: 13, kind: input, shape index: {}]   ;;  %s10118_s14 = inlined_call_operand.vmem [shape: bf16[3,128,32], index: 14, kind: input, shape index: {}]   ;;  %s10119_s15 = inlined_call_operand.vmem [shape: f32[3,1,32], index: 15, kind: input, shape index: {}]   ;;  %s10120_s16 = inlined_call_operand.hbm [shape: f32[2,16,128], index: 16, kind: output, shape index: {}]  }
   0x1   :  { %10138 = sst [smem:[#allocation5_spill]] %s10104_s0 }
   0x2   :  { %v8521_v0 = vld [vmem:[%s10105_s1] sm:$0xff]   ;;  %v8522_v1 = vld [vmem:[%s10105_s1 + $0x8] sm:$0xff]   ;;  %v8523_v2 = vld [vmem:[%s10105_s1 + $0x10] sm:$0xff]   ;;  %s10139_s0 = sld [smem:[#allocation5_spill]] }
   0x3   :  { %7447 = vmatprep.subr.bf16.mxu0 %v8521_v0  ;;  %v8524_v3 = vld [vmem:[%s10105_s1 + $0x18] sm:$0xff]   ;;  %v8525_v7 = vld [vmem:[%s10105_s1 + $0x20] sm:$0xff]   ;;  %v8526_v8 = vld [vmem:[%s10105_s1 + $0x28] sm:$0xff]  }
   0x4   :  { %7448 = vmatpush3.bf16.msra.mxu0 %v8521_v0  ;;  %v8527_v9 = vld [vmem:[%s10105_s1 + $0x30] sm:$0xff]   ;;  %v8528_v10 = vld [vmem:[%s10105_s1 + $0x38] sm:$0xff]  }
   0x5   :  { %7449 = vmatprep.subr.bf16.mxu0 %v8522_v1 }
   0x8   :  { %7450 = vmatpush3.bf16.msra.mxu0 %v8522_v1  ;;  %v55_v4 = vld [vmem:[%s10139_s0] sm:$0xff]  ;;  %v56_v5 = vld [vmem:[%s10139_s0 + $0x8] sm:$0xff]  ;;  %v57_v11 = vld [vmem:[%s10139_s0 + $0x10] sm:$0xff] }
   0x9   :  { %7451 = vmatprep.subr.bf16.mxu0 %v8523_v2  ;;  %v59_v6 = vpack.c.bf16 %v56_v5, %v55_v4  ;;  %v58_v12 = vld [vmem:[%s10139_s0 + $0x18] sm:$0xff] }
   0xa   :  { %v60_v13 = vpack.c.bf16 %v58_v12, %v57_v11 }
   0xb   :  { %7463 = vmatprep.mubr.bf16.mxu0 %v59_v6 }
   0xc   :  { %7452 = vmatpush3.bf16.msra.mxu0 %v8523_v2 }
   0xd   :  { %7453 = vmatprep.subr.bf16.mxu0 %v8524_v3 }
  0x10   :  { %7454 = vmatpush3.bf16.msra.mxu0 %v8524_v3 }
  0x11   :  { %7455 = vmatprep.subr.bf16.mxu0 %v8525_v7 }
  0x14   :  { %7456 = vmatpush3.bf16.msra.mxu0 %v8525_v7 }
  0x15   :  { %7457 = vmatprep.subr.bf16.mxu0 %v8526_v8 }
  0x18   :  { %7458 = vmatpush3.bf16.msra.mxu0 %v8526_v8 }
  0x19   :  { %7459 = vmatprep.subr.bf16.mxu0 %v8527_v9 }
  0x1c   :  { %7460 = vmatpush3.bf16.msra.mxu0 %v8527_v9 }
  0x1d   :  { %7461 = vmatprep.subr.bf16.mxu0 %v8528_v10 }
  0x20   :  { %7462 = vmatpush3.bf16.msra.mxu0 %v8528_v10 }
  0x23   :  { %7464 = vmatmul.mubr.bf16.vlgmr.msra.gmra.mrb[0].mxu0 %v60_v13 }
  0x24   :  { %21 = vsyncpa [#allocation3], 0  ;;  %v6870_v14 = vld [vmem:[%s10106_s2] ss:$0 sm:$0xff]  ;;  %v182_v21 = vld [vmem:[%s10107_s3 + $0x8] sm:$0xff]  ;;  %vm189_vm0 = vcmask 261120  }
  0x25   :  { %v181_v16 = vld [vmem:[%s10107_s3] sm:$0xff]  ;;  %v8530_v54 = vld [vmem:[%s10110_s6 + $0x8] sm:$0xff]   ;;  %vm349_vm1 = vcmask 64512   ;;  %s8859_s29 = smov 96   ;;  %vm522_vm3 = vcmask 130048   ;;  %s8860_s30 = smov 64  }
  0x26   :  { %v8529_v53 = vld [vmem:[%s10110_s6] sm:$0xff]   ;;  %vm9070_vm2 = vmpackc.low %vm349_vm1, %vm349_vm1  ;;  %s8861_s17 = smov 88   ;;  %s8862_s18 = smov 120   ;;  %vm1997_vm4 = vcmask 195584  }
  0x27   :  { %7467 = vmatprep.subr.bf16.mxu1 %v8529_v53  ;;  %v6879_v5 = vld [vmem:[%s10108_s4] ss:$0 sm:$0xff]  ;;  %s8863_s1 = smov 56   ;;  %s8864_s19 = smov 80  }
  0x28   :  { %7468 = vmatpush3.bf16.msra.mxu1 %v8529_v53  ;;  %v6880_v10 = vld [vmem:[%s10109_s5] ss:$0 sm:$0xff]  ;;  %s10136_s0 = smov 112   ;;  %s10132_s20 = smov 72  }
  0x29   :  { %7469 = vmatprep.subr.bf16.mxu1 %v8530_v54  ;;  %s10134_s2 = smov 48   ;;  %s10130_s3 = smov 104  }
  0x2a   :  { %s10128_s21 = smov 40   ;;  %s10126_s22 = smov 8  }
  0x2b   :  { %s10124_s23 = smov 16   ;;  %s10122_s28 = smov 24  }
  0x2c   :  { %7470 = vmatpush3.bf16.msra.mxu1 %v8530_v54  ;;  %s10144_s26 = smov 16  }
  0xf6   :  { %v7465_v15 = vpop.f32.mrb[0].mxu0 }
  0xf7   :  { %v175_v17 = vadd.f32 %v7465_v15, %v6870_v14  ;;  %v166_v18 = vpop.f32.mrb[1].mxu0 }
  0xf8   :  { %v167_v19 = vadd.f32 %v6870_v14, %v166_v18  ;;  %v7466_v20 = vpop.f32.mrb[2].mxu0 }
  0xf9   :  { %v9005_v22 = vadd.f32 %v181_v16, %v175_v17  ;;  %v178_v23 = vadd.f32 %v7466_v20, %v6870_v14  ;;  %v169_v24 = vpop.f32.mrb[3].mxu0 }
  0xfa   :  { %v9007_v25 = vadd.f32 %v181_v16, %v167_v19  ;;  %v170_v26 = vadd.f32 %v6870_v14, %v169_v24  ;;  %v6881_v24 = vld [vmem:[%s10111_s7] ss:$0 sm:$0xff] }
  0xfb   :  { %v9009_v27 = vadd.f32 %v182_v21, %v178_v23  ;;  %v196_v28 = vsel %vm189_vm0, %v9005_v22, 0.0 }
  0xfc   :  { %v9013_v29 = vadd.f32 %v182_v21, %v170_v26  ;;  %197 = vadd.xlane.f32.xlu1 %v196_v28  ;;  %v190_v30 = vsel %vm189_vm0, %v9007_v25, 0.0 }
  0xfd   :  { %191 = vadd.xlane.f32.xlu0 %v190_v30  ;;  %v199_v31 = vsel %vm189_vm0, %v9009_v27, 0.0 }
  0xfe   :  { %v193_v32 = vsel %vm189_vm0, %v9013_v29, 0.0 }
 0x100   :  { %200 = vadd.xlane.f32.xlu1 %v199_v31 }
 0x101   :  { %194 = vadd.xlane.f32.xlu0 %v193_v32 }
 0x189   :  { %v198_v33 = vpop.xlane.xlu1 %197 }
 0x18a   :  { %v205_v34 = vmul.f32 0.03125, %v198_v33  ;;  %v192_v35 = vpop.xlane.xlu0 %191 }
 0x18b   :  { %v203_v36 = vmul.f32 0.03125, %v192_v35 }
 0x18c   :  { %v209_v37 = vsub.f32 %v9005_v22, %v205_v34 }
 0x18d   :  { %v207_v38 = vsub.f32 %v9007_v25, %v203_v36  ;;  %v201_v39 = vpop.xlane.xlu1 %200 }
 0x18e   :  { %v206_v40 = vmul.f32 0.03125, %v201_v39  ;;  %v195_v41 = vpop.xlane.xlu0 %194  ;;  %v213_v47 = vmul.f32 %v209_v37, %v209_v37 }
 0x18f   :  { %v204_v42 = vmul.f32 0.03125, %v195_v41  ;;  %v211_v43 = vmul.f32 %v207_v38, %v207_v38 }
 0x190   :  { %v210_v44 = vsub.f32 %v9009_v27, %v206_v40  ;;  %v221_v49 = vsel %vm189_vm0, %v213_v47, 0.0 }
 0x191   :  { %v208_v45 = vsub.f32 %v9013_v29, %v204_v42  ;;  %v215_v46 = vsel %vm189_vm0, %v211_v43, 0.0 }
 0x192   :  { %216 = vadd.xlane.f32.xlu0 %v215_v46  ;;  %v214_v51 = vmul.f32 %v210_v44, %v210_v44 }
 0x193   :  { %v212_v48 = vmul.f32 %v208_v45, %v208_v45 }
 0x194   :  { %v224_v52 = vsel %vm189_vm0, %v214_v51, 0.0 }
 0x195   :  { %v218_v50 = vsel %vm189_vm0, %v212_v48, 0.0 }
 0x196   :  { %222 = vadd.xlane.f32.xlu0 %v221_v49  ;;  %219 = vadd.xlane.f32.xlu1 %v218_v50 }
 0x19a   :  { %225 = vadd.xlane.f32.xlu1 %v224_v52 }
 0x21f   :  { %v217_v55 = vpop.xlane.xlu0 %216 }
 0x220   :  { %v227_v56 = vmul.f32 0.03125, %v217_v55 }
 0x222   :  { %v231_v57 = vadd.f32 1e-06, %v227_v56 }
 0x223   :  { %v220_v58 = vpop.xlane.xlu1 %219  ;;  %v223_v59 = vpop.xlane.xlu0 %222 }
 0x224   :  { %8571 = vrsqrt.f32 %v231_v57  ;;  %v228_v60 = vmul.f32 0.03125, %v220_v58  ;;  %v229_v61 = vmul.f32 0.03125, %v223_v59 }
 0x226   :  { %v232_v62 = vadd.f32 1e-06, %v228_v60  ;;  %v233_v63 = vadd.f32 1e-06, %v229_v61 }
 0x227   :  { %v226_v0 = vpop.xlane.xlu1 %225 }
 0x228   :  { %8573 = vrsqrt.f32 %v232_v62  ;;  %v230_v1 = vmul.f32 0.03125, %v226_v0 }
 0x229   :  { %8575 = vrsqrt.f32 %v233_v63 }
 0x22a   :  { %v234_v2 = vadd.f32 1e-06, %v230_v1 }
 0x22c   :  { %8577 = vrsqrt.f32 %v234_v2 }
 0x22e   :  { %v8572_v3 = vpop.eup %8571 }
 0x22f   :  { %v239_v4 = vmul.f32 %v8572_v3, %v207_v38 }
 0x231   :  { %v249_v9 = vmul.f32 %v6879_v5, %v239_v4 }
 0x232   :  { %v8574_v6 = vpop.eup %8573 }
 0x233   :  { %v8576_v7 = vpop.eup %8575  ;;  %v240_v8 = vmul.f32 %v8574_v6, %v208_v45  ;;  %v259_v14 = vadd.f32 %v6880_v10, %v249_v9 }
 0x234   :  { %v241_v11 = vmul.f32 %v8576_v7, %v209_v37 }
 0x235   :  { %v250_v12 = vmul.f32 %v6879_v5, %v240_v8 }
 0x236   :  { %v8578_v13 = vpop.eup %8577  ;;  %v251_v17 = vmul.f32 %v6879_v5, %v241_v11 }
 0x237   :  { %v260_v15 = vadd.f32 %v6880_v10, %v250_v12  ;;  %v242_v16 = vmul.f32 %v8578_v13, %v210_v44 }
 0x238   :  { %v261_v20 = vadd.f32 %v6880_v10, %v251_v17 }
 0x239   :  { %v263_v18 = vpack.c.bf16 %v260_v15, %v259_v14  ;;  %v252_v19 = vmul.f32 %v6879_v5, %v242_v16 }
 0x23b   :  { %7471 = vmatprep.mubr.msk.bf16.mxu1 %vm189_vm0, %v263_v18  ;;  %v262_v21 = vadd.f32 %v6880_v10, %v252_v19 }
 0x23d   :  { %v264_v23 = vpack.c.bf16 %v262_v21, %v261_v20 }
 0x23f   :  { %7472 = vmatmul.mubr.msk.bf16.vlgmr.msra.gmra.mrb[0].mxu1 %vm189_vm0, %v264_v23 }
 0x312   :  { %v7473_v26 = vpop.f32.mrb[0].mxu1 }
 0x313   :  { %v328_v28 = vpop.f32.mrb[1].mxu1  ;;  %v9048_v32 = vadd.f32 %v7473_v26, %v6881_v24 }
 0x314   :  { %v9046_v30 = vadd.f32 %v6881_v24, %v328_v28  ;;  %v7474_v31 = vpop.f32.mrb[2].mxu1 }
 0x315   :  { %v9050_v33 = vadd.f32 %v7474_v31, %v6881_v24  ;;  %v331_v34 = vpop.f32.mrb[3].mxu1 }
 0x316   :  { %v9052_v35 = vadd.f32 %v6881_v24, %v331_v34  ;;  %7479 = vmatprep.mubr.msk.f32.mxu1 %vm349_vm1, %v9046_v30 }
 0x317   :  { %v9058_v36 = vpack.i.bf16 %v9050_v33, %v9048_v32 }
 0x318   :  { %v9062_v37 = vpack.i.bf16 %v9052_v35, %v9046_v30 }
 0x319   :  { %8197 = vrot.lane.b32.xlu1 %v9058_v36, %s8859_s29 }
 0x31a   :  { %8192 = vrot.lane.b32.xlu0 %v9062_v37, %s8859_s29 }
 0x38b   :  { %v8198_v38 = vpop.permute.xlu1 %8197 }
 0x38c   :  { %v8193_v39 = vpop.permute.xlu0 %8192  ;;  %v8200_v40 = vunpack.i.h.bf16 %v8198_v38  ;;  %v8199_v41 = vunpack.i.l.bf16 %v8198_v38 }
 0x38d   :  { %v8195_v42 = vunpack.i.h.bf16 %v8193_v39  ;;  %v8194_v43 = vunpack.i.l.bf16 %v8193_v39 }
 0x38e   :  { %v7941_v46 = vpack.c.bf16 %v8200_v40, %v8199_v41 }
 0x38f   :  { %v7935_v45 = vpack.c.bf16 %v8195_v42, %v8194_v43 }
 0x391   :  { %7937 = vmatprep.subr.msk.bf16.mxu1 %vm9070_vm2, %v7935_v45 }
 0x392   :  { %7940 = vmatpush3.bf16.xpose.msk.msra.mxu1 %vm9070_vm2, %v7935_v45 }
 0x393   :  { %7943 = vmatprep.subr.msk.bf16.mxu1 %vm9070_vm2, %v7941_v46 }
 0x399   :  { %7480 = vmatmul.mubr.msk.f32.vlgmr.msra.gmra.mrb[4].mxu1 %vm349_vm1, %v9052_v35 }
 0x39a   :  { %7946 = vmatpush3.bf16.xpose.msk.msra.mxu1 %vm9070_vm2, %v7941_v46  ;;  %7486 = vmatprep.mubr.msk.f32.mxu1 %vm349_vm1, %v9048_v32 }
 0x3a1   :  { %7487 = vmatmul.mubr.msk.f32.vlgmr.msra.gmra.mrb[6].mxu1 %vm349_vm1, %v9050_v33 }
 0x46c   :  { %v7481_v47 = vpop.f32.mrb[4].mxu1 }
 0x46d   :  { %v424_v48 = vpop.f32.mrb[5].mxu1  ;;  %v526_v49 = vsel %vm522_vm3, %v7481_v47, -inf }
 0x46e   :  { %527 = vmax.xlane.f32.xlu0 %v526_v49  ;;  %v523_v50 = vsel %vm522_vm3, %v424_v48, -inf }
 0x46f   :  { %524 = vmax.xlane.f32.xlu1 %v523_v50 }
 0x474   :  { %v7488_v51 = vpop.f32.mrb[6].mxu1 }
 0x475   :  { %v513_v52 = vpop.f32.mrb[7].mxu1  ;;  %v532_v53 = vsel %vm522_vm3, %v7488_v51, -inf }
 0x476   :  { %533 = vmax.xlane.f32.xlu1 %v532_v53  ;;  %v529_v54 = vsel %vm522_vm3, %v513_v52, -inf }
 0x477   :  { %530 = vmax.xlane.f32.xlu0 %v529_v54 }
 0x4fb   :  { %v528_v55 = vpop.xlane.xlu0 %527 }
 0x4fc   :  { %v536_v56 = vsub.f32 %v7481_v47, %v528_v55  ;;  %v525_v57 = vpop.xlane.xlu1 %524 }
 0x4fd   :  { %v535_v58 = vsub.f32 %v424_v48, %v525_v57 }
 0x4fe   :  { %v541_v59 = vmul.f32 1.442695, %v536_v56 }
 0x4ff   :  { %v539_v60 = vmul.f32 1.442695, %v535_v58 }
 0x500   :  { %8579 = vpow2.f32 %v541_v59 }
 0x501   :  { %8581 = vpow2.f32 %v539_v60 }
 0x503   :  { %v534_v61 = vpop.xlane.xlu1 %533 }
 0x504   :  { %v538_v62 = vsub.f32 %v7488_v51, %v534_v61  ;;  %v531_v63 = vpop.xlane.xlu0 %530 }
 0x505   :  { %v537_v0 = vsub.f32 %v513_v52, %v531_v63 }
 0x506   :  { %v545_v1 = vmul.f32 1.442695, %v538_v62 }
 0x507   :  { %v543_v2 = vmul.f32 1.442695, %v537_v0 }
 0x508   :  { %8583 = vpow2.f32 %v545_v1 }
 0x509   :  { %8585 = vpow2.f32 %v543_v2 }
 0x50a   :  { %v8580_v3 = vpop.eup %8579 }
 0x50b   :  { %v8582_v4 = vpop.eup %8581  ;;  %v550_v5 = vsel %vm522_vm3, %v8580_v3, 0.0 }
 0x50c   :  { %551 = vadd.xlane.f32.xlu1 %v550_v5  ;;  %v547_v6 = vsel %vm522_vm3, %v8582_v4, 0.0 }
 0x50d   :  { %548 = vadd.xlane.f32.xlu0 %v547_v6 }
 0x512   :  { %v8584_v7 = vpop.eup %8583 }
 0x513   :  { %v8586_v8 = vpop.eup %8585  ;;  %v556_v9 = vsel %vm522_vm3, %v8584_v7, 0.0 }
 0x514   :  { %557 = vadd.xlane.f32.xlu1 %v556_v9  ;;  %v553_v10 = vsel %vm522_vm3, %v8586_v8, 0.0 }
 0x515   :  { %554 = vadd.xlane.f32.xlu0 %v553_v10 }
 0x525   :  { %8207 = vrot.lane.b32.xlu1 %v9058_v36, %s8860_s30 }
 0x529   :  { %8212 = vrot.lane.b32.xlu1 %v9058_v36, %s8861_s17 }
 0x52b   :  { %8202 = vrot.lane.b32.xlu0 %v9062_v37, %s8860_s30 }
 0x52d   :  { %832 = vrot.lane.b32.xlu1 %v9048_v32, %s8862_s18 }
 0x52f   :  { %834 = vrot.lane.b32.xlu0 %v9050_v33, %s8862_s18 }
 0x599   :  { %v552_v12 = vpop.xlane.xlu1 %551 }
 0x59a   :  { %v549_v11 = vpop.xlane.xlu0 %548 }
 0x59b   :  { %8587 = vrcp.f32 %v549_v11 }
 0x59c   :  { %8589 = vrcp.f32 %v552_v12 }
 0x5a1   :  { %v558_v13 = vpop.xlane.xlu1 %557 }
 0x5a2   :  { %v555_v14 = vpop.xlane.xlu0 %554 }
 0x5a3   :  { %8591 = vrcp.f32 %v555_v14 }
 0x5a4   :  { %8593 = vrcp.f32 %v558_v13 }
 0x5a5   :  { %v8588_v15 = vpop.eup %8587  ;;  %v8208_v16 = vpop.permute.xlu1 %8207 }
 0x5a6   :  { %v8203_v17 = vpop.permute.xlu0 %8202  ;;  %v563_v18 = vmul.f32 %v8588_v15, %v8582_v4  ;;  %v8210_v19 = vunpack.i.h.bf16 %v8208_v16  ;;  %v8209_v20 = vunpack.i.l.bf16 %v8208_v16  ;;  %v8590_v28 = vpop.eup %8589 }
 0x5a7   :  { %v8205_v21 = vunpack.i.h.bf16 %v8203_v17  ;;  %v8204_v23 = vunpack.i.l.bf16 %v8203_v17  ;;  %v564_v40 = vmul.f32 %v8590_v28, %v8580_v3 }
 0x5a8   :  { %7493 = vmatprep.mubr.msk.f32.mxu1 %vm522_vm3, %v563_v18  ;;  %v7951_v38 = vpack.c.bf16 %v8210_v19, %v8209_v20 }
 0x5a9   :  { %v8213_v24 = vpop.permute.xlu1 %8212  ;;  %v7947_v26 = vpack.c.bf16 %v8205_v21, %v8204_v23 }
 0x5aa   :  { %v8215_v31 = vunpack.i.h.bf16 %v8213_v24  ;;  %v8214_v34 = vunpack.i.l.bf16 %v8213_v24  ;;  %v835_v47 = vpop.permute.xlu0 %834 }
 0x5ab   :  { %7948 = vmatprep.subr.bf16.mxu1 %v7947_v26 }
 0x5ac   :  { %7950 = vmatpush3.bf16.msra.mxu1 %v7947_v26  ;;  %v7961_v43 = vpack.c.bf16 %v8215_v31, %v8214_v34 }
 0x5ad   :  { %v8592_v39 = vpop.eup %8591  ;;  %7952 = vmatprep.subr.bf16.mxu1 %v7951_v38  ;;  %v833_v46 = vpop.permute.xlu1 %832 }
 0x5ae   :  { %v8594_v41 = vpop.eup %8593  ;;  %v565_v42 = vmul.f32 %v8592_v39, %v8586_v8 }
 0x5af   :  { %7494 = vmatmul.mubr.msk.f32.vlgmr.msra.gmra.mrb[8].mxu1 %vm522_vm3, %v564_v40  ;;  %v566_v45 = vmul.f32 %v8594_v41, %v8584_v7 }
 0x5b0   :  { %7954 = vmatpush3.bf16.msra.mxu1 %v7951_v38  ;;  %7500 = vmatprep.mubr.msk.f32.mxu1 %vm522_vm3, %v565_v42 }
 0x5b1   :  { %7963 = vmatprep.subr.msk.bf16.mxu1 %vm9070_vm2, %v7961_v43 }
 0x5b3   :  { %7501 = vmatmul.mubr.msk.f32.vlgmr.msra.gmra.mrb[10].mxu1 %vm522_vm3, %v566_v45 }
 0x5b4   :  { %7514 = vmatprep.mubr.msk.f32.mxu1 %vm349_vm1, %v833_v46 }
 0x5b9   :  { %7966 = vmatpush3.bf16.xpose.msk.msra.mxu1 %vm9070_vm2, %v7961_v43 }
 0x5c0   :  { %7515 = vmatmul.mubr.msk.f32.vlgmr.msra.gmra.mrb[12].mxu1 %vm349_vm1, %v835_v47 }
 0x682   :  { %v9116_v48 = vpop.f32.mrb[8].mxu1 }
 0x683   :  { %v9118_v49 = vpop.f32.mrb[9].mxu1 }
 0x686   :  { %v9120_v50 = vpop.f32.mrb[10].mxu1 }
 0x687   :  { %v9122_v51 = vpop.f32.mrb[11].mxu1 }
 0x693   :  { %v7516_v52 = vpop.f32.mrb[12].mxu1 }
 0x694   :  { %v914_v53 = vpop.f32.mrb[13].mxu1  ;;  %v932_v54 = vsel %vm522_vm3, %v7516_v52, -inf }
 0x695   :  { %933 = vmax.xlane.f32.xlu0 %v932_v54  ;;  %v929_v55 = vsel %vm522_vm3, %v914_v53, -inf }
 0x696   :  { %930 = vmax.xlane.f32.xlu1 %v929_v55 }
 0x6a7   :  { %8217 = vrot.lane.b32.xlu1 %v9058_v36, %s8863_s1 }
 0x6ab   :  { %8227 = vrot.lane.b32.xlu1 %v9058_v36, %s8864_s19 }
 0x6af   :  { %1141 = vrot.lane.b32.xlu1 %v9046_v30, %s10136_s0 }
 0x6b3   :  { %1143 = vrot.lane.b32.xlu1 %v9052_v35, %s10136_s0 }
 0x6b7   :  { %1234 = vrot.lane.b32.xlu1 %v9050_v33, %s10136_s0 }
 0x722   :  { %v934_v56 = vpop.xlane.xlu0 %933 }
 0x723   :  { %v938_v57 = vsub.f32 %v7516_v52, %v934_v56  ;;  %v931_v58 = vpop.xlane.xlu1 %930 }
 0x724   :  { %v937_v59 = vsub.f32 %v914_v53, %v931_v58 }
 0x725   :  { %v945_v60 = vmul.f32 1.442695, %v938_v57 }
 0x726   :  { %v943_v61 = vmul.f32 1.442695, %v937_v59 }
 0x727   :  { %8595 = vpow2.f32 %v945_v60  ;;  %v8218_v62 = vpop.permute.xlu1 %8217 }
 0x728   :  { %v8220_v63 = vunpack.i.h.bf16 %v8218_v62  ;;  %v8219_v0 = vunpack.i.l.bf16 %v8218_v62  ;;  %8597 = vpow2.f32 %v943_v61 }
 0x72a   :  { %v7971_v1 = vpack.c.bf16 %v8220_v63, %v8219_v0 }
 0x72b   :  { %v8228_v12 = vpop.permute.xlu1 %8227 }
 0x72c   :  { %7972 = vmatprep.subr.bf16.mxu1 %v7971_v1  ;;  %v8230_v15 = vunpack.i.h.bf16 %v8228_v12  ;;  %v8229_v16 = vunpack.i.l.bf16 %v8228_v12 }
 0x72d   :  { %7974 = vmatpush3.bf16.msra.mxu1 %v7971_v1 }
 0x72e   :  { %v7981_v19 = vpack.c.bf16 %v8230_v15, %v8229_v16 }
 0x72f   :  { %v1142_v20 = vpop.permute.xlu1 %1141 }
 0x731   :  { %v8596_v2 = vpop.eup %8595 }
 0x732   :  { %v956_v3 = vsel %vm522_vm3, %v8596_v2, 0.0  ;;  %v8598_v4 = vpop.eup %8597 }
 0x733   :  { %957 = vadd.xlane.f32.xlu0 %v956_v3  ;;  %v953_v5 = vsel %vm522_vm3, %v8598_v4, 0.0  ;;  %v1144_v21 = vpop.permute.xlu1 %1143 }
 0x737   :  { %954 = vadd.xlane.f32.xlu0 %v953_v5  ;;  %v1235_v24 = vpop.permute.xlu1 %1234 }
 0x74d   :  { %8222 = vrot.lane.b32.xlu0 %v9062_v37, %s8864_s19 }
 0x751   :  { %1232 = vrot.lane.b32.xlu0 %v9048_v32, %s10136_s0 }
 0x7c0   :  { %v958_v6 = vpop.xlane.xlu0 %957 }
 0x7c1   :  { %8599 = vrcp.f32 %v958_v6 }
 0x7c4   :  { %v955_v7 = vpop.xlane.xlu0 %954 }
 0x7c5   :  { %8601 = vrcp.f32 %v955_v7 }
 0x7c8   :  { %v8223_v8 = vpop.permute.xlu0 %8222 }
 0x7c9   :  { %v8225_v9 = vunpack.i.h.bf16 %v8223_v8  ;;  %v8224_v10 = vunpack.i.l.bf16 %v8223_v8 }
 0x7cb   :  { %v7975_v11 = vpack.c.bf16 %v8225_v9, %v8224_v10  ;;  %v8600_v13 = vpop.eup %8599 }
 0x7cc   :  { %v966_v18 = vmul.f32 %v8600_v13, %v8596_v2  ;;  %v1233_v23 = vpop.permute.xlu0 %1232 }
 0x7cd   :  { %7977 = vmatprep.subr.msk.bf16.mxu1 %vm9070_vm2, %v7975_v11 }
 0x7cf   :  { %v8602_v14 = vpop.eup %8601 }
 0x7d0   :  { %v965_v17 = vmul.f32 %v8602_v14, %v8598_v4 }
 0x7d2   :  { %7528 = vmatprep.mubr.msk.f32.mxu1 %vm522_vm3, %v965_v17 }
 0x7d3   :  { %7529 = vmatmul.mubr.msk.f32.vlgmr.msra.gmra.mrb[14].mxu1 %vm522_vm3, %v966_v18 }
 0x7d4   :  { %7980 = vmatpush3.bf16.xpose.msk.msra.mxu1 %vm9070_vm2, %v7975_v11  ;;  %7535 = vmatprep.mubr.msk.f32.mxu1 %vm349_vm1, %v1142_v20 }
 0x7d5   :  { %7983 = vmatprep.subr.msk.bf16.mxu1 %vm9070_vm2, %v7981_v19 }
 0x7db   :  { %7536 = vmatmul.mubr.msk.f32.vlgmr.msra.gmra.mrb[16].mxu1 %vm349_vm1, %v1144_v21 }
 0x7dc   :  { %7986 = vmatpush3.bf16.xpose.msk.msra.mxu1 %vm9070_vm2, %v7981_v19  ;;  %7542 = vmatprep.mubr.msk.f32.mxu1 %vm349_vm1, %v1233_v23 }
 0x7e3   :  { %7543 = vmatmul.mubr.msk.f32.vlgmr.msra.gmra.mrb[18].mxu1 %vm349_vm1, %v1235_v24 }
 0x8a6   :  { %v9156_v26 = vpop.f32.mrb[14].mxu1 }
 0x8a7   :  { %v9158_v28 = vpop.f32.mrb[15].mxu1 }
 0x8a8   :  { %v8276_v31 = vpack.i.bf16 %v9156_v26, %v9158_v28 }
 0x8ae   :  { %v9162_v34 = vpop.f32.mrb[16].mxu1 }
 0x8af   :  { %v9164_v38 = vpop.f32.mrb[17].mxu1  ;;  %v1326_v24 = vsel %vm522_vm3, %v9162_v34, -inf }
 0x8b0   :  { %v1323_v23 = vsel %vm522_vm3, %v9164_v38, -inf }
 0x8b6   :  { %v7544_v39 = vpop.f32.mrb[18].mxu1 }
 0x8b7   :  { %v1314_v40 = vpop.f32.mrb[19].mxu1  ;;  %v1332_v41 = vsel %vm522_vm3, %v7544_v39, -inf }
 0x8b8   :  { %1333 = vmax.xlane.f32.xlu1 %v1332_v41  ;;  %v1329_v42 = vsel %vm522_vm3, %v1314_v40, -inf }
 0x8b9   :  { %1330 = vmax.xlane.f32.xlu0 %v1329_v42 }
 0x8c9   :  { %8237 = vrot.lane.b32.xlu1 %v9062_v37, %s8861_s17 }
 0x8cd   :  { %8242 = vrot.lane.b32.xlu1 %v9062_v37, %s10132_s20 }
 0x8cf   :  { %8232 = vrot.lane.b32.xlu0 %v9058_v36, %s10134_s2 }
 0x8d1   :  { %741 = vrot.lane.b32.xlu1 %v9046_v30, %s8862_s18 }
 0x8d5   :  { %743 = vrot.lane.b32.xlu1 %v9052_v35, %s8862_s18 }
 0x8d9   :  { %1543 = vrot.lane.b32.xlu1 %v9052_v35, %s10130_s3 }
 0x8dd   :  { %1634 = vrot.lane.b32.xlu1 %v9050_v33, %s10130_s3 }
 0x945   :  { %v1334_v43 = vpop.xlane.xlu1 %1333 }
 0x946   :  { %v1338_v45 = vsub.f32 %v7544_v39, %v1334_v43  ;;  %v1331_v46 = vpop.xlane.xlu0 %1330 }
 0x947   :  { %v1337_v47 = vsub.f32 %v1314_v40, %v1331_v46 }
 0x948   :  { %v1345_v52 = vmul.f32 1.442695, %v1338_v45 }
 0x949   :  { %v1343_v53 = vmul.f32 1.442695, %v1337_v47  ;;  %v8238_v54 = vpop.permute.xlu1 %8237 }
 0x94a   :  { %8603 = vpow2.f32 %v1345_v52  ;;  %v8240_v55 = vunpack.i.h.bf16 %v8238_v54  ;;  %v8239_v56 = vunpack.i.l.bf16 %v8238_v54  ;;  %v8233_v57 = vpop.permute.xlu0 %8232 }
 0x94b   :  { %v8235_v58 = vunpack.i.h.bf16 %v8233_v57  ;;  %v8234_v59 = vunpack.i.l.bf16 %v8233_v57  ;;  %8605 = vpow2.f32 %v1343_v53 }
 0x94c   :  { %v7955_v60 = vpack.c.bf16 %v8240_v55, %v8239_v56 }
 0x94d   :  { %v8243_v61 = vpop.permute.xlu1 %8242  ;;  %v7991_v35 = vpack.c.bf16 %v8235_v58, %v8234_v59 }
 0x94e   :  { %v8245_v62 = vunpack.i.h.bf16 %v8243_v61  ;;  %v8244_v63 = vunpack.i.l.bf16 %v8243_v61  ;;  %7957 = vmatprep.subr.msk.bf16.mxu0 %vm9070_vm2, %v7955_v60 }
 0x94f   :  { %7960 = vmatpush3.bf16.xpose.msk.msra.mxu0 %vm9070_vm2, %v7955_v60  ;;  %7992 = vmatprep.subr.bf16.mxu1 %v7991_v35 }
 0x950   :  { %v7995_v33 = vpack.c.bf16 %v8245_v62, %v8244_v63  ;;  %7994 = vmatpush3.bf16.msra.mxu1 %v7991_v35 }
 0x951   :  { %v742_v0 = vpop.permute.xlu1 %741 }
 0x952   :  { %7507 = vmatprep.mubr.msk.f32.mxu0 %vm349_vm1, %v742_v0  ;;  %7997 = vmatprep.subr.msk.bf16.mxu1 %vm9070_vm2, %v7995_v33 }
 0x954   :  { %v8604_v1 = vpop.eup %8603 }
 0x955   :  { %v744_v2 = vpop.permute.xlu1 %743  ;;  %v1356_v3 = vsel %vm522_vm3, %v8604_v1, 0.0  ;;  %v8606_v4 = vpop.eup %8605 }
 0x956   :  { %7508 = vmatmul.mubr.msk.f32.vlgmr.msra.gmra.mrb[4].mxu0 %vm349_vm1, %v744_v2  ;;  %1357 = vadd.xlane.f32.xlu0 %v1356_v3  ;;  %v1353_v5 = vsel %vm522_vm3, %v8606_v4, 0.0 }
 0x95a   :  { %1354 = vadd.xlane.f32.xlu0 %v1353_v5 }
 0x970   :  { %8247 = vrot.lane.b32.xlu0 %v9058_v36, %s10132_s20 }
 0x974   :  { %1541 = vrot.lane.b32.xlu0 %v9046_v30, %s10130_s3  ;;  %v1544_v30 = vpop.permute.xlu1 %1543 }
 0x978   :  { %1632 = vrot.lane.b32.xlu0 %v9048_v32, %s10130_s3  ;;  %v1635_v17 = vpop.permute.xlu1 %1634 }
 0x9e3   :  { %v1358_v6 = vpop.xlane.xlu0 %1357 }
 0x9e4   :  { %8607 = vrcp.f32 %v1358_v6 }
 0x9e7   :  { %v1355_v7 = vpop.xlane.xlu0 %1354 }
 0x9e8   :  { %8609 = vrcp.f32 %v1355_v7 }
 0x9eb   :  { %v8248_v8 = vpop.permute.xlu0 %8247 }
 0x9ec   :  { %v8250_v11 = vunpack.i.h.bf16 %v8248_v8  ;;  %v8249_v12 = vunpack.i.l.bf16 %v8248_v8 }
 0x9ee   :  { %v8608_v9 = vpop.eup %8607  ;;  %v8001_v15 = vpack.c.bf16 %v8250_v11, %v8249_v12 }
 0x9ef   :  { %v1366_v14 = vmul.f32 %v8608_v9, %v8604_v1  ;;  %v1542_v16 = vpop.permute.xlu0 %1541 }
 0x9f2   :  { %v8610_v10 = vpop.eup %8609 }
 0x9f3   :  { %v1365_v13 = vmul.f32 %v8610_v10, %v8606_v4  ;;  %v1633_v32 = vpop.permute.xlu0 %1632 }
 0x9f5   :  { %7556 = vmatprep.mubr.msk.f32.mxu1 %vm522_vm3, %v1365_v13 }
 0x9f6   :  { %7557 = vmatmul.mubr.msk.f32.vlgmr.msra.gmra.mrb[20].mxu1 %vm522_vm3, %v1366_v14 }
 0x9f7   :  { %8000 = vmatpush3.bf16.xpose.msk.msra.mxu1 %vm9070_vm2, %v7995_v33  ;;  %7563 = vmatprep.mubr.msk.f32.mxu1 %vm349_vm1, %v1542_v16 }
 0x9f8   :  { %8003 = vmatprep.subr.msk.bf16.mxu1 %vm9070_vm2, %v8001_v15 }
 0x9fe   :  { %7564 = vmatmul.mubr.msk.f32.vlgmr.msra.gmra.mrb[22].mxu1 %vm349_vm1, %v1544_v30 }
 0x9ff   :  { %8006 = vmatpush3.bf16.xpose.msk.msra.mxu1 %vm9070_vm2, %v8001_v15  ;;  %7570 = vmatprep.mubr.msk.f32.mxu1 %vm349_vm1, %v1633_v32 }
 0xa06   :  { %7571 = vmatmul.mubr.msk.f32.vlgmr.msra.gmra.mrb[24].mxu1 %vm349_vm1, %v1635_v17 }
 0xa29   :  { %v7509_v18 = vpop.f32.mrb[4].mxu0 }
 0xa2a   :  { %v823_v19 = vpop.f32.mrb[5].mxu0  ;;  %v926_v20 = vsel %vm522_vm3, %v7509_v18, -inf }
 0xa2b   :  { %927 = vmax.xlane.f32.xlu1 %v926_v20  ;;  %v923_v21 = vsel %vm522_vm3, %v823_v19, -inf }
 0xa2c   :  { %924 = vmax.xlane.f32.xlu0 %v923_v21 }
 0xa30   :  { %1324 = vmax.xlane.f32.xlu0 %v1323_v23 }
 0xa34   :  { %1327 = vmax.xlane.f32.xlu0 %v1326_v24 }
 0xab8   :  { %v928_v41 = vpop.xlane.xlu1 %927 }
 0xab9   :  { %v925_v39 = vpop.xlane.xlu0 %924  ;;  %v936_v42 = vsub.f32 %v7509_v18, %v928_v41 }
 0xaba   :  { %v935_v45 = vsub.f32 %v823_v19, %v925_v39 }
 0xabb   :  { %v941_v53 = vmul.f32 1.442695, %v936_v42 }
 0xabc   :  { %v939_v55 = vmul.f32 1.442695, %v935_v45 }
 0xabd   :  { %v1325_v40 = vpop.xlane.xlu0 %1324  ;;  %8611 = vpow2.f32 %v941_v53 }
 0xabe   :  { %v1335_v56 = vsub.f32 %v9164_v38, %v1325_v40  ;;  %8613 = vpow2.f32 %v939_v55 }
 0xac0   :  { %v1339_v59 = vmul.f32 1.442695, %v1335_v56 }
 0xac1   :  { %v1328_v46 = vpop.xlane.xlu0 %1327 }
 0xac2   :  { %v1336_v54 = vsub.f32 %v9162_v34, %v1328_v46 }
 0xac4   :  { %v1341_v57 = vmul.f32 1.442695, %v1336_v54 }
 0xac6   :  { %8615 = vpow2.f32 %v1341_v57 }
 0xac7   :  { %8617 = vpow2.f32 %v1339_v59  ;;  %v9227_v33 = vpop.eup %8611 }
 0xac8   :  { %v8614_v0 = vpop.eup %8613  ;;  %v950_v1 = vsel %vm522_vm3, %v9227_v33, 0.0 }
 0xac9   :  { %v9216_v43 = vpop.f32.mrb[20].mxu1  ;;  %v947_v3 = vsel %vm522_vm3, %v8614_v0, 0.0 }
 0xaca   :  { %v9218_v47 = vpop.f32.mrb[21].mxu1 }
 0xacb   :  { %v8286_v52 = vpack.i.bf16 %v9216_v43, %v9218_v47 }
 0xad0   :  { %v9232_v2 = vpop.eup %8615 }
 0xad1   :  { %v7565_v58 = vpop.f32.mrb[22].mxu1  ;;  %v9235_v4 = vpop.eup %8617  ;;  %v1350_v5 = vsel %vm522_vm3, %v9232_v2, 0.0 }
 0xad2   :  { %v1623_v60 = vpop.f32.mrb[23].mxu1  ;;  %v1726_v61 = vsel %vm522_vm3, %v7565_v58, -inf  ;;  %v1347_v6 = vsel %vm522_vm3, %v9235_v4, 0.0 }
 0xad3   :  { %1727 = vmax.xlane.f32.xlu1 %v1726_v61  ;;  %v1723_v35 = vsel %vm522_vm3, %v1623_v60, -inf }
 0xad4   :  { %1724 = vmax.xlane.f32.xlu0 %v1723_v35 }
 0xad9   :  { %v7572_v62 = vpop.f32.mrb[24].mxu1 }
 0xada   :  { %v1714_v63 = vpop.f32.mrb[25].mxu1  ;;  %v1732_v34 = vsel %vm522_vm3, %v7572_v62, -inf }
 0xadb   :  { %1733 = vmax.xlane.f32.xlu1 %v1732_v34  ;;  %v1729_v38 = vsel %vm522_vm3, %v1714_v63, -inf }
 0xadc   :  { %1730 = vmax.xlane.f32.xlu0 %v1729_v38 }
 0xadf   :  { %951 = vadd.xlane.f32.xlu1 %v950_v1 }
 0xae0   :  { %948 = vadd.xlane.f32.xlu0 %v947_v3 }
 0xae3   :  { %1351 = vadd.xlane.f32.xlu1 %v1350_v5 }
 0xae4   :  { %1348 = vadd.xlane.f32.xlu0 %v1347_v6 }
 0xb60   :  { %v1728_v7 = vpop.xlane.xlu1 %1727 }
 0xb61   :  { %v1736_v8 = vsub.f32 %v7565_v58, %v1728_v7  ;;  %v1725_v9 = vpop.xlane.xlu0 %1724 }
 0xb62   :  { %v1735_v10 = vsub.f32 %v1623_v60, %v1725_v9 }
 0xb63   :  { %v1741_v11 = vmul.f32 1.442695, %v1736_v8 }
 0xb64   :  { %v1739_v12 = vmul.f32 1.442695, %v1735_v10 }
 0xb65   :  { %8619 = vpow2.f32 %v1741_v11 }
 0xb66   :  { %8621 = vpow2.f32 %v1739_v12 }
 0xb68   :  { %v1734_v13 = vpop.xlane.xlu1 %1733 }
 0xb69   :  { %v1738_v14 = vsub.f32 %v7572_v62, %v1734_v13  ;;  %v1731_v15 = vpop.xlane.xlu0 %1730 }
 0xb6a   :  { %v1737_v16 = vsub.f32 %v1714_v63, %v1731_v15  ;;  %v8532_v15 = vld [vmem:[%s10112_s8 + $0x8] sm:$0xff]  }
 0xb6b   :  { %v1745_v30 = vmul.f32 1.442695, %v1738_v14 }
 0xb6c   :  { %v1743_v32 = vmul.f32 1.442695, %v1737_v16  ;;  %v952_v45 = vpop.xlane.xlu1 %951 }
 0xb6d   :  { %8623 = vpow2.f32 %v1745_v30  ;;  %v949_v17 = vpop.xlane.xlu0 %948 }
 0xb6e   :  { %8625 = vpow2.f32 %v1743_v32 }
 0xb6f   :  { %v9241_v18 = vpop.eup %8619  ;;  %8627 = vrcp.f32 %v949_v17 }
 0xb70   :  { %v9243_v19 = vpop.eup %8621  ;;  %v1750_v20 = vsel %vm522_vm3, %v9241_v18, 0.0  ;;  %v1352_v46 = vpop.xlane.xlu1 %1351  ;;  %8629 = vrcp.f32 %v952_v45 }
 0xb71   :  { %1751 = vadd.xlane.f32.xlu1 %v1750_v20  ;;  %v1747_v21 = vsel %vm522_vm3, %v9243_v19, 0.0  ;;  %v1349_v53 = vpop.xlane.xlu0 %1348 }
 0xb72   :  { %1748 = vadd.xlane.f32.xlu0 %v1747_v21  ;;  %8631 = vrcp.f32 %v1349_v53 }
 0xb77   :  { %v9249_v23 = vpop.eup %8623 }
 0xb78   :  { %v8626_v24 = vpop.eup %8625  ;;  %v1756_v39 = vsel %vm522_vm3, %v9249_v23, 0.0 }
 0xb79   :  { %1757 = vadd.xlane.f32.xlu1 %v1756_v39  ;;  %v1753_v40 = vsel %vm522_vm3, %v8626_v24, 0.0  ;;  %v8628_v41 = vpop.eup %8627 }
 0xb7a   :  { %1754 = vadd.xlane.f32.xlu0 %v1753_v40  ;;  %v963_v42 = vmul.f32 %v8628_v41, %v8614_v0  ;;  %v8630_v58 = vpop.eup %8629 }
 0xb7b   :  { %v964_v34 = vmul.f32 %v8630_v58, %v9227_v33 }
 0xb7c   :  { %7521 = vmatprep.mubr.msk.f32.mxu0 %vm522_vm3, %v963_v42  ;;  %v8632_v59 = vpop.eup %8631 }
 0xb7d   :  { %v1363_v3 = vmul.f32 %v8632_v59, %v9235_v4 }
 0xb8a   :  { %8257 = vrot.lane.b32.xlu1 %v9062_v37, %s10134_s2 }
 0xb8e   :  { %8262 = vrot.lane.b32.xlu1 %v9062_v37, %s10128_s21 }
 0xb90   :  { %8252 = vrot.lane.b32.xlu0 %v9062_v37, %s8863_s1 }
 0xb92   :  { %8267 = vrot.lane.b32.xlu1 %v9058_v36, %s10128_s21  ;;  %s10142_s21 = smov 40  }
 0xb96   :  { %8277 = vrot.lane.b32.xlu1 %v8276_v31, %s10126_s22 }
 0xb9a   :  { %8287 = vrot.lane.b32.xlu1 %v8286_v52, %s10124_s23 }
 0xbfe   :  { %v1752_v54 = vpop.xlane.xlu1 %1751 }
 0xbff   :  { %v1749_v37 = vpop.xlane.xlu0 %1748 }
 0xc06   :  { %v1758_v36 = vpop.xlane.xlu1 %1757 }
 0xc07   :  { %v1755_v55 = vpop.xlane.xlu0 %1754 }
 0xc08   :  { %8633 = vrcp.f32 %v1755_v55 }
 0xc09   :  { %8635 = vrcp.f32 %v1352_v46 }
 0xc0a   :  { %8637 = vrcp.f32 %v1749_v37  ;;  %v8258_v26 = vpop.permute.xlu1 %8257 }
 0xc0b   :  { %8639 = vrcp.f32 %v1758_v36  ;;  %v8253_v28 = vpop.permute.xlu0 %8252  ;;  %v8260_v31 = vunpack.i.h.bf16 %v8258_v26  ;;  %v8259_v56 = vunpack.i.l.bf16 %v8258_v26 }
 0xc0c   :  { %v8255_v57 = vunpack.i.h.bf16 %v8253_v28  ;;  %v8254_v43 = vunpack.i.l.bf16 %v8253_v28  ;;  %8641 = vrcp.f32 %v1752_v54 }
 0xc0d   :  { %v7987_v35 = vpack.c.bf16 %v8260_v31, %v8259_v56 }
 0xc0e   :  { %v8263_v47 = vpop.permute.xlu1 %8262  ;;  %v7967_v52 = vpack.c.bf16 %v8255_v57, %v8254_v43 }
 0xc0f   :  { %v8265_v60 = vunpack.i.h.bf16 %v8263_v47  ;;  %v8264_v61 = vunpack.i.l.bf16 %v8263_v47 }
 0xc10   :  { %7968 = vmatprep.subr.bf16.mxu0 %v7967_v52 }
 0xc11   :  { %7970 = vmatpush3.bf16.msra.mxu0 %v7967_v52  ;;  %v8007_v7 = vpack.c.bf16 %v8265_v60, %v8264_v61 }
 0xc12   :  { %v8634_v62 = vpop.eup %8633  ;;  %v8268_v63 = vpop.permute.xlu1 %8267  ;;  %7988 = vmatprep.subr.bf16.mxu0 %v7987_v35 }
 0xc13   :  { %v8636_v38 = vpop.eup %8635  ;;  %v8270_v0 = vunpack.i.h.bf16 %v8268_v63  ;;  %v8269_v1 = vunpack.i.l.bf16 %v8268_v63  ;;  %v1765_v5 = vmul.f32 %v8634_v62, %v8626_v24 }
 0xc14   :  { %v8638_v6 = vpop.eup %8637  ;;  %7522 = vmatmul.mubr.msk.f32.vlgmr.msra.gmra.mrb[6].mxu0 %vm522_vm3, %v964_v34  ;;  %v1364_v33 = vmul.f32 %v8636_v38, %v9232_v2  ;;  %v8531_v2 = vld [vmem:[%s10112_s8] sm:$0xff]  }
 0xc15   :  { %v8640_v8 = vpop.eup %8639  ;;  %7990 = vmatpush3.bf16.msra.mxu0 %v7987_v35  ;;  %7549 = vmatprep.mubr.msk.f32.mxu0 %vm522_vm3, %v1363_v3  ;;  %v8011_v9 = vpack.c.bf16 %v8270_v0, %v8269_v1  ;;  %v1763_v11 = vmul.f32 %v8638_v6, %v9243_v19 }
 0xc16   :  { %7584 = vmatprep.mubr.msk.f32.mxu1 %vm522_vm3, %v1765_v5  ;;  %8008 = vmatprep.subr.bf16.mxu0 %v8007_v7  ;;  %v8642_v10 = vpop.eup %8641  ;;  %v1766_v4 = vmul.f32 %v8640_v8, %v9249_v23  ;;  %v8278_v39 = vpop.permute.xlu1 %8277 }
 0xc17   :  { %8012 = vmatprep.subr.bf16.mxu1 %v8011_v9  ;;  %v1764_v12 = vmul.f32 %v8642_v10, %v9241_v18  ;;  %v8280_v42 = vunpack.i.h.bf16 %v8278_v39  ;;  %v8279_v45 = vunpack.i.l.bf16 %v8278_v39 }
 0xc18   :  { %7550 = vmatmul.mubr.msk.f32.vlgmr.msra.gmra.mrb[8].mxu0 %vm522_vm3, %v1364_v33  ;;  %8014 = vmatpush3.bf16.msra.mxu1 %v8011_v9 }
 0xc19   :  { %8010 = vmatpush3.bf16.msra.mxu0 %v8007_v7  ;;  %7577 = vmatprep.mubr.msk.f32.mxu0 %vm522_vm3, %v1763_v11  ;;  %v1992_v28 = vsel %vm349_vm1, %v9120_v50, %v8280_v42  ;;  %v1991_v31 = vsel %vm349_vm1, %v9122_v51, %v8279_v45 }
 0xc1a   :  { %7587 = vmatprep.subr.bf16.mxu0 %v8531_v2  ;;  %v8288_v41 = vpop.permute.xlu1 %8287 }
 0xc1b   :  { %7585 = vmatmul.mubr.msk.f32.vlgmr.msra.gmra.mrb[26].mxu1 %vm522_vm3, %v1766_v4  ;;  %v8290_v46 = vunpack.i.h.bf16 %v8288_v41  ;;  %v8289_v53 = vunpack.i.l.bf16 %v8288_v41 }
 0xc1c   :  { %7578 = vmatmul.mubr.msk.f32.vlgmr.msra.gmra.mrb[10].mxu0 %vm522_vm3, %v1764_v12 }
 0xc1d   :  { %7588 = vmatpush3.bf16.msra.mxu0 %v8531_v2  ;;  %v1995_v57 = vsel %vm522_vm3, %v1991_v31, %v8289_v53  ;;  %v1996_v43 = vsel %vm522_vm3, %v1992_v28, %v8290_v46  ;;  %v8533_v53 = vld [vmem:[%s10116_s12] sm:$0xff]  }
 0xc1e   :  { %7589 = vmatprep.subr.bf16.mxu0 %v8532_v15  ;;  %7595 = vmatprep.subr.bf16.mxu1 %v8533_v53 }
 0xc1f   :  { %7596 = vmatpush3.bf16.msra.mxu1 %v8533_v53 }
 0xc21   :  { %7590 = vmatpush3.bf16.msra.mxu0 %v8532_v15 }
 0xce7   :  { %v7523_v13 = vpop.f32.mrb[6].mxu0 }
 0xce8   :  { %v1045_v14 = vpop.f32.mrb[7].mxu0 }
 0xce9   :  { %v8271_v16 = vpack.i.bf16 %v7523_v13, %v1045_v14 }
 0xceb   :  { %8272 = vrot.lane.b32.xlu0 %v8271_v16, %s10126_s22  ;;  %v7551_v30 = vpop.f32.mrb[8].mxu0  ;;  %s10143_s22 = smov 8  }
 0xcec   :  { %v1445_v32 = vpop.f32.mrb[9].mxu0 }
 0xced   :  { %v8281_v17 = vpack.i.bf16 %v7551_v30, %v1445_v32 }
 0xcee   :  { %v7586_v18 = vpop.f32.mrb[26].mxu1 }
 0xcef   :  { %v1932_v19 = vpop.f32.mrb[27].mxu1  ;;  %8282 = vrot.lane.b32.xlu0 %v8281_v17, %s10124_s23  ;;  %v7579_v20 = vpop.f32.mrb[10].mxu0 }
 0xcf0   :  { %v8296_v21 = vpack.i.bf16 %v7586_v18, %v1932_v19  ;;  %v1845_v23 = vpop.f32.mrb[11].mxu0 }
 0xcf1   :  { %v8291_v24 = vpack.i.bf16 %v7579_v20, %v1845_v23 }
 0xcf2   :  { %8297 = vrot.lane.b32.xlu1 %v8296_v21, %s10122_s28 }
 0xcf3   :  { %8292 = vrot.lane.b32.xlu0 %v8291_v24, %s10122_s28  ;;  %s10145_s28 = smov 24  }
 0xd5d   :  { %v8273_v40 = vpop.permute.xlu0 %8272 }
 0xd5e   :  { %v8275_v37 = vunpack.i.h.bf16 %v8273_v40  ;;  %v8274_v36 = vunpack.i.l.bf16 %v8273_v40 }
 0xd60   :  { %v1990_v59 = vsel %vm349_vm1, %v9116_v48, %v8275_v37  ;;  %v1989_v60 = vsel %vm349_vm1, %v9118_v49, %v8274_v36  ;;  %v6934_v48 = vld [vmem:[%s10113_s9] ss:$0 sm:$0xff] }
 0xd61   :  { %v8283_v54 = vpop.permute.xlu0 %8282 }
 0xd62   :  { %v8285_v55 = vunpack.i.h.bf16 %v8283_v54  ;;  %v8284_v26 = vunpack.i.l.bf16 %v8283_v54  ;;  %v8534_v54 = vld [vmem:[%s10116_s12 + $0x8] sm:$0xff]  }
 0xd63   :  { %7597 = vmatprep.subr.bf16.mxu1 %v8534_v54 }
 0xd64   :  { %v8298_v56 = vpop.permute.xlu1 %8297  ;;  %v1994_v35 = vsel %vm522_vm3, %v1990_v59, %v8285_v55  ;;  %v1993_v51 = vsel %vm522_vm3, %v1989_v60, %v8284_v26  ;;  %7598 = vmatpush3.bf16.msra.mxu1 %v8534_v54  ;;  %v6939_v60 = vld [vmem:[%s10114_s10] ss:$0 sm:$0xff] }
 0xd65   :  { %v8300_v47 = vunpack.i.h.bf16 %v8298_v56  ;;  %v8299_v52 = vunpack.i.l.bf16 %v8298_v56  ;;  %v8293_v58 = vpop.permute.xlu0 %8292 }
 0xd66   :  { %v8295_v61 = vunpack.i.h.bf16 %v8293_v58  ;;  %v8294_v50 = vunpack.i.l.bf16 %v8293_v58 }
 0xd67   :  { %v2001_v62 = vsel %vm1997_vm4, %v1996_v43, %v8300_v47  ;;  %v2000_v63 = vsel %vm1997_vm4, %v1995_v57, %v8299_v52 }
 0xd68   :  { %v2003_v34 = vpack.c.bf16 %v2001_v62, %v2000_v63  ;;  %v1999_v38 = vsel %vm1997_vm4, %v1994_v35, %v8295_v61  ;;  %v1998_v0 = vsel %vm1997_vm4, %v1993_v51, %v8294_v50  ;;  %v6940_v63 = vld [vmem:[%s10115_s11] ss:$0 sm:$0xff] }
 0xd69   :  { %v2002_v1 = vpack.c.bf16 %v1999_v38, %v1998_v0 }
 0xd6b   :  { %7591 = vmatprep.mubr.msk.bf16.mxu0 %vm189_vm0, %v2002_v1 }
 0xd6c   :  { %7592 = vmatmul.mubr.msk.bf16.vlgmr.msra.gmra.mrb[12].mxu0 %vm189_vm0, %v2003_v34 }
 0xe3f   :  { %v7593_v49 = vpop.f32.mrb[12].mxu0 }
 0xe40   :  { %v2067_v3 = vpop.f32.mrb[13].mxu0  ;;  %v2076_v5 = vadd.f32 %v7593_v49, %v6934_v48 }
 0xe41   :  { %v2068_v6 = vadd.f32 %v6934_v48, %v2067_v3  ;;  %v7594_v7 = vpop.f32.mrb[14].mxu0 }
 0xe42   :  { %v2070_v8 = vpop.f32.mrb[15].mxu0  ;;  %v9319_v10 = vadd.f32 %v2076_v5, %v9005_v22  ;;  %v2079_v11 = vadd.f32 %v7594_v7, %v6934_v48 }
 0xe43   :  { %v9316_v9 = vadd.f32 %v2068_v6, %v9007_v25  ;;  %v2071_v33 = vadd.f32 %v6934_v48, %v2070_v8 }
 0xe44   :  { %v9329_v13 = vadd.f32 %v2079_v11, %v9009_v27  ;;  %v2094_v25 = vsel %vm189_vm0, %v9319_v10, 0.0  ;;  %v8535_v11 = vld [vmem:[%s10118_s14] sm:$0xff]  }
 0xe45   :  { %v9322_v4 = vadd.f32 %v2071_v33, %v9013_v29  ;;  %v2088_v12 = vsel %vm189_vm0, %v9316_v9, 0.0  ;;  %7603 = vmatprep.subr.bf16.mxu0 %v8535_v11 }
 0xe46   :  { %2089 = vadd.xlane.f32.xlu0 %v2088_v12  ;;  %v2097_v22 = vsel %vm189_vm0, %v9329_v13, 0.0  ;;  %7604 = vmatpush3.bf16.msra.mxu0 %v8535_v11  ;;  %v8536_v12 = vld [vmem:[%s10118_s14 + $0x8] sm:$0xff]  }
 0xe47   :  { %v2091_v2 = vsel %vm189_vm0, %v9322_v4, 0.0  ;;  %7605 = vmatprep.subr.bf16.mxu0 %v8536_v12 }
 0xe48   :  { %2092 = vadd.xlane.f32.xlu1 %v2091_v2  ;;  %v8537_v2 = vld [vmem:[%s10118_s14 + $0x10] sm:$0xff]  }
 0xe4a   :  { %2095 = vadd.xlane.f32.xlu0 %v2094_v25  ;;  %7606 = vmatpush3.bf16.msra.mxu0 %v8536_v12  ;;  %v8538_v25 = vld [vmem:[%s10118_s14 + $0x18] sm:$0xff]  }
 0xe4b   :  { %7607 = vmatprep.subr.bf16.mxu0 %v8537_v2 }
 0xe4e   :  { %2098 = vadd.xlane.f32.xlu0 %v2097_v22  ;;  %7608 = vmatpush3.bf16.msra.mxu0 %v8537_v2  ;;  %v8539_v22 = vld [vmem:[%s10118_s14 + $0x20] sm:$0xff]  }
 0xe4f   :  { %7609 = vmatprep.subr.bf16.mxu0 %v8538_v25 }
 0xe52   :  { %7610 = vmatpush3.bf16.msra.mxu0 %v8538_v25 }
 0xe53   :  { %7611 = vmatprep.subr.bf16.mxu0 %v8539_v22 }
 0xe56   :  { %7612 = vmatpush3.bf16.msra.mxu0 %v8539_v22 }
 0xed3   :  { %v2090_v29 = vpop.xlane.xlu0 %2089 }
 0xed4   :  { %v2100_v14 = vmul.f32 0.03125, %v2090_v29  ;;  %v8540_v29 = vld [vmem:[%s10118_s14 + $0x28] sm:$0xff]  }
 0xed5   :  { %v2093_v15 = vpop.xlane.xlu1 %2092  ;;  %7613 = vmatprep.subr.bf16.mxu0 %v8540_v29 }
 0xed6   :  { %v2104_v16 = vsub.f32 %v9316_v9, %v2100_v14  ;;  %v2101_v30 = vmul.f32 0.03125, %v2093_v15  ;;  %7614 = vmatpush3.bf16.msra.mxu0 %v8540_v29  ;;  %v8541_v14 = vld [vmem:[%s10118_s14 + $0x30] sm:$0xff]   ;;  %v8542_v15 = vld [vmem:[%s10118_s14 + $0x38] sm:$0xff]  }
 0xed7   :  { %v2096_v32 = vpop.xlane.xlu0 %2095  ;;  %7615 = vmatprep.subr.bf16.mxu0 %v8541_v14 }
 0xed8   :  { %v2105_v17 = vsub.f32 %v9322_v4, %v2101_v30  ;;  %v2102_v18 = vmul.f32 0.03125, %v2096_v32  ;;  %v2108_v27 = vmul.f32 %v2104_v16, %v2104_v16 }
 0xeda   :  { %v2106_v19 = vsub.f32 %v9319_v10, %v2102_v18  ;;  %v2112_v20 = vsel %vm189_vm0, %v2108_v27, 0.0  ;;  %v2109_v21 = vmul.f32 %v2105_v17, %v2105_v17  ;;  %7616 = vmatpush3.bf16.msra.mxu0 %v8541_v14 }
 0xedb   :  { %2113 = vadd.xlane.f32.xlu0 %v2112_v20  ;;  %v2099_v23 = vpop.xlane.xlu0 %2098  ;;  %7617 = vmatprep.subr.bf16.mxu0 %v8542_v15 }
 0xedc   :  { %v2103_v24 = vmul.f32 0.03125, %v2099_v23  ;;  %v2115_v39 = vsel %vm189_vm0, %v2109_v21, 0.0  ;;  %v2110_v40 = vmul.f32 %v2106_v19, %v2106_v19 }
 0xedd   :  { %2116 = vadd.xlane.f32.xlu1 %v2115_v39 }
 0xede   :  { %v2107_v41 = vsub.f32 %v9329_v13, %v2103_v24  ;;  %v2118_v42 = vsel %vm189_vm0, %v2110_v40, 0.0  ;;  %7618 = vmatpush3.bf16.msra.mxu0 %v8542_v15 }
 0xedf   :  { %2119 = vadd.xlane.f32.xlu0 %v2118_v42 }
 0xee0   :  { %v2111_v45 = vmul.f32 %v2107_v41, %v2107_v41 }
 0xee2   :  { %v2121_v46 = vsel %vm189_vm0, %v2111_v45, 0.0 }
 0xee3   :  { %2122 = vadd.xlane.f32.xlu1 %v2121_v46 }
 0xf68   :  { %v2114_v37 = vpop.xlane.xlu0 %2113 }
 0xf69   :  { %v2124_v36 = vmul.f32 0.03125, %v2114_v37 }
 0xf6a   :  { %v2117_v55 = vpop.xlane.xlu1 %2116 }
 0xf6b   :  { %v2128_v26 = vadd.f32 1e-06, %v2124_v36  ;;  %v2125_v28 = vmul.f32 0.03125, %v2117_v55 }
 0xf6c   :  { %v2120_v31 = vpop.xlane.xlu0 %2119 }
 0xf6d   :  { %8643 = vrsqrt.f32 %v2128_v26  ;;  %v2129_v56 = vadd.f32 1e-06, %v2125_v28  ;;  %v2126_v57 = vmul.f32 0.03125, %v2120_v31 }
 0xf6f   :  { %8645 = vrsqrt.f32 %v2129_v56  ;;  %v2130_v43 = vadd.f32 1e-06, %v2126_v57 }
 0xf70   :  { %v2123_v47 = vpop.xlane.xlu1 %2122 }
 0xf71   :  { %8647 = vrsqrt.f32 %v2130_v43  ;;  %v2127_v52 = vmul.f32 0.03125, %v2123_v47 }
 0xf73   :  { %v2131_v58 = vadd.f32 1e-06, %v2127_v52 }
 0xf75   :  { %8649 = vrsqrt.f32 %v2131_v58 }
 0xf77   :  { %v8644_v59 = vpop.eup %8643 }
 0xf78   :  { %v2136_v61 = vmul.f32 %v8644_v59, %v2104_v16  ;;  %v6941_v16 = vld [vmem:[%s10117_s13] ss:$0 sm:$0xff] }
 0xf79   :  { %v8646_v50 = vpop.eup %8645 }
 0xf7a   :  { %v2137_v35 = vmul.f32 %v8646_v50, %v2105_v17  ;;  %v2146_v51 = vmul.f32 %v6939_v60, %v2136_v61 }
 0xf7b   :  { %v8648_v62 = vpop.eup %8647 }
 0xf7c   :  { %v2138_v34 = vmul.f32 %v8648_v62, %v2106_v19  ;;  %v2147_v38 = vmul.f32 %v6939_v60, %v2137_v35  ;;  %v2156_v0 = vadd.f32 %v6940_v63, %v2146_v51 }
 0xf7e   :  { %v2157_v1 = vadd.f32 %v6940_v63, %v2147_v38  ;;  %v2148_v5 = vmul.f32 %v6939_v60, %v2138_v34 }
 0xf7f   :  { %v8650_v48 = vpop.eup %8649 }
 0xf80   :  { %v2139_v49 = vmul.f32 %v8650_v48, %v2107_v41  ;;  %v2160_v3 = vpack.c.bf16 %v2157_v1, %v2156_v0  ;;  %v2158_v7 = vadd.f32 %v6940_v63, %v2148_v5 }
 0xf82   :  { %7599 = vmatprep.mubr.msk.bf16.mxu1 %vm189_vm0, %v2160_v3  ;;  %v2149_v6 = vmul.f32 %v6939_v60, %v2139_v49 }
 0xf84   :  { %v2159_v8 = vadd.f32 %v6940_v63, %v2149_v6  ;;  %v6946_v6 = vld [vmem:[%s10119_s15] ss:$0 sm:$0xff] }
 0xf86   :  { %v2161_v33 = vpack.c.bf16 %v2159_v8, %v2158_v7 }
 0xf88   :  { %7600 = vmatmul.mubr.msk.bf16.vlgmr.msra.gmra.mrb[28].mxu1 %vm189_vm0, %v2161_v33 }
0x105b   :  { %v7601_v30 = vpop.f32.mrb[28].mxu1 }
0x105c   :  { %v2234_v32 = vadd.f32 %v7601_v30, %v6941_v16  ;;  %v2225_v17 = vpop.f32.mrb[29].mxu1 }
0x105d   :  { %v2226_v18 = vadd.f32 %v6941_v16, %v2225_v17  ;;  %v7602_v27 = vpop.f32.mrb[30].mxu1 }
0x105e   :  { %v2242_v19 = vmul.f32 %v2234_v32, %v2234_v32  ;;  %v2237_v20 = vadd.f32 %v7602_v27, %v6941_v16  ;;  %v2228_v21 = vpop.f32.mrb[31].mxu1 }
0x105f   :  { %v2240_v23 = vmul.f32 %v2226_v18, %v2226_v18  ;;  %v2229_v24 = vadd.f32 %v6941_v16, %v2228_v21 }
0x1060   :  { %v2246_v39 = vmul.f32 %v2242_v19, %v2234_v32  ;;  %v2243_v40 = vmul.f32 %v2237_v20, %v2237_v20 }
0x1061   :  { %v2244_v41 = vmul.f32 %v2240_v23, %v2226_v18  ;;  %v2241_v42 = vmul.f32 %v2229_v24, %v2229_v24 }
0x1062   :  { %v2250_v45 = vmul.f32 0.044715, %v2246_v39  ;;  %v2247_v46 = vmul.f32 %v2243_v40, %v2237_v20 }
0x1063   :  { %v2248_v53 = vmul.f32 0.044715, %v2244_v41  ;;  %v2245_v54 = vmul.f32 %v2241_v42, %v2229_v24 }
0x1064   :  { %v2254_v37 = vadd.f32 %v2250_v45, %v2234_v32  ;;  %v2251_v36 = vmul.f32 0.044715, %v2247_v46 }
0x1065   :  { %v2252_v55 = vadd.f32 %v2248_v53, %v2226_v18  ;;  %v2249_v26 = vmul.f32 0.044715, %v2245_v54 }
0x1066   :  { %v2258_v28 = vmul.f32 0.7978846, %v2254_v37  ;;  %v2255_v31 = vadd.f32 %v2251_v36, %v2237_v20 }
0x1067   :  { %v2256_v56 = vmul.f32 0.7978846, %v2252_v55  ;;  %v2253_v57 = vadd.f32 %v2249_v26, %v2229_v24  ;;  %v8543_v55 = vld [vmem:[%s10110_s6 + $0x10] sm:$0xff]   ;;  %v8544_v26 = vld [vmem:[%s10110_s6 + $0x18] sm:$0xff]  }
0x1068   :  { %8651 = vtanh.f32 %v2258_v28  ;;  %v2259_v43 = vmul.f32 0.7978846, %v2255_v31  ;;  %7623 = vmatprep.subr.bf16.mxu1 %v8543_v55 }
0x1069   :  { %8653 = vtanh.f32 %v2256_v56  ;;  %v2257_v47 = vmul.f32 0.7978846, %v2253_v57  ;;  %7624 = vmatpush3.bf16.msra.mxu1 %v8543_v55 }
0x106a   :  { %8655 = vtanh.f32 %v2259_v43  ;;  %7625 = vmatprep.subr.bf16.mxu1 %v8544_v26 }
0x106b   :  { %8657 = vtanh.f32 %v2257_v47 }
0x106d   :  { %7626 = vmatpush3.bf16.msra.mxu1 %v8544_v26 }
0x1072   :  { %v8652_v52 = vpop.eup %8651 }
0x1073   :  { %v8654_v58 = vpop.eup %8653  ;;  %v2266_v59 = vadd.f32 1.0, %v8652_v52 }
0x1074   :  { %v8656_v60 = vpop.eup %8655  ;;  %v2264_v61 = vadd.f32 1.0, %v8654_v58 }
0x1075   :  { %v8658_v50 = vpop.eup %8657  ;;  %v2270_v35 = vmul.f32 0.5, %v2266_v59  ;;  %v2267_v51 = vadd.f32 1.0, %v8656_v60 }
0x1076   :  { %v2265_v62 = vadd.f32 1.0, %v8658_v50  ;;  %v2268_v63 = vmul.f32 0.5, %v2264_v61 }
0x1077   :  { %v2271_v34 = vmul.f32 0.5, %v2267_v51  ;;  %v2274_v0 = vmul.f32 %v2270_v35, %v2234_v32  ;;  %v6957_v51 = vld [vmem:[%s10108_s4 + $0x1] ss:$0 sm:$0xff] }
0x1078   :  { %v2269_v38 = vmul.f32 0.5, %v2265_v62  ;;  %v2272_v48 = vmul.f32 %v2268_v63, %v2226_v18 }
0x1079   :  { %v2275_v1 = vmul.f32 %v2271_v34, %v2237_v20 }
0x107a   :  { %v2273_v49 = vmul.f32 %v2269_v38, %v2229_v24 }
0x107b   :  { %v2277_v3 = vpack.c.bf16 %v2275_v1, %v2274_v0  ;;  %v6958_v1 = vld [vmem:[%s10109_s5 + $0x1] ss:$0 sm:$0xff] }
0x107c   :  { %v2276_v5 = vpack.c.bf16 %v2273_v49, %v2272_v48 }
0x107e   :  { %7619 = vmatprep.mubr.bf16.mxu0 %v2276_v5 }
0x107f   :  { %7620 = vmatmul.mubr.bf16.vlgmr.msra.gmra.mrb[16].mxu0 %v2277_v3 }
0x1152   :  { %v7621_v7 = vpop.f32.mrb[16].mxu0 }
0x1153   :  { %v2383_v8 = vpop.f32.mrb[17].mxu0  ;;  %v2392_v33 = vadd.f32 %v7621_v7, %v6946_v6 }
0x1154   :  { %v2384_v11 = vadd.f32 %v6946_v6, %v2383_v8  ;;  %v7622_v12 = vpop.f32.mrb[18].mxu0 }
0x1155   :  { %v2386_v2 = vpop.f32.mrb[19].mxu0  ;;  %v2395_v22 = vadd.f32 %v7622_v12, %v6946_v6  ;;  %v9391_v14 = vadd.f32 %v2392_v33, %v9319_v10 }
0x1156   :  { %v9388_v25 = vadd.f32 %v2384_v11, %v9316_v9  ;;  %v2387_v29 = vadd.f32 %v6946_v6, %v2386_v2 }
0x1157   :  { %v9399_v30 = vadd.f32 %v2395_v22, %v9329_v13  ;;  %v2412_v9 = vsel %vm189_vm0, %v9391_v14, 0.0 }
0x1158   :  { %v9394_v15 = vadd.f32 %v2387_v29, %v9322_v4  ;;  %v2406_v16 = vsel %vm189_vm0, %v9388_v25, 0.0  ;;  %v6964_v29 = vld [vmem:[%s10111_s7 + $0x1] ss:$0 sm:$0xff] }
0x1159   :  { %2407 = vadd.xlane.f32.xlu0 %v2406_v16  ;;  %v2415_v10 = vsel %vm189_vm0, %v9399_v30, 0.0 }
0x115a   :  { %v2409_v32 = vsel %vm189_vm0, %v9394_v15, 0.0 }
0x115b   :  { %2410 = vadd.xlane.f32.xlu1 %v2409_v32 }
0x115d   :  { %2413 = vadd.xlane.f32.xlu0 %v2412_v9 }
0x115f   :  { %2416 = vadd.xlane.f32.xlu1 %v2415_v10 }
0x11e6   :  { %v2408_v4 = vpop.xlane.xlu0 %2407 }
0x11e7   :  { %v2418_v17 = vmul.f32 0.03125, %v2408_v4 }
0x11e8   :  { %v2411_v18 = vpop.xlane.xlu1 %2410 }
0x11e9   :  { %v2422_v27 = vsub.f32 %v9388_v25, %v2418_v17  ;;  %v2419_v19 = vmul.f32 0.03125, %v2411_v18 }
0x11ea   :  { %v2414_v13 = vpop.xlane.xlu0 %2413 }
0x11eb   :  { %v2423_v20 = vsub.f32 %v9394_v15, %v2419_v19  ;;  %v2420_v21 = vmul.f32 0.03125, %v2414_v13  ;;  %v2426_v23 = vmul.f32 %v2422_v27, %v2422_v27 }
0x11ec   :  { %v2417_v24 = vpop.xlane.xlu1 %2416 }
0x11ed   :  { %v2424_v39 = vsub.f32 %v9391_v14, %v2420_v21  ;;  %v2421_v40 = vmul.f32 0.03125, %v2417_v24  ;;  %v2430_v41 = vsel %vm189_vm0, %v2426_v23, 0.0  ;;  %v2427_v42 = vmul.f32 %v2423_v20, %v2423_v20 }
0x11ee   :  { %2431 = vadd.xlane.f32.xlu0 %v2430_v41 }
0x11ef   :  { %v2425_v45 = vsub.f32 %v9399_v30, %v2421_v40  ;;  %v2433_v46 = vsel %vm189_vm0, %v2427_v42, 0.0  ;;  %v2428_v53 = vmul.f32 %v2424_v39, %v2424_v39 }
0x11f0   :  { %2434 = vadd.xlane.f32.xlu1 %v2433_v46 }
0x11f1   :  { %v2436_v54 = vsel %vm189_vm0, %v2428_v53, 0.0  ;;  %v2429_v37 = vmul.f32 %v2425_v45, %v2425_v45 }
0x11f2   :  { %2437 = vadd.xlane.f32.xlu0 %v2436_v54 }
0x11f3   :  { %v2439_v36 = vsel %vm189_vm0, %v2429_v37, 0.0 }
0x11f4   :  { %2440 = vadd.xlane.f32.xlu1 %v2439_v36 }
0x127b   :  { %v2432_v28 = vpop.xlane.xlu0 %2431 }
0x127c   :  { %v2442_v31 = vmul.f32 0.03125, %v2432_v28 }
0x127d   :  { %v2435_v56 = vpop.xlane.xlu1 %2434 }
0x127e   :  { %v2446_v57 = vadd.f32 1e-06, %v2442_v31  ;;  %v2443_v43 = vmul.f32 0.03125, %v2435_v56 }
0x127f   :  { %v2438_v47 = vpop.xlane.xlu0 %2437 }
0x1280   :  { %8659 = vrsqrt.f32 %v2446_v57  ;;  %v2447_v52 = vadd.f32 1e-06, %v2443_v43  ;;  %v2444_v58 = vmul.f32 0.03125, %v2438_v47 }
0x1281   :  { %v2441_v59 = vpop.xlane.xlu1 %2440 }
0x1282   :  { %8661 = vrsqrt.f32 %v2447_v52  ;;  %v2448_v60 = vadd.f32 1e-06, %v2444_v58  ;;  %v2445_v61 = vmul.f32 0.03125, %v2441_v59 }
0x1284   :  { %8663 = vrsqrt.f32 %v2448_v60  ;;  %v2449_v50 = vadd.f32 1e-06, %v2445_v61 }
0x1286   :  { %8665 = vrsqrt.f32 %v2449_v50 }
0x128a   :  { %v8660_v35 = vpop.eup %8659 }
0x128b   :  { %v2454_v62 = vmul.f32 %v8660_v35, %v2422_v27 }
0x128c   :  { %v8662_v63 = vpop.eup %8661 }
0x128d   :  { %v2455_v34 = vmul.f32 %v8662_v63, %v2423_v20  ;;  %v2464_v38 = vmul.f32 %v6957_v51, %v2454_v62 }
0x128e   :  { %v8664_v0 = vpop.eup %8663 }
0x128f   :  { %v2456_v48 = vmul.f32 %v8664_v0, %v2424_v39  ;;  %v2465_v49 = vmul.f32 %v6957_v51, %v2455_v34  ;;  %v2474_v6 = vadd.f32 %v6958_v1, %v2464_v38 }
0x1290   :  { %v8666_v3 = vpop.eup %8665 }
0x1291   :  { %v2457_v5 = vmul.f32 %v8666_v3, %v2425_v45  ;;  %v2475_v7 = vadd.f32 %v6958_v1, %v2465_v49  ;;  %v2466_v8 = vmul.f32 %v6957_v51, %v2456_v48 }
0x1293   :  { %v2478_v33 = vpack.c.bf16 %v2475_v7, %v2474_v6  ;;  %v2467_v11 = vmul.f32 %v6957_v51, %v2457_v5  ;;  %v2476_v12 = vadd.f32 %v6958_v1, %v2466_v8 }
0x1295   :  { %7627 = vmatprep.mubr.msk.bf16.mxu1 %vm189_vm0, %v2478_v33  ;;  %v2477_v2 = vadd.f32 %v6958_v1, %v2467_v11 }
0x1297   :  { %v2479_v22 = vpack.c.bf16 %v2477_v2, %v2476_v12 }
0x1299   :  { %7628 = vmatmul.mubr.msk.bf16.vlgmr.msra.gmra.mrb[32].mxu1 %vm189_vm0, %v2479_v22 }
0x136c   :  { %v7629_v16 = vpop.f32.mrb[32].mxu1 }
0x136d   :  { %v2545_v32 = vpop.f32.mrb[33].mxu1  ;;  %v9434_v4 = vadd.f32 %v7629_v16, %v6964_v29 }
0x136e   :  { %v9432_v9 = vadd.f32 %v6964_v29, %v2545_v32  ;;  %v7630_v10 = vpop.f32.mrb[34].mxu1 }
0x136f   :  { %v9436_v17 = vadd.f32 %v7630_v10, %v6964_v29  ;;  %v2548_v18 = vpop.f32.mrb[35].mxu1 }
0x1370   :  { %v9438_v27 = vadd.f32 %v6964_v29, %v2548_v18  ;;  %7635 = vmatprep.mubr.msk.f32.mxu1 %vm349_vm1, %v9432_v9 }
0x1371   :  { %v9444_v19 = vpack.i.bf16 %v9436_v17, %v9434_v4 }
0x1372   :  { %v9448_v13 = vpack.i.bf16 %v9438_v27, %v9432_v9 }
0x1373   :  { %8307 = vrot.lane.b32.xlu1 %v9444_v19, %s8859_s29 }
0x1374   :  { %8302 = vrot.lane.b32.xlu0 %v9448_v13, %s8859_s29 }
0x13e5   :  { %v8308_v20 = vpop.permute.xlu1 %8307 }
0x13e6   :  { %v8303_v21 = vpop.permute.xlu0 %8302  ;;  %v8310_v23 = vunpack.i.h.bf16 %v8308_v20  ;;  %v8309_v24 = vunpack.i.l.bf16 %v8308_v20 }
0x13e7   :  { %v8305_v39 = vunpack.i.h.bf16 %v8303_v21  ;;  %v8304_v40 = vunpack.i.l.bf16 %v8303_v21 }
0x13e8   :  { %v8021_v42 = vpack.c.bf16 %v8310_v23, %v8309_v24 }
0x13e9   :  { %v8015_v41 = vpack.c.bf16 %v8305_v39, %v8304_v40 }
0x13eb   :  { %8017 = vmatprep.subr.msk.bf16.mxu1 %vm9070_vm2, %v8015_v41 }
0x13ec   :  { %8020 = vmatpush3.bf16.xpose.msk.msra.mxu1 %vm9070_vm2, %v8015_v41 }
0x13ed   :  { %8023 = vmatprep.subr.msk.bf16.mxu1 %vm9070_vm2, %v8021_v42 }
0x13f3   :  { %7636 = vmatmul.mubr.msk.f32.vlgmr.msra.gmra.mrb[36].mxu1 %vm349_vm1, %v9438_v27 }
0x13f4   :  { %8026 = vmatpush3.bf16.xpose.msk.msra.mxu1 %vm9070_vm2, %v8021_v42  ;;  %7642 = vmatprep.mubr.msk.f32.mxu1 %vm349_vm1, %v9434_v4 }
0x13fb   :  { %7643 = vmatmul.mubr.msk.f32.vlgmr.msra.gmra.mrb[38].mxu1 %vm349_vm1, %v9436_v17 }
0x14c6   :  { %v7637_v45 = vpop.f32.mrb[36].mxu1 }
0x14c7   :  { %v2640_v46 = vpop.f32.mrb[37].mxu1  ;;  %v2741_v53 = vsel %vm522_vm3, %v7637_v45, -inf }
0x14c8   :  { %2742 = vmax.xlane.f32.xlu0 %v2741_v53  ;;  %v2738_v54 = vsel %vm522_vm3, %v2640_v46, -inf }
0x14c9   :  { %2739 = vmax.xlane.f32.xlu1 %v2738_v54 }
0x14ce   :  { %v7644_v37 = vpop.f32.mrb[38].mxu1 }
0x14cf   :  { %v2729_v36 = vpop.f32.mrb[39].mxu1  ;;  %v2747_v55 = vsel %vm522_vm3, %v7644_v37, -inf }
0x14d0   :  { %2748 = vmax.xlane.f32.xlu1 %v2747_v55  ;;  %v2744_v26 = vsel %vm522_vm3, %v2729_v36, -inf }
0x14d1   :  { %2745 = vmax.xlane.f32.xlu0 %v2744_v26 }
0x1555   :  { %v2743_v28 = vpop.xlane.xlu0 %2742 }
0x1556   :  { %v2751_v31 = vsub.f32 %v7637_v45, %v2743_v28  ;;  %v2740_v56 = vpop.xlane.xlu1 %2739 }
0x1557   :  { %v2750_v57 = vsub.f32 %v2640_v46, %v2740_v56 }
0x1558   :  { %v2756_v43 = vmul.f32 1.442695, %v2751_v31 }
0x1559   :  { %v2754_v47 = vmul.f32 1.442695, %v2750_v57 }
0x155a   :  { %8667 = vpow2.f32 %v2756_v43 }
0x155b   :  { %8669 = vpow2.f32 %v2754_v47 }
0x155d   :  { %v2749_v35 = vpop.xlane.xlu1 %2748 }
0x155e   :  { %v2746_v61 = vpop.xlane.xlu0 %2745  ;;  %v2753_v62 = vsub.f32 %v7644_v37, %v2749_v35 }
0x155f   :  { %v2752_v50 = vsub.f32 %v2729_v36, %v2746_v61 }
0x1560   :  { %v2760_v63 = vmul.f32 1.442695, %v2753_v62 }
0x1561   :  { %v2758_v51 = vmul.f32 1.442695, %v2752_v50 }
0x1563   :  { %8671 = vpow2.f32 %v2758_v51 }
0x1564   :  { %v8668_v52 = vpop.eup %8667  ;;  %8673 = vpow2.f32 %v2760_v63 }
0x1565   :  { %v8670_v58 = vpop.eup %8669  ;;  %v2765_v59 = vsel %vm522_vm3, %v8668_v52, 0.0 }
0x1566   :  { %2766 = vadd.xlane.f32.xlu1 %v2765_v59  ;;  %v2762_v60 = vsel %vm522_vm3, %v8670_v58, 0.0 }
0x1567   :  { %2763 = vadd.xlane.f32.xlu0 %v2762_v60 }
0x156d   :  { %v8672_v34 = vpop.eup %8671 }
0x156e   :  { %v2768_v38 = vsel %vm522_vm3, %v8672_v34, 0.0  ;;  %v8674_v0 = vpop.eup %8673 }
0x156f   :  { %v2771_v1 = vsel %vm522_vm3, %v8674_v0, 0.0 }
0x1577   :  { %8317 = vrot.lane.b32.xlu1 %v9444_v19, %s8860_s30 }
0x157b   :  { %8322 = vrot.lane.b32.xlu1 %v9448_v13, %s8861_s17 }
0x157d   :  { %8312 = vrot.lane.b32.xlu0 %v9448_v13, %s8860_s30 }
0x157f   :  { %8327 = vrot.lane.b32.xlu1 %v9444_v19, %s8861_s17 }
0x159c   :  { %2769 = vadd.xlane.f32.xlu0 %v2768_v38 }
0x15a3   :  { %2772 = vadd.xlane.f32.xlu1 %v2771_v1 }
0x15b2   :  { %2956 = vrot.lane.b32.xlu0 %v9432_v9, %s8862_s18 }
0x15b4   :  { %2958 = vrot.lane.b32.xlu1 %v9438_v27, %s8862_s18 }
0x15b6   :  { %3047 = vrot.lane.b32.xlu0 %v9434_v4, %s8862_s18 }
0x15b8   :  { %3049 = vrot.lane.b32.xlu1 %v9436_v17, %s8862_s18 }
0x15f3   :  { %v2767_v48 = vpop.xlane.xlu1 %2766 }
0x15f4   :  { %8675 = vrcp.f32 %v2767_v48  ;;  %v2764_v49 = vpop.xlane.xlu0 %2763 }
0x15f5   :  { %8677 = vrcp.f32 %v2764_v49 }
0x15f7   :  { %v8318_v3 = vpop.permute.xlu1 %8317 }
0x15f8   :  { %v8313_v5 = vpop.permute.xlu0 %8312  ;;  %v8320_v6 = vunpack.i.h.bf16 %v8318_v3  ;;  %v8319_v7 = vunpack.i.l.bf16 %v8318_v3 }
0x15f9   :  { %v8315_v8 = vunpack.i.h.bf16 %v8313_v5  ;;  %v8314_v33 = vunpack.i.l.bf16 %v8313_v5 }
0x15fa   :  { %v8031_v29 = vpack.c.bf16 %v8320_v6, %v8319_v7 }
0x15fb   :  { %v8323_v11 = vpop.permute.xlu1 %8322  ;;  %v8027_v12 = vpack.c.bf16 %v8315_v8, %v8314_v33 }
0x15fc   :  { %v8325_v2 = vunpack.i.h.bf16 %v8323_v11  ;;  %v8324_v22 = vunpack.i.l.bf16 %v8323_v11 }
0x15fd   :  { %8028 = vmatprep.subr.bf16.mxu1 %v8027_v12 }
0x15fe   :  { %v8676_v16 = vpop.eup %8675  ;;  %v8035_v32 = vpack.c.bf16 %v8325_v2, %v8324_v22  ;;  %8030 = vmatpush3.bf16.msra.mxu1 %v8027_v12 }
0x15ff   :  { %v8678_v10 = vpop.eup %8677  ;;  %v8328_v18 = vpop.permute.xlu1 %8327  ;;  %8032 = vmatprep.subr.bf16.mxu1 %v8031_v29  ;;  %v2779_v24 = vmul.f32 %v8676_v16, %v8668_v52 }
0x1600   :  { %v8330_v20 = vunpack.i.h.bf16 %v8328_v18  ;;  %v8329_v21 = vunpack.i.l.bf16 %v8328_v18  ;;  %8037 = vmatprep.subr.msk.bf16.mxu0 %vm9070_vm2, %v8035_v32  ;;  %v2778_v23 = vmul.f32 %v8678_v10, %v8670_v58 }
0x1601   :  { %8040 = vmatpush3.bf16.xpose.msk.msra.mxu0 %vm9070_vm2, %v8035_v32 }
0x1602   :  { %v8041_v39 = vpack.c.bf16 %v8330_v20, %v8329_v21  ;;  %7649 = vmatprep.mubr.msk.f32.mxu1 %vm522_vm3, %v2778_v23 }
0x1603   :  { %7650 = vmatmul.mubr.msk.f32.vlgmr.msra.gmra.mrb[40].mxu1 %vm522_vm3, %v2779_v24 }
0x1604   :  { %8034 = vmatpush3.bf16.msra.mxu1 %v8031_v29 }
0x1605   :  { %8043 = vmatprep.subr.msk.bf16.mxu1 %vm9070_vm2, %v8041_v39 }
0x1629   :  { %v2770_v40 = vpop.xlane.xlu0 %2769 }
0x162a   :  { %8679 = vrcp.f32 %v2770_v40 }
0x162d   :  { %v2957_v41 = vpop.permute.xlu0 %2956 }
0x162e   :  { %7663 = vmatprep.mubr.msk.f32.mxu0 %vm349_vm1, %v2957_v41 }
0x1630   :  { %v2773_v42 = vpop.xlane.xlu1 %2772 }
0x1631   :  { %8681 = vrcp.f32 %v2773_v42  ;;  %v3048_v36 = vpop.permute.xlu0 %3047 }
0x1634   :  { %v8680_v45 = vpop.eup %8679  ;;  %v2959_v46 = vpop.permute.xlu1 %2958 }
0x1635   :  { %7664 = vmatmul.mubr.msk.f32.vlgmr.msra.gmra.mrb[20].mxu0 %vm349_vm1, %v2959_v46  ;;  %v2780_v53 = vmul.f32 %v8680_v45, %v8672_v34 }
0x1637   :  { %7656 = vmatprep.mubr.msk.f32.mxu1 %vm522_vm3, %v2780_v53 }
0x1638   :  { %v3050_v55 = vpop.permute.xlu1 %3049 }
0x163b   :  { %v8682_v54 = vpop.eup %8681 }
0x163c   :  { %v2781_v37 = vmul.f32 %v8682_v54, %v8674_v0 }
0x163e   :  { %7657 = vmatmul.mubr.msk.f32.vlgmr.msra.gmra.mrb[42].mxu1 %vm522_vm3, %v2781_v37 }
0x163f   :  { %8046 = vmatpush3.bf16.xpose.msk.msra.mxu1 %vm9070_vm2, %v8041_v39  ;;  %7670 = vmatprep.mubr.msk.f32.mxu1 %vm349_vm1, %v3048_v36 }
0x1646   :  { %7671 = vmatmul.mubr.msk.f32.vlgmr.msra.gmra.mrb[44].mxu1 %vm349_vm1, %v3050_v55 }
0x16d6   :  { %v9508_v26 = vpop.f32.mrb[40].mxu1 }
0x16d7   :  { %v9510_v28 = vpop.f32.mrb[41].mxu1 }
0x1708   :  { %v7665_v31 = vpop.f32.mrb[20].mxu0 }
0x1709   :  { %v3038_v56 = vpop.f32.mrb[21].mxu0  ;;  %v3141_v57 = vsel %vm522_vm3, %v7665_v31, -inf }
0x170a   :  { %3142 = vmax.xlane.f32.xlu1 %v3141_v57  ;;  %v3138_v43 = vsel %vm522_vm3, %v3038_v56, -inf }
0x170b   :  { %3139 = vmax.xlane.f32.xlu0 %v3138_v43 }
0x1711   :  { %v9514_v47 = vpop.f32.mrb[42].mxu1 }
0x1712   :  { %v9516_v52 = vpop.f32.mrb[43].mxu1 }
0x1719   :  { %v7672_v58 = vpop.f32.mrb[44].mxu1 }
0x171a   :  { %v3129_v59 = vpop.f32.mrb[45].mxu1  ;;  %v3147_v61 = vsel %vm522_vm3, %v7672_v58, -inf }
0x171b   :  { %v3144_v60 = vsel %vm522_vm3, %v3129_v59, -inf }
0x171c   :  { %3145 = vmax.xlane.f32.xlu0 %v3144_v60 }
0x1720   :  { %3148 = vmax.xlane.f32.xlu0 %v3147_v61 }
0x1797   :  { %v3143_v50 = vpop.xlane.xlu1 %3142 }
0x1798   :  { %v3151_v35 = vsub.f32 %v7665_v31, %v3143_v50  ;;  %v3140_v51 = vpop.xlane.xlu0 %3139 }
0x1799   :  { %v3150_v62 = vsub.f32 %v3038_v56, %v3140_v51 }
0x179a   :  { %v3156_v63 = vmul.f32 1.442695, %v3151_v35 }
0x179b   :  { %v3154_v34 = vmul.f32 1.442695, %v3150_v62 }
0x179c   :  { %8683 = vpow2.f32 %v3156_v63 }
0x179d   :  { %8685 = vpow2.f32 %v3154_v34 }
0x17a6   :  { %v8684_v38 = vpop.eup %8683 }
0x17a7   :  { %v8686_v0 = vpop.eup %8685  ;;  %v3165_v1 = vsel %vm522_vm3, %v8684_v38, 0.0 }
0x17a8   :  { %3166 = vadd.xlane.f32.xlu1 %v3165_v1  ;;  %v3162_v48 = vsel %vm522_vm3, %v8686_v0, 0.0 }
0x17a9   :  { %3163 = vadd.xlane.f32.xlu0 %v3162_v48  ;;  %v3146_v49 = vpop.xlane.xlu0 %3145 }
0x17aa   :  { %v3152_v3 = vsub.f32 %v3129_v59, %v3146_v49 }
0x17ac   :  { %v3158_v5 = vmul.f32 1.442695, %v3152_v3 }
0x17ad   :  { %v3149_v6 = vpop.xlane.xlu0 %3148 }
0x17ae   :  { %v3153_v7 = vsub.f32 %v7672_v58, %v3149_v6  ;;  %8687 = vpow2.f32 %v3158_v5 }
0x17b0   :  { %v3160_v8 = vmul.f32 1.442695, %v3153_v7 }
0x17b2   :  { %8689 = vpow2.f32 %v3160_v8 }
0x17b8   :  { %v8688_v33 = vpop.eup %8687 }
0x17b9   :  { %8337 = vrot.lane.b32.xlu1 %v9444_v19, %s8863_s1  ;;  %v3168_v11 = vsel %vm522_vm3, %v8688_v33, 0.0 }
0x17bc   :  { %v8690_v12 = vpop.eup %8689 }
0x17bd   :  { %8342 = vrot.lane.b32.xlu1 %v9448_v13, %s8864_s19  ;;  %v3171_v2 = vsel %vm522_vm3, %v8690_v12, 0.0 }
0x17bf   :  { %8332 = vrot.lane.b32.xlu0 %v9448_v13, %s8863_s1 }
0x17c1   :  { %8347 = vrot.lane.b32.xlu1 %v9444_v19, %s8864_s19 }
0x17de   :  { %3169 = vadd.xlane.f32.xlu0 %v3168_v11 }
0x17e5   :  { %3172 = vadd.xlane.f32.xlu1 %v3171_v2 }
0x17f4   :  { %3356 = vrot.lane.b32.xlu0 %v9432_v9, %s10136_s0 }
0x17f6   :  { %3358 = vrot.lane.b32.xlu1 %v9438_v27, %s10136_s0 }
0x17f8   :  { %3447 = vrot.lane.b32.xlu0 %v9434_v4, %s10136_s0 }
0x17fa   :  { %3449 = vrot.lane.b32.xlu1 %v9436_v17, %s10136_s0 }
0x1835   :  { %v3167_v22 = vpop.xlane.xlu1 %3166 }
0x1836   :  { %8691 = vrcp.f32 %v3167_v22  ;;  %v3164_v29 = vpop.xlane.xlu0 %3163 }
0x1837   :  { %8693 = vrcp.f32 %v3164_v29 }
0x1839   :  { %v8338_v16 = vpop.permute.xlu1 %8337 }
0x183a   :  { %v8340_v32 = vunpack.i.h.bf16 %v8338_v16  ;;  %v8339_v10 = vunpack.i.l.bf16 %v8338_v16  ;;  %v8333_v18 = vpop.permute.xlu0 %8332 }
0x183b   :  { %v8335_v20 = vunpack.i.h.bf16 %v8333_v18  ;;  %v8334_v21 = vunpack.i.l.bf16 %v8333_v18 }
0x183c   :  { %v8051_v23 = vpack.c.bf16 %v8340_v32, %v8339_v10 }
0x183d   :  { %v8343_v24 = vpop.permute.xlu1 %8342  ;;  %v8047_v39 = vpack.c.bf16 %v8335_v20, %v8334_v21 }
0x183e   :  { %v8345_v40 = vunpack.i.h.bf16 %v8343_v24  ;;  %v8344_v41 = vunpack.i.l.bf16 %v8343_v24  ;;  %8052 = vmatprep.subr.bf16.mxu1 %v8051_v23 }
0x183f   :  { %8048 = vmatprep.subr.bf16.mxu0 %v8047_v39  ;;  %8054 = vmatpush3.bf16.msra.mxu1 %v8051_v23 }
0x1840   :  { %v8692_v42 = vpop.eup %8691  ;;  %v8055_v45 = vpack.c.bf16 %v8345_v40, %v8344_v41  ;;  %8050 = vmatpush3.bf16.msra.mxu0 %v8047_v39 }
0x1841   :  { %v8694_v46 = vpop.eup %8693  ;;  %v8348_v53 = vpop.permute.xlu1 %8347  ;;  %v3179_v55 = vmul.f32 %v8692_v42, %v8684_v38 }
0x1842   :  { %v8350_v54 = vunpack.i.h.bf16 %v8348_v53  ;;  %v8349_v37 = vunpack.i.l.bf16 %v8348_v53  ;;  %8057 = vmatprep.subr.msk.bf16.mxu0 %vm9070_vm2, %v8055_v45  ;;  %v3178_v36 = vmul.f32 %v8694_v46, %v8686_v0 }
0x1844   :  { %v8061_v31 = vpack.c.bf16 %v8350_v54, %v8349_v37  ;;  %7677 = vmatprep.mubr.msk.f32.mxu0 %vm522_vm3, %v3178_v36 }
0x1845   :  { %7678 = vmatmul.mubr.msk.f32.vlgmr.msra.gmra.mrb[22].mxu0 %vm522_vm3, %v3179_v55 }
0x1846   :  { %8063 = vmatprep.subr.msk.bf16.mxu1 %vm9070_vm2, %v8061_v31 }
0x1849   :  { %8060 = vmatpush3.bf16.xpose.msk.msra.mxu0 %vm9070_vm2, %v8055_v45 }
0x186b   :  { %v3170_v56 = vpop.xlane.xlu0 %3169 }
0x186c   :  { %8695 = vrcp.f32 %v3170_v56 }
0x186f   :  { %v3357_v57 = vpop.permute.xlu0 %3356 }
0x1870   :  { %7691 = vmatprep.mubr.msk.f32.mxu0 %vm349_vm1, %v3357_v57 }
0x1872   :  { %v3173_v43 = vpop.xlane.xlu1 %3172 }
0x1873   :  { %8697 = vrcp.f32 %v3173_v43  ;;  %v3448_v35 = vpop.permute.xlu0 %3447 }
0x1876   :  { %v8696_v58 = vpop.eup %8695  ;;  %v3359_v59 = vpop.permute.xlu1 %3358 }
0x1877   :  { %7692 = vmatmul.mubr.msk.f32.vlgmr.msra.gmra.mrb[24].mxu0 %vm349_vm1, %v3359_v59  ;;  %v3180_v60 = vmul.f32 %v8696_v58, %v8688_v33 }
0x1879   :  { %7684 = vmatprep.mubr.msk.f32.mxu1 %vm522_vm3, %v3180_v60 }
0x187a   :  { %v3450_v51 = vpop.permute.xlu1 %3449 }
0x187d   :  { %v8698_v61 = vpop.eup %8697 }
0x187e   :  { %v3181_v50 = vmul.f32 %v8698_v61, %v8690_v12 }
0x1880   :  { %7685 = vmatmul.mubr.msk.f32.vlgmr.msra.gmra.mrb[46].mxu1 %vm522_vm3, %v3181_v50 }
0x1881   :  { %8066 = vmatpush3.bf16.xpose.msk.msra.mxu1 %vm9070_vm2, %v8061_v31  ;;  %7698 = vmatprep.mubr.msk.f32.mxu1 %vm349_vm1, %v3448_v35 }
0x1888   :  { %7699 = vmatmul.mubr.msk.f32.vlgmr.msra.gmra.mrb[48].mxu1 %vm349_vm1, %v3450_v51 }
0x1918   :  { %v9556_v62 = vpop.f32.mrb[22].mxu0 }
0x1919   :  { %v9558_v63 = vpop.f32.mrb[23].mxu0 }
0x191a   :  { %v8381_v34 = vpack.i.bf16 %v9556_v62, %v9558_v63 }
0x194a   :  { %v7693_v38 = vpop.f32.mrb[24].mxu0 }
0x194b   :  { %v3438_v0 = vpop.f32.mrb[25].mxu0  ;;  %v3541_v1 = vsel %vm522_vm3, %v7693_v38, -inf }
0x194c   :  { %3542 = vmax.xlane.f32.xlu1 %v3541_v1  ;;  %v3538_v48 = vsel %vm522_vm3, %v3438_v0, -inf }
0x194d   :  { %3539 = vmax.xlane.f32.xlu0 %v3538_v48 }
0x1953   :  { %v9564_v49 = vpop.f32.mrb[46].mxu1 }
0x1954   :  { %v9566_v3 = vpop.f32.mrb[47].mxu1 }
0x1955   :  { %v8386_v5 = vpack.i.bf16 %v9564_v49, %v9566_v3 }
0x195b   :  { %v7700_v6 = vpop.f32.mrb[48].mxu1 }
0x195c   :  { %v3529_v7 = vpop.f32.mrb[49].mxu1  ;;  %v3547_v33 = vsel %vm522_vm3, %v7700_v6, -inf }
0x195d   :  { %v3544_v8 = vsel %vm522_vm3, %v3529_v7, -inf }
0x195e   :  { %3545 = vmax.xlane.f32.xlu0 %v3544_v8 }
0x1962   :  { %3548 = vmax.xlane.f32.xlu0 %v3547_v33 }
0x19d9   :  { %v3543_v11 = vpop.xlane.xlu1 %3542 }
0x19da   :  { %v3551_v12 = vsub.f32 %v7693_v38, %v3543_v11  ;;  %v3540_v2 = vpop.xlane.xlu0 %3539 }
0x19db   :  { %v3550_v22 = vsub.f32 %v3438_v0, %v3540_v2 }
0x19dc   :  { %v3556_v29 = vmul.f32 1.442695, %v3551_v12 }
0x19dd   :  { %v3554_v16 = vmul.f32 1.442695, %v3550_v22 }
0x19de   :  { %8699 = vpow2.f32 %v3556_v29 }
0x19df   :  { %8701 = vpow2.f32 %v3554_v16 }
0x19e8   :  { %v8700_v32 = vpop.eup %8699 }
0x19e9   :  { %v8702_v10 = vpop.eup %8701  ;;  %v3565_v18 = vsel %vm522_vm3, %v8700_v32, 0.0 }
0x19ea   :  { %3566 = vadd.xlane.f32.xlu1 %v3565_v18  ;;  %v3562_v20 = vsel %vm522_vm3, %v8702_v10, 0.0 }
0x19eb   :  { %3563 = vadd.xlane.f32.xlu0 %v3562_v20  ;;  %v3546_v21 = vpop.xlane.xlu0 %3545 }
0x19ec   :  { %v3552_v23 = vsub.f32 %v3529_v7, %v3546_v21 }
0x19ee   :  { %v3558_v24 = vmul.f32 1.442695, %v3552_v23 }
0x19ef   :  { %v3549_v39 = vpop.xlane.xlu0 %3548 }
0x19f0   :  { %v3553_v40 = vsub.f32 %v7700_v6, %v3549_v39  ;;  %8703 = vpow2.f32 %v3558_v24 }
0x19f2   :  { %v3560_v41 = vmul.f32 1.442695, %v3553_v40 }
0x19f4   :  { %8705 = vpow2.f32 %v3560_v41 }
0x19fa   :  { %v8704_v42 = vpop.eup %8703 }
0x19fb   :  { %8357 = vrot.lane.b32.xlu1 %v9444_v19, %s10134_s2  ;;  %v3568_v45 = vsel %vm522_vm3, %v8704_v42, 0.0 }
0x19fe   :  { %v8706_v46 = vpop.eup %8705 }
0x19ff   :  { %8362 = vrot.lane.b32.xlu1 %v9448_v13, %s10132_s20  ;;  %v3571_v53 = vsel %vm522_vm3, %v8706_v46, 0.0 }
0x1a01   :  { %8352 = vrot.lane.b32.xlu0 %v9448_v13, %s10134_s2 }
0x1a03   :  { %8367 = vrot.lane.b32.xlu1 %v9444_v19, %s10132_s20 }
0x1a20   :  { %3569 = vadd.xlane.f32.xlu0 %v3568_v45 }
0x1a27   :  { %3572 = vadd.xlane.f32.xlu1 %v3571_v53 }
0x1a36   :  { %3756 = vrot.lane.b32.xlu0 %v9432_v9, %s10130_s3 }
0x1a38   :  { %3758 = vrot.lane.b32.xlu1 %v9438_v27, %s10130_s3 }
0x1a3a   :  { %3847 = vrot.lane.b32.xlu0 %v9434_v4, %s10130_s3 }
0x1a3c   :  { %3849 = vrot.lane.b32.xlu1 %v9436_v17, %s10130_s3 }
0x1a77   :  { %v3567_v54 = vpop.xlane.xlu1 %3566 }
0x1a78   :  { %8707 = vrcp.f32 %v3567_v54  ;;  %v3564_v37 = vpop.xlane.xlu0 %3563 }
0x1a79   :  { %8709 = vrcp.f32 %v3564_v37 }
0x1a7b   :  { %v8358_v36 = vpop.permute.xlu1 %8357 }
0x1a7c   :  { %v8360_v55 = vunpack.i.h.bf16 %v8358_v36  ;;  %v8359_v31 = vunpack.i.l.bf16 %v8358_v36  ;;  %v8353_v56 = vpop.permute.xlu0 %8352 }
0x1a7d   :  { %v8355_v57 = vunpack.i.h.bf16 %v8353_v56  ;;  %v8354_v43 = vunpack.i.l.bf16 %v8353_v56 }
0x1a7e   :  { %v8071_v9 = vpack.c.bf16 %v8360_v55, %v8359_v31 }
0x1a7f   :  { %v8363_v58 = vpop.permute.xlu1 %8362  ;;  %v8067_v59 = vpack.c.bf16 %v8355_v57, %v8354_v43 }
0x1a80   :  { %v8365_v27 = vunpack.i.h.bf16 %v8363_v58  ;;  %v8364_v60 = vunpack.i.l.bf16 %v8363_v58  ;;  %8072 = vmatprep.subr.bf16.mxu1 %v8071_v9 }
0x1a81   :  { %8068 = vmatprep.subr.bf16.mxu0 %v8067_v59  ;;  %8074 = vmatpush3.bf16.msra.mxu1 %v8071_v9 }
0x1a82   :  { %v8708_v4 = vpop.eup %8707  ;;  %v8075_v17 = vpack.c.bf16 %v8365_v27, %v8364_v60  ;;  %8070 = vmatpush3.bf16.msra.mxu0 %v8067_v59 }
0x1a83   :  { %v8710_v61 = vpop.eup %8709  ;;  %v8368_v50 = vpop.permute.xlu1 %8367  ;;  %v3579_v0 = vmul.f32 %v8708_v4, %v8700_v32 }
0x1a84   :  { %v8370_v35 = vunpack.i.h.bf16 %v8368_v50  ;;  %v8369_v51 = vunpack.i.l.bf16 %v8368_v50  ;;  %8077 = vmatprep.subr.msk.bf16.mxu0 %vm9070_vm2, %v8075_v17  ;;  %v3578_v38 = vmul.f32 %v8710_v61, %v8702_v10 }
0x1a86   :  { %v8081_v1 = vpack.c.bf16 %v8370_v35, %v8369_v51  ;;  %7705 = vmatprep.mubr.msk.f32.mxu0 %vm522_vm3, %v3578_v38 }
0x1a87   :  { %7706 = vmatmul.mubr.msk.f32.vlgmr.msra.gmra.mrb[26].mxu0 %vm522_vm3, %v3579_v0 }
0x1a88   :  { %8083 = vmatprep.subr.msk.bf16.mxu1 %vm9070_vm2, %v8081_v1 }
0x1a8b   :  { %8080 = vmatpush3.bf16.xpose.msk.msra.mxu0 %vm9070_vm2, %v8075_v17 }
0x1aad   :  { %v3570_v48 = vpop.xlane.xlu0 %3569 }
0x1aae   :  { %8711 = vrcp.f32 %v3570_v48 }
0x1ab1   :  { %v3757_v6 = vpop.permute.xlu0 %3756 }
0x1ab2   :  { %7719 = vmatprep.mubr.msk.f32.mxu0 %vm349_vm1, %v3757_v6 }
0x1ab4   :  { %v3573_v7 = vpop.xlane.xlu1 %3572 }
0x1ab5   :  { %8713 = vrcp.f32 %v3573_v7  ;;  %v3848_v22 = vpop.permute.xlu0 %3847 }
0x1ab8   :  { %v8712_v8 = vpop.eup %8711  ;;  %v3759_v33 = vpop.permute.xlu1 %3758 }
0x1ab9   :  { %7720 = vmatmul.mubr.msk.f32.vlgmr.msra.gmra.mrb[28].mxu0 %vm349_vm1, %v3759_v33  ;;  %v3580_v11 = vmul.f32 %v8712_v8, %v8704_v42 }
0x1abb   :  { %7712 = vmatprep.mubr.msk.f32.mxu1 %vm522_vm3, %v3580_v11 }
0x1abc   :  { %v3850_v29 = vpop.permute.xlu1 %3849 }
0x1abf   :  { %v8714_v12 = vpop.eup %8713 }
0x1ac0   :  { %v3581_v2 = vmul.f32 %v8714_v12, %v8706_v46 }
0x1ac2   :  { %7713 = vmatmul.mubr.msk.f32.vlgmr.msra.gmra.mrb[50].mxu1 %vm522_vm3, %v3581_v2 }
0x1ac3   :  { %8086 = vmatpush3.bf16.xpose.msk.msra.mxu1 %vm9070_vm2, %v8081_v1  ;;  %7726 = vmatprep.mubr.msk.f32.mxu1 %vm349_vm1, %v3848_v22 }
0x1aca   :  { %7727 = vmatmul.mubr.msk.f32.vlgmr.msra.gmra.mrb[52].mxu1 %vm349_vm1, %v3850_v29  ;;  %v8545_v29 = vld [vmem:[%s10112_s8 + $0x10] sm:$0xff]  }
0x1b5a   :  { %v7707_v16 = vpop.f32.mrb[26].mxu0 }
0x1b5b   :  { %v3660_v32 = vpop.f32.mrb[27].mxu0 }
0x1b5c   :  { %v8391_v10 = vpack.i.bf16 %v7707_v16, %v3660_v32  ;;  %v8546_v16 = vld [vmem:[%s10112_s8 + $0x18] sm:$0xff]  }
0x1b8c   :  { %v7721_v18 = vpop.f32.mrb[28].mxu0 }
0x1b8d   :  { %v3838_v20 = vpop.f32.mrb[29].mxu0  ;;  %v3941_v21 = vsel %vm522_vm3, %v7721_v18, -inf }
0x1b8e   :  { %3942 = vmax.xlane.f32.xlu1 %v3941_v21  ;;  %v3938_v23 = vsel %vm522_vm3, %v3838_v20, -inf }
0x1b8f   :  { %3939 = vmax.xlane.f32.xlu0 %v3938_v23 }
0x1b95   :  { %v7714_v24 = vpop.f32.mrb[50].mxu1 }
0x1b96   :  { %v3747_v39 = vpop.f32.mrb[51].mxu1 }
0x1b97   :  { %v8396_v40 = vpack.i.bf16 %v7714_v24, %v3747_v39 }
0x1b9d   :  { %v7728_v41 = vpop.f32.mrb[52].mxu1 }
0x1b9e   :  { %v3929_v42 = vpop.f32.mrb[53].mxu1  ;;  %v3947_v46 = vsel %vm522_vm3, %v7728_v41, -inf }
0x1b9f   :  { %v3944_v45 = vsel %vm522_vm3, %v3929_v42, -inf }
0x1ba0   :  { %3945 = vmax.xlane.f32.xlu0 %v3944_v45 }
0x1ba4   :  { %3948 = vmax.xlane.f32.xlu0 %v3947_v46 }
0x1c1b   :  { %v3943_v53 = vpop.xlane.xlu1 %3942 }
0x1c1c   :  { %v3951_v54 = vsub.f32 %v7721_v18, %v3943_v53  ;;  %v3940_v37 = vpop.xlane.xlu0 %3939 }
0x1c1d   :  { %v3950_v36 = vsub.f32 %v3838_v20, %v3940_v37 }
0x1c1e   :  { %v3956_v55 = vmul.f32 1.442695, %v3951_v54 }
0x1c1f   :  { %v3954_v31 = vmul.f32 1.442695, %v3950_v36 }
0x1c20   :  { %8715 = vpow2.f32 %v3956_v55 }
0x1c21   :  { %8717 = vpow2.f32 %v3954_v31 }
0x1c2a   :  { %v8716_v56 = vpop.eup %8715 }
0x1c2b   :  { %v8718_v57 = vpop.eup %8717  ;;  %v3965_v43 = vsel %vm522_vm3, %v8716_v56, 0.0 }
0x1c2c   :  { %3966 = vadd.xlane.f32.xlu1 %v3965_v43  ;;  %v3962_v9 = vsel %vm522_vm3, %v8718_v57, 0.0 }
0x1c2d   :  { %v3946_v58 = vpop.xlane.xlu0 %3945  ;;  %3963 = vadd.xlane.f32.xlu0 %v3962_v9 }
0x1c2e   :  { %v3952_v59 = vsub.f32 %v3929_v42, %v3946_v58 }
0x1c30   :  { %v3958_v27 = vmul.f32 1.442695, %v3952_v59 }
0x1c31   :  { %v3949_v60 = vpop.xlane.xlu0 %3948 }
0x1c32   :  { %8719 = vpow2.f32 %v3958_v27  ;;  %v3953_v4 = vsub.f32 %v7728_v41, %v3949_v60 }
0x1c34   :  { %v3960_v17 = vmul.f32 1.442695, %v3953_v4 }
0x1c36   :  { %8721 = vpow2.f32 %v3960_v17 }
0x1c3c   :  { %v8720_v61 = vpop.eup %8719 }
0x1c3d   :  { %v3968_v50 = vsel %vm522_vm3, %v8720_v61, 0.0 }
0x1c3e   :  { %3969 = vadd.xlane.f32.xlu0 %v3968_v50 }
0x1c40   :  { %v8722_v35 = vpop.eup %8721 }
0x1c41   :  { %v3971_v51 = vsel %vm522_vm3, %v8722_v35, 0.0 }
0x1c42   :  { %3972 = vadd.xlane.f32.xlu1 %v3971_v51 }
0x1c53   :  { %8377 = vrot.lane.b32.xlu1 %v9444_v19, %s10142_s21 }
0x1c54   :  { %8372 = vrot.lane.b32.xlu0 %v9448_v13, %s10142_s21 }
0x1c57   :  { %8382 = vrot.lane.b32.xlu1 %v8381_v34, %s10143_s22 }
0x1c58   :  { %8392 = vrot.lane.b32.xlu0 %v8391_v10, %s10144_s26 }
0x1c5b   :  { %8387 = vrot.lane.b32.xlu1 %v8386_v5, %s10143_s22 }
0x1c5f   :  { %8397 = vrot.lane.b32.xlu1 %v8396_v40, %s10144_s26 }
0x1cb9   :  { %v3967_v0 = vpop.xlane.xlu1 %3966 }
0x1cba   :  { %v3964_v38 = vpop.xlane.xlu0 %3963 }
0x1cbb   :  { %8723 = vrcp.f32 %v3964_v38 }
0x1cbc   :  { %8725 = vrcp.f32 %v3967_v0 }
0x1cc5   :  { %v8724_v19 = vpop.eup %8723 }
0x1cc6   :  { %v3978_v1 = vmul.f32 %v8724_v19, %v8718_v57  ;;  %v8726_v49 = vpop.eup %8725 }
0x1cc7   :  { %v3979_v11 = vmul.f32 %v8726_v49, %v8716_v56 }
0x1cc8   :  { %7733 = vmatprep.mubr.msk.f32.mxu0 %vm522_vm3, %v3978_v1 }
0x1ccb   :  { %v3970_v13 = vpop.xlane.xlu0 %3969 }
0x1ccc   :  { %8727 = vrcp.f32 %v3970_v13 }
0x1ccf   :  { %v3973_v62 = vpop.xlane.xlu1 %3972  ;;  %v8373_v63 = vpop.permute.xlu0 %8372 }
0x1cd0   :  { %8729 = vrcp.f32 %v3973_v62  ;;  %v8375_v34 = vunpack.i.h.bf16 %v8373_v63  ;;  %v8374_v48 = vunpack.i.l.bf16 %v8373_v63 }
0x1cd2   :  { %v8087_v6 = vpack.c.bf16 %v8375_v34, %v8374_v48 }
0x1cd3   :  { %v8378_v3 = vpop.permute.xlu1 %8377  ;;  %v8393_v42 = vpop.permute.xlu0 %8392 }
0x1cd4   :  { %v8380_v5 = vunpack.i.h.bf16 %v8378_v3  ;;  %v8379_v7 = vunpack.i.l.bf16 %v8378_v3  ;;  %8088 = vmatprep.subr.bf16.mxu0 %v8087_v6  ;;  %v8395_v53 = vunpack.i.h.bf16 %v8393_v42  ;;  %v8394_v54 = vunpack.i.l.bf16 %v8393_v42 }
0x1cd5   :  { %8090 = vmatpush3.bf16.msra.mxu0 %v8087_v6 }
0x1cd6   :  { %v8728_v8 = vpop.eup %8727  ;;  %v8091_v33 = vpack.c.bf16 %v8380_v5, %v8379_v7  ;;  %7743 = vmatprep.subr.bf16.mxu0 %v8545_v29 }
0x1cd7   :  { %v3980_v12 = vmul.f32 %v8728_v8, %v8720_v61  ;;  %v8383_v24 = vpop.permute.xlu1 %8382 }
0x1cd8   :  { %7734 = vmatmul.mubr.msk.f32.vlgmr.msra.gmra.mrb[30].mxu0 %vm522_vm3, %v3979_v11  ;;  %8092 = vmatprep.subr.bf16.mxu1 %v8091_v33  ;;  %v8385_v40 = vunpack.i.h.bf16 %v8383_v24  ;;  %v8384_v41 = vunpack.i.l.bf16 %v8383_v24 }
0x1cd9   :  { %8094 = vmatpush3.bf16.msra.mxu1 %v8091_v33  ;;  %7740 = vmatprep.mubr.msk.f32.mxu1 %vm522_vm3, %v3980_v12 }
0x1cda   :  { %v8730_v2 = vpop.eup %8729  ;;  %7744 = vmatpush3.bf16.msra.mxu0 %v8545_v29  ;;  %v4205_v45 = vsel %vm349_vm1, %v9508_v26, %v8385_v40  ;;  %v4204_v46 = vsel %vm349_vm1, %v9510_v28, %v8384_v41 }
0x1cdb   :  { %v3981_v22 = vmul.f32 %v8730_v2, %v8722_v35  ;;  %7745 = vmatprep.subr.bf16.mxu0 %v8546_v16  ;;  %v8388_v39 = vpop.permute.xlu1 %8387  ;;  %v4208_v43 = vsel %vm522_vm3, %v4204_v46, %v8394_v54  ;;  %v4209_v9 = vsel %vm522_vm3, %v4205_v45, %v8395_v53  ;;  %v8547_v46 = vld [vmem:[%s10116_s12 + $0x10] sm:$0xff]   ;;  %v8548_v53 = vld [vmem:[%s10116_s12 + $0x18] sm:$0xff]  }
0x1cdc   :  { %v8390_v56 = vunpack.i.h.bf16 %v8388_v39  ;;  %v8389_v57 = vunpack.i.l.bf16 %v8388_v39  ;;  %7751 = vmatprep.subr.bf16.mxu1 %v8547_v46 }
0x1cdd   :  { %7741 = vmatmul.mubr.msk.f32.vlgmr.msra.gmra.mrb[54].mxu1 %vm522_vm3, %v3981_v22 }
0x1cde   :  { %7746 = vmatpush3.bf16.msra.mxu0 %v8546_v16  ;;  %v4207_v4 = vsel %vm349_vm1, %v9514_v47, %v8390_v56  ;;  %v4206_v17 = vsel %vm349_vm1, %v9516_v52, %v8389_v57  ;;  %v7022_v47 = vld [vmem:[%s10113_s9 + $0x1] ss:$0 sm:$0xff]  ;;  %7752 = vmatpush3.bf16.msra.mxu1 %v8547_v46 }
0x1cdf   :  { %v8398_v37 = vpop.permute.xlu1 %8397  ;;  %7753 = vmatprep.subr.bf16.mxu1 %v8548_v53 }
0x1ce0   :  { %v8400_v58 = vunpack.i.h.bf16 %v8398_v37  ;;  %v8399_v59 = vunpack.i.l.bf16 %v8398_v37 }
0x1ce2   :  { %v4210_v35 = vsel %vm522_vm3, %v4206_v17, %v8399_v59  ;;  %v4211_v51 = vsel %vm522_vm3, %v4207_v4, %v8400_v58  ;;  %7754 = vmatpush3.bf16.msra.mxu1 %v8548_v53 }
0x1dab   :  { %v7735_v32 = vpop.f32.mrb[30].mxu0 }
0x1dac   :  { %v4060_v10 = vpop.f32.mrb[31].mxu0 }
0x1dad   :  { %v8401_v18 = vpack.i.bf16 %v7735_v32, %v4060_v10 }
0x1daf   :  { %8402 = vrot.lane.b32.xlu0 %v8401_v18, %s10145_s28 }
0x1db0   :  { %v7742_v20 = vpop.f32.mrb[54].mxu1 }
0x1db1   :  { %v4147_v21 = vpop.f32.mrb[55].mxu1 }
0x1db2   :  { %v8406_v23 = vpack.i.bf16 %v7742_v20, %v4147_v21 }
0x1db4   :  { %8407 = vrot.lane.b32.xlu1 %v8406_v23, %s10145_s28 }
0x1e21   :  { %v8403_v36 = vpop.permute.xlu0 %8402 }
0x1e22   :  { %v8405_v55 = vunpack.i.h.bf16 %v8403_v36  ;;  %v8404_v31 = vunpack.i.l.bf16 %v8403_v36 }
0x1e24   :  { %v4213_v27 = vsel %vm1997_vm4, %v4209_v9, %v8405_v55  ;;  %v4212_v26 = vsel %vm1997_vm4, %v4208_v43, %v8404_v31 }
0x1e25   :  { %v4216_v60 = vpack.c.bf16 %v4213_v27, %v4212_v26 }
0x1e26   :  { %v8408_v28 = vpop.permute.xlu1 %8407 }
0x1e27   :  { %v8410_v61 = vunpack.i.h.bf16 %v8408_v28  ;;  %v8409_v50 = vunpack.i.l.bf16 %v8408_v28  ;;  %7747 = vmatprep.mubr.msk.bf16.mxu0 %vm189_vm0, %v4216_v60  ;;  %v7029_v60 = vld [vmem:[%s10114_s10 + $0x1] ss:$0 sm:$0xff] }
0x1e29   :  { %v4215_v38 = vsel %vm1997_vm4, %v4211_v51, %v8410_v61  ;;  %v4214_v19 = vsel %vm1997_vm4, %v4210_v35, %v8409_v50  ;;  %v7030_v35 = vld [vmem:[%s10115_s11 + $0x1] ss:$0 sm:$0xff] }
0x1e2a   :  { %v4217_v0 = vpack.c.bf16 %v4215_v38, %v4214_v19 }
0x1e2c   :  { %7748 = vmatmul.mubr.msk.bf16.vlgmr.msra.gmra.mrb[32].mxu0 %vm189_vm0, %v4217_v0 }
0x1eff   :  { %v7749_v52 = vpop.f32.mrb[32].mxu0 }
0x1f00   :  { %v4283_v1 = vpop.f32.mrb[33].mxu0  ;;  %v4292_v13 = vadd.f32 %v7749_v52, %v7022_v47 }
0x1f01   :  { %v4284_v62 = vadd.f32 %v7022_v47, %v4283_v1  ;;  %v7750_v63 = vpop.f32.mrb[34].mxu0 }
0x1f02   :  { %v4286_v34 = vpop.f32.mrb[35].mxu0  ;;  %v9667_v49 = vadd.f32 %v4292_v13, %v9391_v14  ;;  %v4295_v3 = vadd.f32 %v7750_v63, %v7022_v47 }
0x1f03   :  { %v9664_v48 = vadd.f32 %v4284_v62, %v9388_v25  ;;  %v4287_v6 = vadd.f32 %v7022_v47, %v4286_v34 }
0x1f04   :  { %v9677_v33 = vadd.f32 %v4295_v3, %v9399_v30  ;;  %v4312_v25 = vsel %vm189_vm0, %v9667_v49, 0.0  ;;  %v8549_v3 = vld [vmem:[%s10118_s14 + $0x40] sm:$0xff]  }
0x1f05   :  { %v9670_v5 = vadd.f32 %v4287_v6, %v9394_v15  ;;  %v4306_v7 = vsel %vm189_vm0, %v9664_v48, 0.0  ;;  %7759 = vmatprep.subr.bf16.mxu0 %v8549_v3 }
0x1f06   :  { %4307 = vadd.xlane.f32.xlu0 %v4306_v7  ;;  %v4315_v14 = vsel %vm189_vm0, %v9677_v33, 0.0  ;;  %7760 = vmatpush3.bf16.msra.mxu0 %v8549_v3  ;;  %v8550_v7 = vld [vmem:[%s10118_s14 + $0x48] sm:$0xff]  }
0x1f07   :  { %v4309_v8 = vsel %vm189_vm0, %v9670_v5, 0.0  ;;  %7761 = vmatprep.subr.bf16.mxu0 %v8550_v7 }
0x1f08   :  { %4310 = vadd.xlane.f32.xlu1 %v4309_v8  ;;  %v8551_v8 = vld [vmem:[%s10118_s14 + $0x50] sm:$0xff]  }
0x1f0a   :  { %4313 = vadd.xlane.f32.xlu0 %v4312_v25  ;;  %7762 = vmatpush3.bf16.msra.mxu0 %v8550_v7  ;;  %v8552_v25 = vld [vmem:[%s10118_s14 + $0x58] sm:$0xff]  }
0x1f0b   :  { %7763 = vmatprep.subr.bf16.mxu0 %v8551_v8 }
0x1f0e   :  { %4316 = vadd.xlane.f32.xlu0 %v4315_v14  ;;  %7764 = vmatpush3.bf16.msra.mxu0 %v8551_v8  ;;  %v8553_v14 = vld [vmem:[%s10118_s14 + $0x60] sm:$0xff]  }
0x1f0f   :  { %7765 = vmatprep.subr.bf16.mxu0 %v8552_v25 }
0x1f12   :  { %7766 = vmatpush3.bf16.msra.mxu0 %v8552_v25 }
0x1f13   :  { %7767 = vmatprep.subr.bf16.mxu0 %v8553_v14 }
0x1f16   :  { %7768 = vmatpush3.bf16.msra.mxu0 %v8553_v14 }
0x1f93   :  { %v4308_v15 = vpop.xlane.xlu0 %4307 }
0x1f94   :  { %v4318_v11 = vmul.f32 0.03125, %v4308_v15  ;;  %v8554_v15 = vld [vmem:[%s10118_s14 + $0x68] sm:$0xff]  }
0x1f95   :  { %v4311_v12 = vpop.xlane.xlu1 %4310  ;;  %7769 = vmatprep.subr.bf16.mxu0 %v8554_v15 }
0x1f96   :  { %v4322_v2 = vsub.f32 %v9664_v48, %v4318_v11  ;;  %v4319_v22 = vmul.f32 0.03125, %v4311_v12  ;;  %7770 = vmatpush3.bf16.msra.mxu0 %v8554_v15  ;;  %v8555_v11 = vld [vmem:[%s10118_s14 + $0x70] sm:$0xff]   ;;  %v8556_v12 = vld [vmem:[%s10118_s14 + $0x78] sm:$0xff]  }
0x1f97   :  { %v4314_v29 = vpop.xlane.xlu0 %4313  ;;  %7771 = vmatprep.subr.bf16.mxu0 %v8555_v11 }
0x1f98   :  { %v4323_v16 = vsub.f32 %v9670_v5, %v4319_v22  ;;  %v4320_v32 = vmul.f32 0.03125, %v4314_v29  ;;  %v4326_v30 = vmul.f32 %v4322_v2, %v4322_v2 }
0x1f9a   :  { %v4324_v10 = vsub.f32 %v9667_v49, %v4320_v32  ;;  %v4330_v18 = vsel %vm189_vm0, %v4326_v30, 0.0  ;;  %v4327_v20 = vmul.f32 %v4323_v16, %v4323_v16  ;;  %7772 = vmatpush3.bf16.msra.mxu0 %v8555_v11 }
0x1f9b   :  { %4331 = vadd.xlane.f32.xlu0 %v4330_v18  ;;  %v4317_v21 = vpop.xlane.xlu0 %4316  ;;  %7773 = vmatprep.subr.bf16.mxu0 %v8556_v12 }
0x1f9c   :  { %v4321_v23 = vmul.f32 0.03125, %v4317_v21  ;;  %v4333_v24 = vsel %vm189_vm0, %v4327_v20, 0.0  ;;  %v4328_v39 = vmul.f32 %v4324_v10, %v4324_v10 }
0x1f9d   :  { %4334 = vadd.xlane.f32.xlu1 %v4333_v24 }
0x1f9e   :  { %v4325_v40 = vsub.f32 %v9677_v33, %v4321_v23  ;;  %v4336_v41 = vsel %vm189_vm0, %v4328_v39, 0.0  ;;  %7774 = vmatpush3.bf16.msra.mxu0 %v8556_v12 }
0x1f9f   :  { %4337 = vadd.xlane.f32.xlu0 %v4336_v41 }
0x1fa0   :  { %v4329_v42 = vmul.f32 %v4325_v40, %v4325_v40 }
0x1fa2   :  { %v4339_v45 = vsel %vm189_vm0, %v4329_v42, 0.0 }
0x1fa3   :  { %4340 = vadd.xlane.f32.xlu1 %v4339_v45 }
0x2028   :  { %v4332_v54 = vpop.xlane.xlu0 %4331 }
0x2029   :  { %v4342_v37 = vmul.f32 0.03125, %v4332_v54 }
0x202a   :  { %v4335_v36 = vpop.xlane.xlu1 %4334 }
0x202b   :  { %v4346_v55 = vadd.f32 1e-06, %v4342_v37  ;;  %v4343_v31 = vmul.f32 0.03125, %v4335_v36 }
0x202c   :  { %v4338_v56 = vpop.xlane.xlu0 %4337 }
0x202d   :  { %8731 = vrsqrt.f32 %v4346_v55  ;;  %v4347_v57 = vadd.f32 1e-06, %v4343_v31  ;;  %v4344_v43 = vmul.f32 0.03125, %v4338_v56 }
0x202f   :  { %8733 = vrsqrt.f32 %v4347_v57  ;;  %v4348_v9 = vadd.f32 1e-06, %v4344_v43 }
0x2030   :  { %v4341_v58 = vpop.xlane.xlu1 %4340 }
0x2031   :  { %8735 = vrsqrt.f32 %v4348_v9  ;;  %v4345_v59 = vmul.f32 0.03125, %v4341_v58 }
0x2033   :  { %v4349_v27 = vadd.f32 1e-06, %v4345_v59 }
0x2035   :  { %8737 = vrsqrt.f32 %v4349_v27 }
0x2037   :  { %v8732_v26 = vpop.eup %8731 }
0x2038   :  { %v4354_v28 = vmul.f32 %v8732_v26, %v4322_v2  ;;  %v7036_v2 = vld [vmem:[%s10117_s13 + $0x1] ss:$0 sm:$0xff] }
0x2039   :  { %v8734_v4 = vpop.eup %8733 }
0x203a   :  { %v4355_v17 = vmul.f32 %v8734_v4, %v4323_v16  ;;  %v4364_v61 = vmul.f32 %v7029_v60, %v4354_v28 }
0x203b   :  { %v8736_v50 = vpop.eup %8735 }
0x203c   :  { %v4356_v51 = vmul.f32 %v8736_v50, %v4324_v10  ;;  %v4365_v38 = vmul.f32 %v7029_v60, %v4355_v17  ;;  %v4374_v19 = vadd.f32 %v7030_v35, %v4364_v61 }
0x203e   :  { %v4375_v0 = vadd.f32 %v7030_v35, %v4365_v38  ;;  %v4366_v52 = vmul.f32 %v7029_v60, %v4356_v51 }
0x203f   :  { %v8738_v47 = vpop.eup %8737 }
0x2040   :  { %v4357_v1 = vmul.f32 %v8738_v47, %v4325_v40  ;;  %v4378_v13 = vpack.c.bf16 %v4375_v0, %v4374_v19  ;;  %v4376_v63 = vadd.f32 %v7030_v35, %v4366_v52 }
0x2042   :  { %v4367_v62 = vmul.f32 %v7029_v60, %v4357_v1  ;;  %7755 = vmatprep.mubr.msk.bf16.mxu1 %vm189_vm0, %v4378_v13 }
0x2044   :  { %v4377_v34 = vadd.f32 %v7030_v35, %v4367_v62  ;;  %v7058_v62 = vld [vmem:[%s10119_s15 + $0x1] ss:$0 sm:$0xff] }
0x2046   :  { %v4379_v6 = vpack.c.bf16 %v4377_v34, %v4376_v63 }
0x2048   :  { %7756 = vmatmul.mubr.msk.bf16.vlgmr.msra.gmra.mrb[56].mxu1 %vm189_vm0, %v4379_v6 }
0x211b   :  { %v7757_v22 = vpop.f32.mrb[56].mxu1 }
0x211c   :  { %v4454_v29 = vadd.f32 %v7757_v22, %v7036_v2  ;;  %v4445_v16 = vpop.f32.mrb[57].mxu1 }
0x211d   :  { %v4446_v32 = vadd.f32 %v7036_v2, %v4445_v16  ;;  %v7758_v30 = vpop.f32.mrb[58].mxu1 }
0x211e   :  { %v4462_v10 = vmul.f32 %v4454_v29, %v4454_v29  ;;  %v4457_v18 = vadd.f32 %v7758_v30, %v7036_v2  ;;  %v4448_v20 = vpop.f32.mrb[59].mxu1 }
0x211f   :  { %v4460_v21 = vmul.f32 %v4446_v32, %v4446_v32  ;;  %v4449_v23 = vadd.f32 %v7036_v2, %v4448_v20 }
0x2120   :  { %v4466_v24 = vmul.f32 %v4462_v10, %v4454_v29  ;;  %v4463_v39 = vmul.f32 %v4457_v18, %v4457_v18 }
0x2121   :  { %v4464_v40 = vmul.f32 %v4460_v21, %v4446_v32  ;;  %v4461_v41 = vmul.f32 %v4449_v23, %v4449_v23 }
0x2122   :  { %v4470_v42 = vmul.f32 0.044715, %v4466_v24  ;;  %v4467_v45 = vmul.f32 %v4463_v39, %v4457_v18 }
0x2123   :  { %v4468_v46 = vmul.f32 0.044715, %v4464_v40  ;;  %v4465_v53 = vmul.f32 %v4461_v41, %v4449_v23 }
0x2124   :  { %v4474_v54 = vadd.f32 %v4470_v42, %v4454_v29  ;;  %v4471_v37 = vmul.f32 0.044715, %v4467_v45 }
0x2125   :  { %v4472_v36 = vadd.f32 %v4468_v46, %v4446_v32  ;;  %v4469_v55 = vmul.f32 0.044715, %v4465_v53 }
0x2126   :  { %v4478_v31 = vmul.f32 0.7978846, %v4474_v54  ;;  %v4475_v56 = vadd.f32 %v4471_v37, %v4457_v18 }
0x2127   :  { %v4476_v57 = vmul.f32 0.7978846, %v4472_v36  ;;  %v4473_v43 = vadd.f32 %v4469_v55, %v4449_v23  ;;  %v8557_v36 = vld [vmem:[%s10110_s6 + $0x20] sm:$0xff]   ;;  %v8558_v55 = vld [vmem:[%s10110_s6 + $0x28] sm:$0xff]  }
0x2128   :  { %8739 = vtanh.f32 %v4478_v31  ;;  %v4479_v9 = vmul.f32 0.7978846, %v4475_v56  ;;  %7779 = vmatprep.subr.bf16.mxu1 %v8557_v36 }
0x2129   :  { %8741 = vtanh.f32 %v4476_v57  ;;  %v4477_v58 = vmul.f32 0.7978846, %v4473_v43  ;;  %7780 = vmatpush3.bf16.msra.mxu1 %v8557_v36 }
0x212a   :  { %8743 = vtanh.f32 %v4479_v9  ;;  %7781 = vmatprep.subr.bf16.mxu1 %v8558_v55 }
0x212b   :  { %8745 = vtanh.f32 %v4477_v58 }
0x212d   :  { %7782 = vmatpush3.bf16.msra.mxu1 %v8558_v55 }
0x2132   :  { %v8740_v59 = vpop.eup %8739 }
0x2133   :  { %v8742_v27 = vpop.eup %8741  ;;  %v4486_v26 = vadd.f32 1.0, %v8740_v59 }
0x2134   :  { %v8744_v60 = vpop.eup %8743  ;;  %v4484_v28 = vadd.f32 1.0, %v8742_v27 }
0x2135   :  { %v8746_v4 = vpop.eup %8745  ;;  %v4490_v17 = vmul.f32 0.5, %v4486_v26  ;;  %v4487_v61 = vadd.f32 1.0, %v8744_v60 }
0x2136   :  { %v4485_v50 = vadd.f32 1.0, %v8746_v4  ;;  %v4488_v35 = vmul.f32 0.5, %v4484_v28 }
0x2137   :  { %v4491_v51 = vmul.f32 0.5, %v4487_v61  ;;  %v4494_v19 = vmul.f32 %v4490_v17, %v4454_v29  ;;  %v7069_v61 = vld [vmem:[%s10108_s4 + $0x2] ss:$0 sm:$0xff] }
0x2138   :  { %v4489_v38 = vmul.f32 0.5, %v4485_v50  ;;  %v4492_v47 = vmul.f32 %v4488_v35, %v4446_v32 }
0x2139   :  { %v4495_v0 = vmul.f32 %v4491_v51, %v4457_v18 }
0x213a   :  { %v4493_v52 = vmul.f32 %v4489_v38, %v4449_v23 }
0x213b   :  { %v4497_v1 = vpack.c.bf16 %v4495_v0, %v4494_v19  ;;  %v7070_v0 = vld [vmem:[%s10109_s5 + $0x2] ss:$0 sm:$0xff]  ;;  %s10146_s5 = smov 112  }
0x213c   :  { %v4496_v13 = vpack.c.bf16 %v4493_v52, %v4492_v47 }
0x213e   :  { %7775 = vmatprep.mubr.bf16.mxu0 %v4496_v13 }
0x213f   :  { %7776 = vmatmul.mubr.bf16.vlgmr.msra.gmra.mrb[36].mxu0 %v4497_v1 }
0x2212   :  { %v7777_v63 = vpop.f32.mrb[36].mxu0 }
0x2213   :  { %v4605_v34 = vpop.f32.mrb[37].mxu0  ;;  %v4614_v6 = vadd.f32 %v7777_v63, %v7058_v62 }
0x2214   :  { %v4606_v3 = vadd.f32 %v7058_v62, %v4605_v34  ;;  %v7778_v7 = vpop.f32.mrb[38].mxu0 }
0x2215   :  { %v4608_v8 = vpop.f32.mrb[39].mxu0  ;;  %v4617_v14 = vadd.f32 %v7778_v7, %v7058_v62  ;;  %v9739_v11 = vadd.f32 %v4614_v6, %v9667_v49 }
0x2216   :  { %v9736_v25 = vadd.f32 %v4606_v3, %v9664_v48  ;;  %v4609_v15 = vadd.f32 %v7058_v62, %v4608_v8 }
0x2217   :  { %v9747_v22 = vadd.f32 %v4617_v14, %v9677_v33  ;;  %v4634_v48 = vsel %vm189_vm0, %v9739_v11, 0.0 }
0x2218   :  { %v9742_v12 = vadd.f32 %v4609_v15, %v9670_v5  ;;  %v4628_v2 = vsel %vm189_vm0, %v9736_v25, 0.0  ;;  %v7076_v15 = vld [vmem:[%s10111_s7 + $0x2] ss:$0 sm:$0xff]  ;;  %s10147_s7 = smov 48  }
0x2219   :  { %4629 = vadd.xlane.f32.xlu0 %v4628_v2  ;;  %v4637_v49 = vsel %vm189_vm0, %v9747_v22, 0.0 }
0x221a   :  { %v4631_v29 = vsel %vm189_vm0, %v9742_v12, 0.0 }
0x221b   :  { %4632 = vadd.xlane.f32.xlu1 %v4631_v29 }
0x221d   :  { %4635 = vadd.xlane.f32.xlu0 %v4634_v48 }
0x221f   :  { %4638 = vadd.xlane.f32.xlu1 %v4637_v49 }
0x22a6   :  { %v4630_v5 = vpop.xlane.xlu0 %4629 }
0x22a7   :  { %v4640_v16 = vmul.f32 0.03125, %v4630_v5 }
0x22a8   :  { %v4633_v32 = vpop.xlane.xlu1 %4632 }
0x22a9   :  { %v4644_v30 = vsub.f32 %v9736_v25, %v4640_v16  ;;  %v4641_v10 = vmul.f32 0.03125, %v4633_v32 }
0x22aa   :  { %v4636_v33 = vpop.xlane.xlu0 %4635 }
0x22ab   :  { %v4645_v18 = vsub.f32 %v9742_v12, %v4641_v10  ;;  %v4642_v20 = vmul.f32 0.03125, %v4636_v33  ;;  %v4648_v21 = vmul.f32 %v4644_v30, %v4644_v30 }
0x22ac   :  { %v4639_v23 = vpop.xlane.xlu1 %4638 }
0x22ad   :  { %v4646_v24 = vsub.f32 %v9739_v11, %v4642_v20  ;;  %v4643_v39 = vmul.f32 0.03125, %v4639_v23  ;;  %v4652_v40 = vsel %vm189_vm0, %v4648_v21, 0.0  ;;  %v4649_v41 = vmul.f32 %v4645_v18, %v4645_v18 }
0x22ae   :  { %4653 = vadd.xlane.f32.xlu0 %v4652_v40 }
0x22af   :  { %v4647_v42 = vsub.f32 %v9747_v22, %v4643_v39  ;;  %v4655_v45 = vsel %vm189_vm0, %v4649_v41, 0.0  ;;  %v4650_v46 = vmul.f32 %v4646_v24, %v4646_v24 }
0x22b0   :  { %4656 = vadd.xlane.f32.xlu1 %v4655_v45 }
0x22b1   :  { %v4658_v53 = vsel %vm189_vm0, %v4650_v46, 0.0  ;;  %v4651_v54 = vmul.f32 %v4647_v42, %v4647_v42 }
0x22b2   :  { %4659 = vadd.xlane.f32.xlu0 %v4658_v53 }
0x22b3   :  { %v4661_v37 = vsel %vm189_vm0, %v4651_v54, 0.0 }
0x22b4   :  { %4662 = vadd.xlane.f32.xlu1 %v4661_v37 }
0x233b   :  { %v4654_v31 = vpop.xlane.xlu0 %4653 }
0x233c   :  { %v4664_v56 = vmul.f32 0.03125, %v4654_v31 }
0x233d   :  { %v4657_v57 = vpop.xlane.xlu1 %4656 }
0x233e   :  { %v4668_v43 = vadd.f32 1e-06, %v4664_v56  ;;  %v4665_v9 = vmul.f32 0.03125, %v4657_v57 }
0x233f   :  { %v4660_v58 = vpop.xlane.xlu0 %4659 }
0x2340   :  { %8747 = vrsqrt.f32 %v4668_v43  ;;  %v4669_v59 = vadd.f32 1e-06, %v4665_v9  ;;  %v4666_v27 = vmul.f32 0.03125, %v4660_v58 }
0x2341   :  { %v4663_v26 = vpop.xlane.xlu1 %4662 }
0x2342   :  { %8749 = vrsqrt.f32 %v4669_v59  ;;  %v4670_v60 = vadd.f32 1e-06, %v4666_v27  ;;  %v4667_v28 = vmul.f32 0.03125, %v4663_v26 }
0x2344   :  { %8751 = vrsqrt.f32 %v4670_v60  ;;  %v4671_v4 = vadd.f32 1e-06, %v4667_v28 }
0x2346   :  { %8753 = vrsqrt.f32 %v4671_v4 }
0x234a   :  { %v8748_v17 = vpop.eup %8747 }
0x234b   :  { %v4676_v50 = vmul.f32 %v8748_v17, %v4644_v30 }
0x234c   :  { %v8750_v35 = vpop.eup %8749 }
0x234d   :  { %v4677_v51 = vmul.f32 %v8750_v35, %v4645_v18  ;;  %v4686_v38 = vmul.f32 %v7069_v61, %v4676_v50 }
0x234e   :  { %v8752_v19 = vpop.eup %8751 }
0x234f   :  { %v4678_v47 = vmul.f32 %v8752_v19, %v4646_v24  ;;  %v4687_v52 = vmul.f32 %v7069_v61, %v4677_v51  ;;  %v4696_v63 = vadd.f32 %v7070_v0, %v4686_v38 }
0x2350   :  { %v8754_v1 = vpop.eup %8753 }
0x2351   :  { %v4688_v13 = vmul.f32 %v7069_v61, %v4678_v47  ;;  %v4679_v62 = vmul.f32 %v8754_v1, %v4647_v42  ;;  %v4697_v34 = vadd.f32 %v7070_v0, %v4687_v52 }
0x2353   :  { %v4689_v6 = vmul.f32 %v7069_v61, %v4679_v62  ;;  %v4700_v3 = vpack.c.bf16 %v4697_v34, %v4696_v63  ;;  %v4698_v7 = vadd.f32 %v7070_v0, %v4688_v13 }
0x2355   :  { %7783 = vmatprep.mubr.msk.bf16.mxu1 %vm189_vm0, %v4700_v3  ;;  %v4699_v8 = vadd.f32 %v7070_v0, %v4689_v6 }
0x2357   :  { %v4701_v14 = vpack.c.bf16 %v4699_v8, %v4698_v7 }
0x2359   :  { %7784 = vmatmul.mubr.msk.bf16.vlgmr.msra.gmra.mrb[60].mxu1 %vm189_vm0, %v4701_v14 }
0x242c   :  { %v7785_v2 = vpop.f32.mrb[60].mxu1 }
0x242d   :  { %v4767_v29 = vpop.f32.mrb[61].mxu1  ;;  %v9782_v5 = vadd.f32 %v7785_v2, %v7076_v15 }
0x242e   :  { %v9780_v48 = vadd.f32 %v7076_v15, %v4767_v29  ;;  %v7786_v49 = vpop.f32.mrb[62].mxu1 }
0x242f   :  { %v9784_v16 = vadd.f32 %v7786_v49, %v7076_v15  ;;  %v4770_v32 = vpop.f32.mrb[63].mxu1 }
0x2430   :  { %v9786_v30 = vadd.f32 %v7076_v15, %v4770_v32  ;;  %7791 = vmatprep.mubr.msk.f32.mxu1 %vm349_vm1, %v9780_v48 }
0x2431   :  { %v9792_v10 = vpack.i.bf16 %v9784_v16, %v9782_v5 }
0x2432   :  { %v9796_v33 = vpack.i.bf16 %v9786_v30, %v9780_v48 }
0x2433   :  { %8417 = vrot.lane.b32.xlu1 %v9792_v10, %s8859_s29 }
0x2434   :  { %8412 = vrot.lane.b32.xlu0 %v9796_v33, %s8859_s29  ;;  %s10148_s29 = smov 72  }
0x24a5   :  { %v8418_v18 = vpop.permute.xlu1 %8417 }
0x24a6   :  { %v8413_v20 = vpop.permute.xlu0 %8412  ;;  %v8420_v21 = vunpack.i.h.bf16 %v8418_v18  ;;  %v8419_v23 = vunpack.i.l.bf16 %v8418_v18 }
0x24a7   :  { %v8415_v24 = vunpack.i.h.bf16 %v8413_v20  ;;  %v8414_v39 = vunpack.i.l.bf16 %v8413_v20 }
0x24a8   :  { %v8101_v41 = vpack.c.bf16 %v8420_v21, %v8419_v23 }
0x24a9   :  { %v8095_v40 = vpack.c.bf16 %v8415_v24, %v8414_v39 }
0x24ab   :  { %8097 = vmatprep.subr.msk.bf16.mxu1 %vm9070_vm2, %v8095_v40 }
0x24ac   :  { %8100 = vmatpush3.bf16.xpose.msk.msra.mxu1 %vm9070_vm2, %v8095_v40 }
0x24ad   :  { %8103 = vmatprep.subr.msk.bf16.mxu1 %vm9070_vm2, %v8101_v41 }
0x24b3   :  { %7792 = vmatmul.mubr.msk.f32.vlgmr.msra.gmra.mrb[64].mxu1 %vm349_vm1, %v9786_v30 }
0x24b4   :  { %8106 = vmatpush3.bf16.xpose.msk.msra.mxu1 %vm9070_vm2, %v8101_v41  ;;  %7798 = vmatprep.mubr.msk.f32.mxu1 %vm349_vm1, %v9782_v5 }
0x24bb   :  { %7799 = vmatmul.mubr.msk.f32.vlgmr.msra.gmra.mrb[66].mxu1 %vm349_vm1, %v9784_v16 }
0x2586   :  { %v7793_v42 = vpop.f32.mrb[64].mxu1 }
0x2587   :  { %v4862_v45 = vpop.f32.mrb[65].mxu1  ;;  %v4963_v46 = vsel %vm522_vm3, %v7793_v42, -inf }
0x2588   :  { %4964 = vmax.xlane.f32.xlu0 %v4963_v46  ;;  %v4960_v53 = vsel %vm522_vm3, %v4862_v45, -inf }
0x2589   :  { %4961 = vmax.xlane.f32.xlu1 %v4960_v53 }
0x258e   :  { %v7800_v54 = vpop.f32.mrb[66].mxu1 }
0x258f   :  { %v4951_v37 = vpop.f32.mrb[67].mxu1  ;;  %v4969_v36 = vsel %vm522_vm3, %v7800_v54, -inf }
0x2590   :  { %4970 = vmax.xlane.f32.xlu1 %v4969_v36  ;;  %v4966_v55 = vsel %vm522_vm3, %v4951_v37, -inf }
0x2591   :  { %4967 = vmax.xlane.f32.xlu0 %v4966_v55 }
0x2615   :  { %v4965_v31 = vpop.xlane.xlu0 %4964 }
0x2616   :  { %v4973_v56 = vsub.f32 %v7793_v42, %v4965_v31  ;;  %v4962_v57 = vpop.xlane.xlu1 %4961 }
0x2617   :  { %v4972_v43 = vsub.f32 %v4862_v45, %v4962_v57 }
0x2618   :  { %v4978_v9 = vmul.f32 1.442695, %v4973_v56 }
0x2619   :  { %v4976_v58 = vmul.f32 1.442695, %v4972_v43 }
0x261a   :  { %8755 = vpow2.f32 %v4978_v9 }
0x261b   :  { %8757 = vpow2.f32 %v4976_v58 }
0x261d   :  { %v4971_v17 = vpop.xlane.xlu1 %4970 }
0x261e   :  { %v4968_v28 = vpop.xlane.xlu0 %4967  ;;  %v4975_v50 = vsub.f32 %v7800_v54, %v4971_v17 }
0x261f   :  { %v4974_v4 = vsub.f32 %v4951_v37, %v4968_v28 }
0x2620   :  { %v4982_v35 = vmul.f32 1.442695, %v4975_v50 }
0x2621   :  { %v4980_v61 = vmul.f32 1.442695, %v4974_v4 }
0x2623   :  { %8759 = vpow2.f32 %v4980_v61 }
0x2624   :  { %v8756_v59 = vpop.eup %8755  ;;  %8761 = vpow2.f32 %v4982_v35 }
0x2625   :  { %v8758_v27 = vpop.eup %8757  ;;  %v4987_v26 = vsel %vm522_vm3, %v8756_v59, 0.0 }
0x2626   :  { %4988 = vadd.xlane.f32.xlu1 %v4987_v26  ;;  %v4984_v60 = vsel %vm522_vm3, %v8758_v27, 0.0 }
0x2627   :  { %4985 = vadd.xlane.f32.xlu0 %v4984_v60 }
0x262d   :  { %v8760_v51 = vpop.eup %8759 }
0x262e   :  { %v4990_v38 = vsel %vm522_vm3, %v8760_v51, 0.0  ;;  %v8762_v19 = vpop.eup %8761 }
0x262f   :  { %v4993_v0 = vsel %vm522_vm3, %v8762_v19, 0.0 }
0x2637   :  { %8427 = vrot.lane.b32.xlu1 %v9792_v10, %s8860_s30 }
0x263b   :  { %8432 = vrot.lane.b32.xlu1 %v9796_v33, %s8861_s17 }
0x263d   :  { %8422 = vrot.lane.b32.xlu0 %v9796_v33, %s8860_s30  ;;  %s10149_s30 = smov 104  }
0x263f   :  { %8437 = vrot.lane.b32.xlu1 %v9792_v10, %s8861_s17 }
0x265c   :  { %4991 = vadd.xlane.f32.xlu0 %v4990_v38 }
0x2663   :  { %4994 = vadd.xlane.f32.xlu1 %v4993_v0 }
0x2672   :  { %5178 = vrot.lane.b32.xlu0 %v9780_v48, %s8862_s18 }
0x2674   :  { %5180 = vrot.lane.b32.xlu1 %v9786_v30, %s8862_s18 }
0x2676   :  { %5269 = vrot.lane.b32.xlu0 %v9782_v5, %s8862_s18 }
0x2678   :  { %5271 = vrot.lane.b32.xlu1 %v9784_v16, %s8862_s18 }
0x26b3   :  { %v4989_v47 = vpop.xlane.xlu1 %4988 }
0x26b4   :  { %8763 = vrcp.f32 %v4989_v47  ;;  %v4986_v52 = vpop.xlane.xlu0 %4985 }
0x26b5   :  { %8765 = vrcp.f32 %v4986_v52 }
0x26b7   :  { %v8428_v1 = vpop.permute.xlu1 %8427 }
0x26b8   :  { %v8423_v13 = vpop.permute.xlu0 %8422  ;;  %v8430_v62 = vunpack.i.h.bf16 %v8428_v1  ;;  %v8429_v63 = vunpack.i.l.bf16 %v8428_v1 }
0x26b9   :  { %v8425_v34 = vunpack.i.h.bf16 %v8423_v13  ;;  %v8424_v6 = vunpack.i.l.bf16 %v8423_v13 }
0x26ba   :  { %v8111_v15 = vpack.c.bf16 %v8430_v62, %v8429_v63 }
0x26bb   :  { %v8107_v3 = vpack.c.bf16 %v8425_v34, %v8424_v6  ;;  %v8433_v7 = vpop.permute.xlu1 %8432 }
0x26bc   :  { %v8435_v8 = vunpack.i.h.bf16 %v8433_v7  ;;  %v8434_v14 = vunpack.i.l.bf16 %v8433_v7 }
0x26bd   :  { %8108 = vmatprep.subr.bf16.mxu1 %v8107_v3 }
0x26be   :  { %v8764_v2 = vpop.eup %8763  ;;  %v8115_v29 = vpack.c.bf16 %v8435_v8, %v8434_v14  ;;  %8110 = vmatpush3.bf16.msra.mxu1 %v8107_v3 }
0x26bf   :  { %v8766_v49 = vpop.eup %8765  ;;  %v8438_v32 = vpop.permute.xlu1 %8437  ;;  %8112 = vmatprep.subr.bf16.mxu1 %v8111_v15  ;;  %v5001_v23 = vmul.f32 %v8764_v2, %v8756_v59 }
0x26c0   :  { %v8440_v18 = vunpack.i.h.bf16 %v8438_v32  ;;  %v8439_v20 = vunpack.i.l.bf16 %v8438_v32  ;;  %8117 = vmatprep.subr.msk.bf16.mxu0 %vm9070_vm2, %v8115_v29  ;;  %v5000_v21 = vmul.f32 %v8766_v49, %v8758_v27 }
0x26c1   :  { %8120 = vmatpush3.bf16.xpose.msk.msra.mxu0 %vm9070_vm2, %v8115_v29 }
0x26c2   :  { %v8121_v24 = vpack.c.bf16 %v8440_v18, %v8439_v20  ;;  %7805 = vmatprep.mubr.msk.f32.mxu1 %vm522_vm3, %v5000_v21 }
0x26c3   :  { %7806 = vmatmul.mubr.msk.f32.vlgmr.msra.gmra.mrb[68].mxu1 %vm522_vm3, %v5001_v23 }
0x26c4   :  { %8114 = vmatpush3.bf16.msra.mxu1 %v8111_v15 }
0x26c5   :  { %8123 = vmatprep.subr.msk.bf16.mxu1 %vm9070_vm2, %v8121_v24 }
0x26e9   :  { %v4992_v39 = vpop.xlane.xlu0 %4991 }
0x26ea   :  { %8767 = vrcp.f32 %v4992_v39 }
0x26ed   :  { %v5179_v40 = vpop.permute.xlu0 %5178 }
0x26ee   :  { %7819 = vmatprep.mubr.msk.f32.mxu0 %vm349_vm1, %v5179_v40 }
0x26f0   :  { %v4995_v41 = vpop.xlane.xlu1 %4994 }
0x26f1   :  { %8769 = vrcp.f32 %v4995_v41  ;;  %v5270_v37 = vpop.permute.xlu0 %5269 }
0x26f4   :  { %v8768_v42 = vpop.eup %8767  ;;  %v5181_v45 = vpop.permute.xlu1 %5180 }
0x26f5   :  { %7820 = vmatmul.mubr.msk.f32.vlgmr.msra.gmra.mrb[40].mxu0 %vm349_vm1, %v5181_v45  ;;  %v5002_v46 = vmul.f32 %v8768_v42, %v8760_v51 }
0x26f7   :  { %7812 = vmatprep.mubr.msk.f32.mxu1 %vm522_vm3, %v5002_v46 }
0x26f8   :  { %v5272_v36 = vpop.permute.xlu1 %5271 }
0x26fb   :  { %v8770_v53 = vpop.eup %8769 }
0x26fc   :  { %v5003_v54 = vmul.f32 %v8770_v53, %v8762_v19 }
0x26fe   :  { %7813 = vmatmul.mubr.msk.f32.vlgmr.msra.gmra.mrb[70].mxu1 %vm522_vm3, %v5003_v54 }
0x26ff   :  { %8126 = vmatpush3.bf16.xpose.msk.msra.mxu1 %vm9070_vm2, %v8121_v24  ;;  %7826 = vmatprep.mubr.msk.f32.mxu1 %vm349_vm1, %v5270_v37 }
0x2706   :  { %7827 = vmatmul.mubr.msk.f32.vlgmr.msra.gmra.mrb[72].mxu1 %vm349_vm1, %v5272_v36 }
0x2796   :  { %v9856_v55 = vpop.f32.mrb[68].mxu1 }
0x2797   :  { %v9858_v31 = vpop.f32.mrb[69].mxu1 }
0x27c8   :  { %v7821_v56 = vpop.f32.mrb[40].mxu0 }
0x27c9   :  { %v5260_v57 = vpop.f32.mrb[41].mxu0  ;;  %v5363_v43 = vsel %vm522_vm3, %v7821_v56, -inf }
0x27ca   :  { %5364 = vmax.xlane.f32.xlu1 %v5363_v43  ;;  %v5360_v9 = vsel %vm522_vm3, %v5260_v57, -inf }
0x27cb   :  { %5361 = vmax.xlane.f32.xlu0 %v5360_v9 }
0x27d1   :  { %v9862_v58 = vpop.f32.mrb[70].mxu1 }
0x27d2   :  { %v9864_v59 = vpop.f32.mrb[71].mxu1 }
0x27d9   :  { %v7828_v27 = vpop.f32.mrb[72].mxu1 }
0x27da   :  { %v5351_v26 = vpop.f32.mrb[73].mxu1  ;;  %v5369_v28 = vsel %vm522_vm3, %v7828_v27, -inf }
0x27db   :  { %v5366_v60 = vsel %vm522_vm3, %v5351_v26, -inf }
0x27dc   :  { %5367 = vmax.xlane.f32.xlu0 %v5366_v60 }
0x27e0   :  { %5370 = vmax.xlane.f32.xlu0 %v5369_v28 }
0x2857   :  { %v5365_v4 = vpop.xlane.xlu1 %5364 }
0x2858   :  { %v5373_v17 = vsub.f32 %v7821_v56, %v5365_v4  ;;  %v5362_v61 = vpop.xlane.xlu0 %5361 }
0x2859   :  { %v5372_v50 = vsub.f32 %v5260_v57, %v5362_v61 }
0x285a   :  { %v5378_v35 = vmul.f32 1.442695, %v5373_v17 }
0x285b   :  { %v5376_v51 = vmul.f32 1.442695, %v5372_v50 }
0x285c   :  { %8771 = vpow2.f32 %v5378_v35 }
0x285d   :  { %8773 = vpow2.f32 %v5376_v51 }
0x2866   :  { %v8772_v38 = vpop.eup %8771 }
0x2867   :  { %v8774_v19 = vpop.eup %8773  ;;  %v5387_v0 = vsel %vm522_vm3, %v8772_v38, 0.0 }
0x2868   :  { %5388 = vadd.xlane.f32.xlu1 %v5387_v0  ;;  %v5384_v47 = vsel %vm522_vm3, %v8774_v19, 0.0 }
0x2869   :  { %5385 = vadd.xlane.f32.xlu0 %v5384_v47  ;;  %v5368_v52 = vpop.xlane.xlu0 %5367 }
0x286a   :  { %v5374_v1 = vsub.f32 %v5351_v26, %v5368_v52 }
0x286c   :  { %v5380_v13 = vmul.f32 1.442695, %v5374_v1 }
0x286d   :  { %v5371_v62 = vpop.xlane.xlu0 %5370 }
0x286e   :  { %v5375_v63 = vsub.f32 %v7828_v27, %v5371_v62  ;;  %8775 = vpow2.f32 %v5380_v13 }
0x2870   :  { %v5382_v34 = vmul.f32 1.442695, %v5375_v63 }
0x2872   :  { %8777 = vpow2.f32 %v5382_v34 }
0x2878   :  { %v8776_v6 = vpop.eup %8775 }
0x2879   :  { %8447 = vrot.lane.b32.xlu1 %v9792_v10, %s8863_s1  ;;  %v5390_v3 = vsel %vm522_vm3, %v8776_v6, 0.0 }
0x287c   :  { %v8778_v7 = vpop.eup %8777 }
0x287d   :  { %8452 = vrot.lane.b32.xlu1 %v9796_v33, %s8864_s19  ;;  %v5393_v8 = vsel %vm522_vm3, %v8778_v7, 0.0 }
0x287f   :  { %8442 = vrot.lane.b32.xlu0 %v9796_v33, %s8863_s1 }
0x2881   :  { %8457 = vrot.lane.b32.xlu1 %v9792_v10, %s8864_s19 }
0x289e   :  { %5391 = vadd.xlane.f32.xlu0 %v5390_v3 }
0x28a5   :  { %5394 = vadd.xlane.f32.xlu1 %v5393_v8 }
0x28b4   :  { %5578 = vrot.lane.b32.xlu0 %v9780_v48, %s10146_s5 }
0x28b6   :  { %5580 = vrot.lane.b32.xlu1 %v9786_v30, %s10146_s5 }
0x28b8   :  { %5669 = vrot.lane.b32.xlu0 %v9782_v5, %s10146_s5 }
0x28ba   :  { %5671 = vrot.lane.b32.xlu1 %v9784_v16, %s10146_s5 }
0x28f5   :  { %v5389_v14 = vpop.xlane.xlu1 %5388 }
0x28f6   :  { %8779 = vrcp.f32 %v5389_v14  ;;  %v5386_v15 = vpop.xlane.xlu0 %5385 }
0x28f7   :  { %8781 = vrcp.f32 %v5386_v15 }
0x28f9   :  { %v8448_v2 = vpop.permute.xlu1 %8447 }
0x28fa   :  { %v8450_v29 = vunpack.i.h.bf16 %v8448_v2  ;;  %v8449_v49 = vunpack.i.l.bf16 %v8448_v2  ;;  %v8443_v32 = vpop.permute.xlu0 %8442 }
0x28fb   :  { %v8445_v18 = vunpack.i.h.bf16 %v8443_v32  ;;  %v8444_v20 = vunpack.i.l.bf16 %v8443_v32 }
0x28fc   :  { %v8131_v21 = vpack.c.bf16 %v8450_v29, %v8449_v49 }
0x28fd   :  { %v8127_v23 = vpack.c.bf16 %v8445_v18, %v8444_v20  ;;  %v8453_v24 = vpop.permute.xlu1 %8452 }
0x28fe   :  { %v8455_v39 = vunpack.i.h.bf16 %v8453_v24  ;;  %v8454_v40 = vunpack.i.l.bf16 %v8453_v24  ;;  %8132 = vmatprep.subr.bf16.mxu1 %v8131_v21 }
0x28ff   :  { %8128 = vmatprep.subr.bf16.mxu0 %v8127_v23  ;;  %8134 = vmatpush3.bf16.msra.mxu1 %v8131_v21 }
0x2900   :  { %v8780_v41 = vpop.eup %8779  ;;  %v8135_v42 = vpack.c.bf16 %v8455_v39, %v8454_v40  ;;  %8130 = vmatpush3.bf16.msra.mxu0 %v8127_v23 }
0x2901   :  { %v8782_v45 = vpop.eup %8781  ;;  %v8458_v46 = vpop.permute.xlu1 %8457  ;;  %v5401_v36 = vmul.f32 %v8780_v41, %v8772_v38 }
0x2902   :  { %v8460_v53 = vunpack.i.h.bf16 %v8458_v46  ;;  %v8459_v54 = vunpack.i.l.bf16 %v8458_v46  ;;  %8137 = vmatprep.subr.msk.bf16.mxu0 %vm9070_vm2, %v8135_v42  ;;  %v5400_v37 = vmul.f32 %v8782_v45, %v8774_v19 }
0x2904   :  { %v8141_v56 = vpack.c.bf16 %v8460_v53, %v8459_v54  ;;  %7833 = vmatprep.mubr.msk.f32.mxu0 %vm522_vm3, %v5400_v37 }
0x2905   :  { %7834 = vmatmul.mubr.msk.f32.vlgmr.msra.gmra.mrb[42].mxu0 %vm522_vm3, %v5401_v36 }
0x2906   :  { %8143 = vmatprep.subr.msk.bf16.mxu1 %vm9070_vm2, %v8141_v56 }
0x2909   :  { %8140 = vmatpush3.bf16.xpose.msk.msra.mxu0 %vm9070_vm2, %v8135_v42 }
0x292b   :  { %v5392_v57 = vpop.xlane.xlu0 %5391 }
0x292c   :  { %8783 = vrcp.f32 %v5392_v57 }
0x292f   :  { %v5579_v43 = vpop.permute.xlu0 %5578 }
0x2930   :  { %7847 = vmatprep.mubr.msk.f32.mxu0 %vm349_vm1, %v5579_v43 }
0x2932   :  { %v5395_v9 = vpop.xlane.xlu1 %5394 }
0x2933   :  { %8785 = vrcp.f32 %v5395_v9  ;;  %v5670_v17 = vpop.permute.xlu0 %5669 }
0x2936   :  { %v8784_v27 = vpop.eup %8783  ;;  %v5581_v26 = vpop.permute.xlu1 %5580 }
0x2937   :  { %7848 = vmatmul.mubr.msk.f32.vlgmr.msra.gmra.mrb[44].mxu0 %vm349_vm1, %v5581_v26  ;;  %v5402_v60 = vmul.f32 %v8784_v27, %v8776_v6 }
0x2939   :  { %7840 = vmatprep.mubr.msk.f32.mxu1 %vm522_vm3, %v5402_v60 }
0x293a   :  { %v5672_v61 = vpop.permute.xlu1 %5671 }
0x293d   :  { %v8786_v28 = vpop.eup %8785 }
0x293e   :  { %v5403_v4 = vmul.f32 %v8786_v28, %v8778_v7 }
0x2940   :  { %7841 = vmatmul.mubr.msk.f32.vlgmr.msra.gmra.mrb[74].mxu1 %vm522_vm3, %v5403_v4 }
0x2941   :  { %8146 = vmatpush3.bf16.xpose.msk.msra.mxu1 %vm9070_vm2, %v8141_v56  ;;  %7854 = vmatprep.mubr.msk.f32.mxu1 %vm349_vm1, %v5670_v17 }
0x2948   :  { %7855 = vmatmul.mubr.msk.f32.vlgmr.msra.gmra.mrb[76].mxu1 %vm349_vm1, %v5672_v61 }
0x29d8   :  { %v9904_v50 = vpop.f32.mrb[42].mxu0 }
0x29d9   :  { %v9906_v35 = vpop.f32.mrb[43].mxu0 }
0x29da   :  { %v8491_v51 = vpack.i.bf16 %v9904_v50, %v9906_v35 }
0x2a0a   :  { %v7849_v38 = vpop.f32.mrb[44].mxu0 }
0x2a0b   :  { %v5660_v19 = vpop.f32.mrb[45].mxu0  ;;  %v5763_v0 = vsel %vm522_vm3, %v7849_v38, -inf }
0x2a0c   :  { %5764 = vmax.xlane.f32.xlu1 %v5763_v0  ;;  %v5760_v47 = vsel %vm522_vm3, %v5660_v19, -inf }
0x2a0d   :  { %5761 = vmax.xlane.f32.xlu0 %v5760_v47 }
0x2a13   :  { %v9912_v52 = vpop.f32.mrb[74].mxu1 }
0x2a14   :  { %v9914_v1 = vpop.f32.mrb[75].mxu1 }
0x2a15   :  { %v8496_v13 = vpack.i.bf16 %v9912_v52, %v9914_v1 }
0x2a1b   :  { %v7856_v62 = vpop.f32.mrb[76].mxu1 }
0x2a1c   :  { %v5751_v63 = vpop.f32.mrb[77].mxu1  ;;  %v5769_v6 = vsel %vm522_vm3, %v7856_v62, -inf }
0x2a1d   :  { %v5766_v34 = vsel %vm522_vm3, %v5751_v63, -inf }
0x2a1e   :  { %5767 = vmax.xlane.f32.xlu0 %v5766_v34 }
0x2a22   :  { %5770 = vmax.xlane.f32.xlu0 %v5769_v6 }
0x2a99   :  { %v5765_v3 = vpop.xlane.xlu1 %5764 }
0x2a9a   :  { %v5773_v7 = vsub.f32 %v7849_v38, %v5765_v3  ;;  %v5762_v8 = vpop.xlane.xlu0 %5761 }
0x2a9b   :  { %v5772_v14 = vsub.f32 %v5660_v19, %v5762_v8 }
0x2a9c   :  { %v5778_v15 = vmul.f32 1.442695, %v5773_v7 }
0x2a9d   :  { %v5776_v2 = vmul.f32 1.442695, %v5772_v14 }
0x2a9e   :  { %8787 = vpow2.f32 %v5778_v15 }
0x2a9f   :  { %8789 = vpow2.f32 %v5776_v2 }
0x2aa8   :  { %v8788_v29 = vpop.eup %8787 }
0x2aa9   :  { %v8790_v49 = vpop.eup %8789  ;;  %v5787_v32 = vsel %vm522_vm3, %v8788_v29, 0.0 }
0x2aaa   :  { %5788 = vadd.xlane.f32.xlu1 %v5787_v32  ;;  %v5784_v18 = vsel %vm522_vm3, %v8790_v49, 0.0 }
0x2aab   :  { %5785 = vadd.xlane.f32.xlu0 %v5784_v18  ;;  %v5768_v20 = vpop.xlane.xlu0 %5767 }
0x2aac   :  { %v5774_v21 = vsub.f32 %v5751_v63, %v5768_v20 }
0x2aae   :  { %v5780_v23 = vmul.f32 1.442695, %v5774_v21 }
0x2aaf   :  { %v5771_v24 = vpop.xlane.xlu0 %5770 }
0x2ab0   :  { %v5775_v39 = vsub.f32 %v7856_v62, %v5771_v24  ;;  %8791 = vpow2.f32 %v5780_v23 }
0x2ab2   :  { %v5782_v40 = vmul.f32 1.442695, %v5775_v39 }
0x2ab4   :  { %8793 = vpow2.f32 %v5782_v40 }
0x2aba   :  { %v8792_v41 = vpop.eup %8791 }
0x2abb   :  { %8467 = vrot.lane.b32.xlu1 %v9792_v10, %s10147_s7  ;;  %v5790_v42 = vsel %vm522_vm3, %v8792_v41, 0.0 }
0x2abe   :  { %v8794_v45 = vpop.eup %8793 }
0x2abf   :  { %8472 = vrot.lane.b32.xlu1 %v9796_v33, %s10148_s29  ;;  %v5793_v46 = vsel %vm522_vm3, %v8794_v45, 0.0 }
0x2ac1   :  { %8462 = vrot.lane.b32.xlu0 %v9796_v33, %s10147_s7 }
0x2ac3   :  { %8477 = vrot.lane.b32.xlu1 %v9792_v10, %s10148_s29 }
0x2ae0   :  { %5791 = vadd.xlane.f32.xlu0 %v5790_v42 }
0x2ae7   :  { %5794 = vadd.xlane.f32.xlu1 %v5793_v46 }
0x2af6   :  { %5978 = vrot.lane.b32.xlu0 %v9780_v48, %s10149_s30 }
0x2af8   :  { %5980 = vrot.lane.b32.xlu1 %v9786_v30, %s10149_s30 }
0x2afa   :  { %6069 = vrot.lane.b32.xlu0 %v9782_v5, %s10149_s30 }
0x2afc   :  { %6071 = vrot.lane.b32.xlu1 %v9784_v16, %s10149_s30 }
0x2b37   :  { %v5789_v53 = vpop.xlane.xlu1 %5788 }
0x2b38   :  { %8795 = vrcp.f32 %v5789_v53  ;;  %v5786_v54 = vpop.xlane.xlu0 %5785 }
0x2b39   :  { %8797 = vrcp.f32 %v5786_v54 }
0x2b3b   :  { %v8468_v37 = vpop.permute.xlu1 %8467 }
0x2b3c   :  { %v8470_v36 = vunpack.i.h.bf16 %v8468_v37  ;;  %v8469_v56 = vunpack.i.l.bf16 %v8468_v37  ;;  %v8463_v57 = vpop.permute.xlu0 %8462 }
0x2b3d   :  { %v8465_v43 = vunpack.i.h.bf16 %v8463_v57  ;;  %v8464_v9 = vunpack.i.l.bf16 %v8463_v57 }
0x2b3e   :  { %v8151_v48 = vpack.c.bf16 %v8470_v36, %v8469_v56 }
0x2b3f   :  { %v8147_v27 = vpack.c.bf16 %v8465_v43, %v8464_v9  ;;  %v8473_v26 = vpop.permute.xlu1 %8472 }
0x2b40   :  { %v8475_v30 = vunpack.i.h.bf16 %v8473_v26  ;;  %v8474_v60 = vunpack.i.l.bf16 %v8473_v26  ;;  %8152 = vmatprep.subr.bf16.mxu1 %v8151_v48 }
0x2b41   :  { %8148 = vmatprep.subr.bf16.mxu0 %v8147_v27  ;;  %8154 = vmatpush3.bf16.msra.mxu1 %v8151_v48 }
0x2b42   :  { %v8796_v5 = vpop.eup %8795  ;;  %v8155_v16 = vpack.c.bf16 %v8475_v30, %v8474_v60  ;;  %8150 = vmatpush3.bf16.msra.mxu0 %v8147_v27 }
0x2b43   :  { %v8798_v28 = vpop.eup %8797  ;;  %v8478_v4 = vpop.permute.xlu1 %8477  ;;  %v5801_v19 = vmul.f32 %v8796_v5, %v8788_v29 }
0x2b44   :  { %v8480_v17 = vunpack.i.h.bf16 %v8478_v4  ;;  %v8479_v61 = vunpack.i.l.bf16 %v8478_v4  ;;  %8157 = vmatprep.subr.msk.bf16.mxu0 %vm9070_vm2, %v8155_v16  ;;  %v5800_v38 = vmul.f32 %v8798_v28, %v8790_v49 }
0x2b46   :  { %v8161_v0 = vpack.c.bf16 %v8480_v17, %v8479_v61  ;;  %7861 = vmatprep.mubr.msk.f32.mxu0 %vm522_vm3, %v5800_v38 }
0x2b47   :  { %7862 = vmatmul.mubr.msk.f32.vlgmr.msra.gmra.mrb[46].mxu0 %vm522_vm3, %v5801_v19 }
0x2b48   :  { %8163 = vmatprep.subr.msk.bf16.mxu1 %vm9070_vm2, %v8161_v0 }
0x2b4b   :  { %8160 = vmatpush3.bf16.xpose.msk.msra.mxu0 %vm9070_vm2, %v8155_v16 }
0x2b6d   :  { %v5792_v47 = vpop.xlane.xlu0 %5791 }
0x2b6e   :  { %8799 = vrcp.f32 %v5792_v47 }
0x2b71   :  { %v5979_v62 = vpop.permute.xlu0 %5978 }
0x2b72   :  { %7875 = vmatprep.mubr.msk.f32.mxu0 %vm349_vm1, %v5979_v62 }
0x2b74   :  { %v5795_v63 = vpop.xlane.xlu1 %5794 }
0x2b75   :  { %8801 = vrcp.f32 %v5795_v63  ;;  %v6070_v14 = vpop.permute.xlu0 %6069 }
0x2b78   :  { %v8800_v34 = vpop.eup %8799  ;;  %v5981_v6 = vpop.permute.xlu1 %5980 }
0x2b79   :  { %7876 = vmatmul.mubr.msk.f32.vlgmr.msra.gmra.mrb[48].mxu0 %vm349_vm1, %v5981_v6  ;;  %v5802_v3 = vmul.f32 %v8800_v34, %v8792_v41 }
0x2b7b   :  { %7868 = vmatprep.mubr.msk.f32.mxu1 %vm522_vm3, %v5802_v3 }
0x2b7c   :  { %v6072_v15 = vpop.permute.xlu1 %6071 }
0x2b7f   :  { %v8802_v7 = vpop.eup %8801 }
0x2b80   :  { %v5803_v8 = vmul.f32 %v8802_v7, %v8794_v45 }
0x2b82   :  { %7869 = vmatmul.mubr.msk.f32.vlgmr.msra.gmra.mrb[78].mxu1 %vm522_vm3, %v5803_v8 }
0x2b83   :  { %8166 = vmatpush3.bf16.xpose.msk.msra.mxu1 %vm9070_vm2, %v8161_v0  ;;  %7882 = vmatprep.mubr.msk.f32.mxu1 %vm349_vm1, %v6070_v14  ;;  %v8559_v14 = vld [vmem:[%s10112_s8 + $0x20] sm:$0xff]  }
0x2b8a   :  { %7883 = vmatmul.mubr.msk.f32.vlgmr.msra.gmra.mrb[80].mxu1 %vm349_vm1, %v6072_v15  ;;  %v8560_v15 = vld [vmem:[%s10112_s8 + $0x28] sm:$0xff]  }
0x2c1a   :  { %v7863_v2 = vpop.f32.mrb[46].mxu0 }
0x2c1b   :  { %v5882_v29 = vpop.f32.mrb[47].mxu0 }
0x2c1c   :  { %v8501_v49 = vpack.i.bf16 %v7863_v2, %v5882_v29 }
0x2c4c   :  { %v7877_v32 = vpop.f32.mrb[48].mxu0 }
0x2c4d   :  { %v6060_v18 = vpop.f32.mrb[49].mxu0  ;;  %v6163_v20 = vsel %vm522_vm3, %v7877_v32, -inf }
0x2c4e   :  { %6164 = vmax.xlane.f32.xlu1 %v6163_v20  ;;  %v6160_v21 = vsel %vm522_vm3, %v6060_v18, -inf }
0x2c4f   :  { %6161 = vmax.xlane.f32.xlu0 %v6160_v21 }
0x2c55   :  { %v7870_v23 = vpop.f32.mrb[78].mxu1 }
0x2c56   :  { %v5969_v24 = vpop.f32.mrb[79].mxu1 }
0x2c57   :  { %v8506_v44 = vpack.i.bf16 %v7870_v23, %v5969_v24 }
0x2c5d   :  { %v7884_v39 = vpop.f32.mrb[80].mxu1 }
0x2c5e   :  { %v6151_v40 = vpop.f32.mrb[81].mxu1  ;;  %v6169_v42 = vsel %vm522_vm3, %v7884_v39, -inf }
0x2c5f   :  { %v6166_v41 = vsel %vm522_vm3, %v6151_v40, -inf }
0x2c60   :  { %6167 = vmax.xlane.f32.xlu0 %v6166_v41 }
0x2c64   :  { %6170 = vmax.xlane.f32.xlu0 %v6169_v42 }
0x2cdb   :  { %v6165_v45 = vpop.xlane.xlu1 %6164 }
0x2cdc   :  { %v6173_v46 = vsub.f32 %v7877_v32, %v6165_v45  ;;  %v6162_v53 = vpop.xlane.xlu0 %6161 }
0x2cdd   :  { %v6172_v54 = vsub.f32 %v6060_v18, %v6162_v53 }
0x2cde   :  { %v6178_v37 = vmul.f32 1.442695, %v6173_v46 }
0x2cdf   :  { %v6176_v36 = vmul.f32 1.442695, %v6172_v54 }
0x2ce0   :  { %8803 = vpow2.f32 %v6178_v37 }
0x2ce1   :  { %8805 = vpow2.f32 %v6176_v36 }
0x2cea   :  { %v8804_v56 = vpop.eup %8803 }
0x2ceb   :  { %v8806_v57 = vpop.eup %8805  ;;  %v6187_v43 = vsel %vm522_vm3, %v8804_v56, 0.0 }
0x2cec   :  { %6188 = vadd.xlane.f32.xlu1 %v6187_v43  ;;  %v6184_v9 = vsel %vm522_vm3, %v8806_v57, 0.0 }
0x2ced   :  { %v6168_v48 = vpop.xlane.xlu0 %6167  ;;  %6185 = vadd.xlane.f32.xlu0 %v6184_v9 }
0x2cee   :  { %v6174_v27 = vsub.f32 %v6151_v40, %v6168_v48 }
0x2cf0   :  { %v6180_v26 = vmul.f32 1.442695, %v6174_v27 }
0x2cf1   :  { %v6171_v30 = vpop.xlane.xlu0 %6170 }
0x2cf2   :  { %8807 = vpow2.f32 %v6180_v26  ;;  %v6175_v60 = vsub.f32 %v7884_v39, %v6171_v30 }
0x2cf4   :  { %v6182_v5 = vmul.f32 1.442695, %v6175_v60 }
0x2cf6   :  { %8809 = vpow2.f32 %v6182_v5 }
0x2cfc   :  { %v8808_v16 = vpop.eup %8807 }
0x2cfd   :  { %v6190_v28 = vsel %vm522_vm3, %v8808_v16, 0.0 }
0x2cfe   :  { %6191 = vadd.xlane.f32.xlu0 %v6190_v28 }
0x2d00   :  { %v8810_v4 = vpop.eup %8809 }
0x2d01   :  { %v6193_v17 = vsel %vm522_vm3, %v8810_v4, 0.0 }
0x2d02   :  { %6194 = vadd.xlane.f32.xlu1 %v6193_v17 }
0x2d13   :  { %8487 = vrot.lane.b32.xlu1 %v9792_v10, %s10142_s21 }
0x2d14   :  { %8482 = vrot.lane.b32.xlu0 %v9796_v33, %s10142_s21 }
0x2d17   :  { %8492 = vrot.lane.b32.xlu1 %v8491_v51, %s10143_s22 }
0x2d18   :  { %8502 = vrot.lane.b32.xlu0 %v8501_v49, %s10144_s26 }
0x2d1b   :  { %8497 = vrot.lane.b32.xlu1 %v8496_v13, %s10143_s22 }
0x2d1f   :  { %8507 = vrot.lane.b32.xlu1 %v8506_v44, %s10144_s26 }
0x2d79   :  { %v6189_v38 = vpop.xlane.xlu1 %6188 }
0x2d7a   :  { %v6186_v61 = vpop.xlane.xlu0 %6185 }
0x2d7b   :  { %8811 = vrcp.f32 %v6186_v61 }
0x2d7c   :  { %8813 = vrcp.f32 %v6189_v38 }
0x2d85   :  { %v8812_v10 = vpop.eup %8811 }
0x2d86   :  { %v6200_v19 = vmul.f32 %v8812_v10, %v8806_v57  ;;  %v8814_v52 = vpop.eup %8813 }
0x2d87   :  { %v6201_v34 = vmul.f32 %v8814_v52, %v8804_v56 }
0x2d88   :  { %7889 = vmatprep.mubr.msk.f32.mxu0 %vm522_vm3, %v6200_v19 }
0x2d8b   :  { %v6192_v33 = vpop.xlane.xlu0 %6191 }
0x2d8c   :  { %8815 = vrcp.f32 %v6192_v33 }
0x2d8f   :  { %v6195_v50 = vpop.xlane.xlu1 %6194  ;;  %v8483_v35 = vpop.permute.xlu0 %8482 }
0x2d90   :  { %8817 = vrcp.f32 %v6195_v50  ;;  %v8485_v51 = vunpack.i.h.bf16 %v8483_v35  ;;  %v8484_v0 = vunpack.i.l.bf16 %v8483_v35 }
0x2d92   :  { %v8167_v47 = vpack.c.bf16 %v8485_v51, %v8484_v0 }
0x2d93   :  { %v8488_v1 = vpop.permute.xlu1 %8487  ;;  %v8503_v39 = vpop.permute.xlu0 %8502 }
0x2d94   :  { %v8490_v13 = vunpack.i.h.bf16 %v8488_v1  ;;  %v8489_v62 = vunpack.i.l.bf16 %v8488_v1  ;;  %8168 = vmatprep.subr.bf16.mxu0 %v8167_v47  ;;  %v8505_v42 = vunpack.i.h.bf16 %v8503_v39  ;;  %v8504_v45 = vunpack.i.l.bf16 %v8503_v39 }
0x2d95   :  { %8170 = vmatpush3.bf16.msra.mxu0 %v8167_v47 }
0x2d96   :  { %v8816_v63 = vpop.eup %8815  ;;  %v8171_v6 = vpack.c.bf16 %v8490_v13, %v8489_v62  ;;  %7899 = vmatprep.subr.bf16.mxu0 %v8559_v14 }
0x2d97   :  { %v6202_v3 = vmul.f32 %v8816_v63, %v8808_v16  ;;  %v8493_v21 = vpop.permute.xlu1 %8492 }
0x2d98   :  { %7890 = vmatmul.mubr.msk.f32.vlgmr.msra.gmra.mrb[50].mxu0 %vm522_vm3, %v6201_v34  ;;  %8172 = vmatprep.subr.bf16.mxu1 %v8171_v6  ;;  %v8495_v24 = vunpack.i.h.bf16 %v8493_v21  ;;  %v8494_v44 = vunpack.i.l.bf16 %v8493_v21 }
0x2d99   :  { %8174 = vmatpush3.bf16.msra.mxu1 %v8171_v6  ;;  %7896 = vmatprep.mubr.msk.f32.mxu1 %vm522_vm3, %v6202_v3 }
0x2d9a   :  { %v8818_v7 = vpop.eup %8817  ;;  %7900 = vmatpush3.bf16.msra.mxu0 %v8559_v14  ;;  %v6427_v40 = vsel %vm349_vm1, %v9856_v55, %v8495_v24  ;;  %v6426_v41 = vsel %vm349_vm1, %v9858_v31, %v8494_v44 }
0x2d9b   :  { %v6203_v8 = vmul.f32 %v8818_v7, %v8810_v4  ;;  %7901 = vmatprep.subr.bf16.mxu0 %v8560_v15  ;;  %v8498_v23 = vpop.permute.xlu1 %8497  ;;  %v6430_v57 = vsel %vm522_vm3, %v6426_v41, %v8504_v45  ;;  %v6431_v43 = vsel %vm522_vm3, %v6427_v40, %v8505_v42  ;;  %v8561_v40 = vld [vmem:[%s10116_s12 + $0x20] sm:$0xff]   ;;  %v8562_v41 = vld [vmem:[%s10116_s12 + $0x28] sm:$0xff]  }
0x2d9c   :  { %v8500_v36 = vunpack.i.h.bf16 %v8498_v23  ;;  %v8499_v56 = vunpack.i.l.bf16 %v8498_v23  ;;  %7907 = vmatprep.subr.bf16.mxu1 %v8561_v40 }
0x2d9d   :  { %7897 = vmatmul.mubr.msk.f32.vlgmr.msra.gmra.mrb[82].mxu1 %vm522_vm3, %v6203_v8 }
0x2d9e   :  { %7902 = vmatpush3.bf16.msra.mxu0 %v8560_v15  ;;  %v6429_v30 = vsel %vm349_vm1, %v9862_v58, %v8500_v36  ;;  %v6428_v60 = vsel %vm349_vm1, %v9864_v59, %v8499_v56  ;;  %v7134_v58 = vld [vmem:[%s10113_s9 + $0x2] ss:$0 sm:$0xff]  ;;  %7908 = vmatpush3.bf16.msra.mxu1 %v8561_v40  ;;  %s8873_s9 = smov [#allocation2]  }
0x2d9f   :  { %v8508_v46 = vpop.permute.xlu1 %8507  ;;  %7909 = vmatprep.subr.bf16.mxu1 %v8562_v41  ;;  %s6859_s26 = sshll.u32 %s8873_s9, 4  ;;  %s6860_s26 = int_to_ptr.vmem [resolvable:$true] %s6859_s26 }
0x2da0   :  { %v8510_v9 = vunpack.i.h.bf16 %v8508_v46  ;;  %v8509_v48 = vunpack.i.l.bf16 %v8508_v46  ;;  %p8840_p1 = scmp.lt.s32.totalorder %s6860_s26, %s6860_s26 }
0x2da2   :  { %v6432_v28 = vsel %vm522_vm3, %v6428_v60, %v8509_v48  ;;  %v6433_v4 = vsel %vm522_vm3, %v6429_v30, %v8510_v9  ;;  %7910 = vmatpush3.bf16.msra.mxu1 %v8562_v41 }
0x2e6b   :  { %v7891_v2 = vpop.f32.mrb[50].mxu0 }
0x2e6c   :  { %v6282_v29 = vpop.f32.mrb[51].mxu0 }
0x2e6d   :  { %v8511_v49 = vpack.i.bf16 %v7891_v2, %v6282_v29 }
0x2e6f   :  { %8512 = vrot.lane.b32.xlu0 %v8511_v49, %s10145_s28 }
0x2e70   :  { %v7898_v32 = vpop.f32.mrb[82].mxu1 }
0x2e71   :  { %v6369_v18 = vpop.f32.mrb[83].mxu1 }
0x2e72   :  { %v8516_v20 = vpack.i.bf16 %v7898_v32, %v6369_v18 }
0x2e74   :  { %8517 = vrot.lane.b32.xlu1 %v8516_v20, %s10145_s28 }
0x2ee1   :  { %v8513_v53 = vpop.permute.xlu0 %8512 }
0x2ee2   :  { %v8515_v54 = vunpack.i.h.bf16 %v8513_v53  ;;  %v8514_v37 = vunpack.i.l.bf16 %v8513_v53 }
0x2ee4   :  { %v6435_v27 = vsel %vm1997_vm4, %v6431_v43, %v8515_v54  ;;  %v6434_v55 = vsel %vm1997_vm4, %v6430_v57, %v8514_v37 }
0x2ee5   :  { %v6438_v26 = vpack.c.bf16 %v6435_v27, %v6434_v55  ;;  %v7141_v55 = vld [vmem:[%s10114_s10 + $0x2] ss:$0 sm:$0xff] }
0x2ee6   :  { %v8518_v31 = vpop.permute.xlu1 %8517 }
0x2ee7   :  { %v8520_v5 = vunpack.i.h.bf16 %v8518_v31  ;;  %v8519_v16 = vunpack.i.l.bf16 %v8518_v31  ;;  %7903 = vmatprep.mubr.msk.bf16.mxu0 %vm189_vm0, %v6438_v26 }
0x2ee9   :  { %v6437_v17 = vsel %vm1997_vm4, %v6433_v4, %v8520_v5  ;;  %v6436_v61 = vsel %vm1997_vm4, %v6432_v28, %v8519_v16  ;;  %v7142_v16 = vld [vmem:[%s10115_s11 + $0x2] ss:$0 sm:$0xff] }
0x2eea   :  { %v6439_v10 = vpack.c.bf16 %v6437_v17, %v6436_v61 }
0x2eec   :  { %7904 = vmatmul.mubr.msk.bf16.vlgmr.msra.gmra.mrb[52].mxu0 %vm189_vm0, %v6439_v10 }
0x2fbf   :  { %v7905_v59 = vpop.f32.mrb[52].mxu0 }
0x2fc0   :  { %v6505_v38 = vpop.f32.mrb[53].mxu0  ;;  %v6514_v19 = vadd.f32 %v7905_v59, %v7134_v58 }
0x2fc1   :  { %v6506_v33 = vadd.f32 %v7134_v58, %v6505_v38  ;;  %v7906_v50 = vpop.f32.mrb[54].mxu0 }
0x2fc2   :  { %v6508_v35 = vpop.f32.mrb[55].mxu0  ;;  %v10015_v47 = vadd.f32 %v6514_v19, %v9739_v11  ;;  %v6517_v52 = vadd.f32 %v7906_v50, %v7134_v58 }
0x2fc3   :  { %v10012_v51 = vadd.f32 %v6506_v33, %v9736_v25  ;;  %v6509_v0 = vadd.f32 %v7134_v58, %v6508_v35 }
0x2fc4   :  { %v10025_v63 = vadd.f32 %v6517_v52, %v9747_v22  ;;  %v6534_v25 = vsel %vm189_vm0, %v10015_v47, 0.0  ;;  %v8564_v52 = vld [vmem:[%s10118_s14 + $0x88] sm:$0xff]  }
0x2fc5   :  { %v10018_v1 = vadd.f32 %v6509_v0, %v9742_v12  ;;  %v6528_v13 = vsel %vm189_vm0, %v10012_v51, 0.0  ;;  %v8563_v0 = vld [vmem:[%s10118_s14 + $0x80] sm:$0xff]  }
0x2fc6   :  { %6529 = vadd.xlane.f32.xlu0 %v6528_v13  ;;  %v6537_v11 = vsel %vm189_vm0, %v10025_v63, 0.0  ;;  %7915 = vmatprep.subr.bf16.mxu0 %v8563_v0  ;;  %v8565_v13 = vld [vmem:[%s10118_s14 + $0x90] sm:$0xff]  }
0x2fc7   :  { %v6531_v62 = vsel %vm189_vm0, %v10018_v1, 0.0  ;;  %7916 = vmatpush3.bf16.msra.mxu0 %v8563_v0 }
0x2fc8   :  { %6532 = vadd.xlane.f32.xlu1 %v6531_v62  ;;  %7917 = vmatprep.subr.bf16.mxu0 %v8564_v52  ;;  %v8566_v62 = vld [vmem:[%s10118_s14 + $0x98] sm:$0xff]  }
0x2fca   :  { %6535 = vadd.xlane.f32.xlu0 %v6534_v25  ;;  %v8567_v25 = vld [vmem:[%s10118_s14 + $0xa0] sm:$0xff]  }
0x2fcb   :  { %7918 = vmatpush3.bf16.msra.mxu0 %v8564_v52 }
0x2fcc   :  { %7919 = vmatprep.subr.bf16.mxu0 %v8565_v13 }
0x2fce   :  { %6538 = vadd.xlane.f32.xlu0 %v6537_v11  ;;  %v8568_v11 = vld [vmem:[%s10118_s14 + $0xa8] sm:$0xff]  }
0x2fcf   :  { %7920 = vmatpush3.bf16.msra.mxu0 %v8565_v13 }
0x2fd0   :  { %7921 = vmatprep.subr.bf16.mxu0 %v8566_v62 }
0x2fd3   :  { %7922 = vmatpush3.bf16.msra.mxu0 %v8566_v62 }
0x2fd4   :  { %7923 = vmatprep.subr.bf16.mxu0 %v8567_v25 }
0x2fd7   :  { %7924 = vmatpush3.bf16.msra.mxu0 %v8567_v25 }
0x2fd8   :  { %7925 = vmatprep.subr.bf16.mxu0 %v8568_v11 }
0x2fdb   :  { %7926 = vmatpush3.bf16.msra.mxu0 %v8568_v11 }
0x3053   :  { %v6530_v12 = vpop.xlane.xlu0 %6529 }
0x3054   :  { %v6540_v34 = vmul.f32 0.03125, %v6530_v12  ;;  %v8569_v12 = vld [vmem:[%s10118_s14 + $0xb0] sm:$0xff]  }
0x3055   :  { %v6533_v6 = vpop.xlane.xlu1 %6532  ;;  %7927 = vmatprep.subr.bf16.mxu0 %v8569_v12 }
0x3056   :  { %v6544_v3 = vsub.f32 %v10012_v51, %v6540_v34  ;;  %v6541_v7 = vmul.f32 0.03125, %v6533_v6  ;;  %v8570_v34 = vld [vmem:[%s10118_s14 + $0xb8] sm:$0xff]   ;;  %7928 = vmatpush3.bf16.msra.mxu0 %v8569_v12  ;;  %v7148_v6 = vld [vmem:[%s10117_s13 + $0x2] ss:$0 sm:$0xff] }
0x3057   :  { %v6536_v8 = vpop.xlane.xlu0 %6535  ;;  %7929 = vmatprep.subr.bf16.mxu0 %v8570_v34 }
0x3058   :  { %v6545_v14 = vsub.f32 %v10018_v1, %v6541_v7  ;;  %v6542_v15 = vmul.f32 0.03125, %v6536_v8  ;;  %v6548_v22 = vmul.f32 %v6544_v3, %v6544_v3 }
0x305a   :  { %v6546_v2 = vsub.f32 %v10015_v47, %v6542_v15  ;;  %v6552_v29 = vsel %vm189_vm0, %v6548_v22, 0.0  ;;  %v6549_v49 = vmul.f32 %v6545_v14, %v6545_v14  ;;  %7930 = vmatpush3.bf16.msra.mxu0 %v8570_v34 }
0x305b   :  { %6553 = vadd.xlane.f32.xlu0 %v6552_v29  ;;  %v6539_v32 = vpop.xlane.xlu0 %6538 }
0x305c   :  { %v6543_v18 = vmul.f32 0.03125, %v6539_v32  ;;  %v6555_v20 = vsel %vm189_vm0, %v6549_v49, 0.0  ;;  %v6550_v21 = vmul.f32 %v6546_v2, %v6546_v2 }
0x305d   :  { %6556 = vadd.xlane.f32.xlu1 %v6555_v20 }
0x305e   :  { %v6547_v23 = vsub.f32 %v10025_v63, %v6543_v18  ;;  %v6558_v24 = vsel %vm189_vm0, %v6550_v21, 0.0 }
0x305f   :  { %6559 = vadd.xlane.f32.xlu0 %v6558_v24 }
0x3060   :  { %v6551_v44 = vmul.f32 %v6547_v23, %v6547_v23 }
0x3062   :  { %v6561_v39 = vsel %vm189_vm0, %v6551_v44, 0.0 }
0x3063   :  { %6562 = vadd.xlane.f32.xlu1 %v6561_v39 }
0x30e8   :  { %v6554_v42 = vpop.xlane.xlu0 %6553 }
0x30e9   :  { %v6564_v45 = vmul.f32 0.03125, %v6554_v42 }
0x30ea   :  { %v6557_v46 = vpop.xlane.xlu1 %6556 }
0x30eb   :  { %v6568_v53 = vadd.f32 1e-06, %v6564_v45  ;;  %v6565_v54 = vmul.f32 0.03125, %v6557_v46 }
0x30ec   :  { %v6560_v37 = vpop.xlane.xlu0 %6559 }
0x30ed   :  { %8819 = vrsqrt.f32 %v6568_v53  ;;  %v6569_v36 = vadd.f32 1e-06, %v6565_v54  ;;  %v6566_v56 = vmul.f32 0.03125, %v6560_v37 }
0x30ef   :  { %8821 = vrsqrt.f32 %v6569_v36  ;;  %v6570_v57 = vadd.f32 1e-06, %v6566_v56 }
0x30f0   :  { %v6563_v43 = vpop.xlane.xlu1 %6562 }
0x30f1   :  { %8823 = vrsqrt.f32 %v6570_v57  ;;  %v6567_v9 = vmul.f32 0.03125, %v6563_v43 }
0x30f3   :  { %v6571_v48 = vadd.f32 1e-06, %v6567_v9 }
0x30f5   :  { %8825 = vrsqrt.f32 %v6571_v48 }
0x30f7   :  { %v8820_v27 = vpop.eup %8819 }
0x30f8   :  { %v6576_v26 = vmul.f32 %v8820_v27, %v6544_v3 }
0x30f9   :  { %v8822_v31 = vpop.eup %8821 }
0x30fa   :  { %v6577_v30 = vmul.f32 %v8822_v31, %v6545_v14  ;;  %v6586_v60 = vmul.f32 %v7141_v55, %v6576_v26 }
0x30fb   :  { %v8824_v5 = vpop.eup %8823 }
0x30fc   :  { %v6578_v28 = vmul.f32 %v8824_v5, %v6546_v2  ;;  %v6587_v4 = vmul.f32 %v7141_v55, %v6577_v30  ;;  %v6596_v17 = vadd.f32 %v7142_v16, %v6586_v60 }
0x30fe   :  { %v6597_v61 = vadd.f32 %v7142_v16, %v6587_v4  ;;  %v6588_v58 = vmul.f32 %v7141_v55, %v6578_v28 }
0x30ff   :  { %v8826_v10 = vpop.eup %8825 }
0x3100   :  { %v6579_v59 = vmul.f32 %v8826_v10, %v6547_v23  ;;  %v6600_v38 = vpack.c.bf16 %v6597_v61, %v6596_v17  ;;  %v6598_v33 = vadd.f32 %v7142_v16, %v6588_v58 }
0x3102   :  { %v6589_v19 = vmul.f32 %v7141_v55, %v6579_v59  ;;  %7911 = vmatprep.mubr.msk.bf16.mxu1 %vm189_vm0, %v6600_v38  ;;  %v7170_v38 = vld [vmem:[%s10119_s15 + $0x2] ss:$0 sm:$0xff]  ;;  %s8835_s15 = scalar_lea.vmem %s6860_s26, 512 }
0x3103   :  { %p8836_p0 = scmp.ne.s32.totalorder %s6860_s26, %s8835_s15  ;;  %p8841_p2 = scmp.lt.s32.totalorder %s8835_s15, %s8835_s15 }
0x3104   :  { %v6599_v50 = vadd.f32 %v7142_v16, %v6589_v19 }
0x3105   :  { %p8842_p3 = por %p8841_p2, %p8840_p1 }
0x3106   :  { %v6601_v35 = vpack.c.bf16 %v6599_v50, %v6598_v33 }
0x3107   :  { %p8843_p4 = pnand %p8842_p3, %p8836_p0 }
0x3108   :  { %7912 = vmatmul.mubr.msk.bf16.vlgmr.msra.gmra.mrb[84].mxu1 %vm189_vm0, %v6601_v35 }
0x31db   :  { %v7913_v3 = vpop.f32.mrb[84].mxu1 }
0x31dc   :  { %v6676_v7 = vadd.f32 %v7913_v3, %v7148_v6  ;;  %v6667_v8 = vpop.f32.mrb[85].mxu1 }
0x31dd   :  { %v6668_v14 = vadd.f32 %v7148_v6, %v6667_v8  ;;  %v7914_v15 = vpop.f32.mrb[86].mxu1 }
0x31de   :  { %v6684_v22 = vmul.f32 %v6676_v7, %v6676_v7  ;;  %v6679_v2 = vadd.f32 %v7914_v15, %v7148_v6  ;;  %v6670_v29 = vpop.f32.mrb[87].mxu1 }
0x31df   :  { %v6682_v49 = vmul.f32 %v6668_v14, %v6668_v14  ;;  %v6671_v32 = vadd.f32 %v7148_v6, %v6670_v29 }
0x31e0   :  { %v6688_v18 = vmul.f32 %v6684_v22, %v6676_v7  ;;  %v6685_v20 = vmul.f32 %v6679_v2, %v6679_v2 }
0x31e1   :  { %v6686_v21 = vmul.f32 %v6682_v49, %v6668_v14  ;;  %v6683_v23 = vmul.f32 %v6671_v32, %v6671_v32 }
0x31e2   :  { %v6692_v24 = vmul.f32 0.044715, %v6688_v18  ;;  %v6689_v44 = vmul.f32 %v6685_v20, %v6679_v2 }
0x31e3   :  { %v6690_v39 = vmul.f32 0.044715, %v6686_v21  ;;  %v6687_v40 = vmul.f32 %v6683_v23, %v6671_v32 }
0x31e4   :  { %v6696_v41 = vadd.f32 %v6692_v24, %v6676_v7  ;;  %v6693_v42 = vmul.f32 0.044715, %v6689_v44 }
0x31e5   :  { %v6694_v45 = vadd.f32 %v6690_v39, %v6668_v14  ;;  %v6691_v46 = vmul.f32 0.044715, %v6687_v40 }
0x31e6   :  { %v6700_v53 = vmul.f32 0.7978846, %v6696_v41  ;;  %v6697_v54 = vadd.f32 %v6693_v42, %v6679_v2 }
0x31e7   :  { %v6698_v37 = vmul.f32 0.7978846, %v6694_v45  ;;  %v6695_v36 = vadd.f32 %v6691_v46, %v6671_v32 }
0x31e8   :  { %8827 = vtanh.f32 %v6700_v53  ;;  %v6701_v56 = vmul.f32 0.7978846, %v6697_v54 }
0x31e9   :  { %8829 = vtanh.f32 %v6698_v37  ;;  %v6699_v57 = vmul.f32 0.7978846, %v6695_v36 }
0x31ea   :  { %8831 = vtanh.f32 %v6701_v56 }
0x31eb   :  { %8833 = vtanh.f32 %v6699_v57 }
0x31f2   :  { %v8828_v43 = vpop.eup %8827 }
0x31f3   :  { %v8830_v9 = vpop.eup %8829  ;;  %v6708_v48 = vadd.f32 1.0, %v8828_v43 }
0x31f4   :  { %v8832_v27 = vpop.eup %8831  ;;  %v6706_v55 = vadd.f32 1.0, %v8830_v9 }
0x31f5   :  { %v8834_v26 = vpop.eup %8833  ;;  %v6712_v31 = vmul.f32 0.5, %v6708_v48  ;;  %v6709_v30 = vadd.f32 1.0, %v8832_v27 }
0x31f6   :  { %v6707_v60 = vadd.f32 1.0, %v8834_v26  ;;  %v6710_v5 = vmul.f32 0.5, %v6706_v55 }
0x31f7   :  { %v6713_v16 = vmul.f32 0.5, %v6709_v30  ;;  %v6716_v4 = vmul.f32 %v6712_v31, %v6676_v7 }
0x31f8   :  { %v6711_v28 = vmul.f32 0.5, %v6707_v60  ;;  %v6714_v61 = vmul.f32 %v6710_v5, %v6668_v14 }
0x31f9   :  { %v6717_v17 = vmul.f32 %v6713_v16, %v6679_v2 }
0x31fa   :  { %v6715_v10 = vmul.f32 %v6711_v28, %v6671_v32 }
0x31fb   :  { %v6719_v58 = vpack.c.bf16 %v6717_v17, %v6716_v4 }
0x31fc   :  { %v6718_v59 = vpack.c.bf16 %v6715_v10, %v6714_v61 }
0x31fe   :  { %7931 = vmatprep.mubr.bf16.mxu0 %v6718_v59 }
0x31ff   :  { %7932 = vmatmul.mubr.bf16.vlgmr.msra.gmra.mrb[56].mxu0 %v6719_v58 }
0x32d2   :  { %v7933_v19 = vpop.f32.mrb[56].mxu0 }
0x32d3   :  { %v6836_v33 = vadd.f32 %v7933_v19, %v7170_v38  ;;  %v6827_v50 = vpop.f32.mrb[57].mxu0 }
0x32d4   :  { %v6828_v35 = vadd.f32 %v7170_v38, %v6827_v50  ;;  %v7934_v0 = vpop.f32.mrb[58].mxu0 }
0x32d5   :  { %v6844_v52 = vadd.f32 %v6836_v33, %v10015_v47  ;;  %v6839_v13 = vadd.f32 %v7934_v0, %v7170_v38  ;;  %v6830_v62 = vpop.f32.mrb[59].mxu0 }
0x32d6   :  { %v6842_v25 = vadd.f32 %v6828_v35, %v10012_v51  ;;  %v6831_v11 = vadd.f32 %v7170_v38, %v6830_v62 }
0x32d7   :  { %v6848_v12 = vsel %vm189_vm0, %v6844_v52, 0.0  ;;  %v6845_v34 = vadd.f32 %v6839_v13, %v10025_v63 }
0x32d8   :  { %6852 = vst [vmem:[#allocation2 + $0x10] sm:$0xff] %v6848_v12  ;;  %v6846_v6 = vsel %vm189_vm0, %v6842_v25, 0.0  ;;  %v6843_v3 = vadd.f32 %v6831_v11, %v10018_v1 }
0x32d9   :  { %6850 = vst [vmem:[#allocation2] sm:$0xff] %v6846_v6  ;;  %v6849_v7 = vsel %vm189_vm0, %v6845_v34, 0.0 }
0x32da   :  { %6853 = vst [vmem:[#allocation2 + $0x18] sm:$0xff] %v6849_v7  ;;  %v6847_v47 = vsel %vm189_vm0, %v6843_v3, 0.0 }
0x32db   :  { %6851 = vst [vmem:[#allocation2 + $0x8] sm:$0xff] %v6847_v47 }
0x32dc   :  { %8846 = shalt.err (!%p8843_p4)
}
0x32dd   :  { %s8847_s12 = scalar_lea.hbm %s10120_s16, 512 }
0x32de   :  { %p8848_p5 = scmp.ne.s32.totalorder %s10120_s16, %s8847_s12  ;;  %p8851_p6 = scmp.lt.u32.totalorder %s8847_s12, %s10120_s16 }
0x32e0   :  { %p8853_p7 = pnand %p8851_p6, %p8848_p5 }
0x32e2   :  { %8856 = shalt.err (!%p8853_p7)
}
0x32e3   :  { %s8874_s6 = smov 128  }
0x32e4   :  { %6865 = dma.vmem_to_hbm [thread:$0]  %s6860_s26, 512, %s10120_s16, [#allocation3], %s8874_s6, %s8874_s6, %s10143_s22  }
0x32e5   :  { %8857 = dma.done.wait [#allocation3], 512  }
0x32e6   :  { %8858 = vsyncadd [#allocation3], 4294966784 }
0x32e7   :  { %6869 = vsyncpa [#allocation3], 1 }

</bundles_post_ra>
